<compile_context>
chip_gen: v7x
topology: tpu7x:2x2x1
jax: 0.10.0
libtpu: 0.0.40
codegen_flags: <defaults>
</compile_context>

<pallas_src>
import math
from functools import partial

import numpy as np
import jax
import jax.numpy as jnp
from jax.experimental import pallas as pl
from jax.experimental.pallas import tpu as pltpu

# ----------------------------- model configuration -----------------------------
NUMB       = 4                      # atoms in the unit cell
N_CELL     = 1                      # n (number of glued Hamiltonians)
N_NODES    = NUMB + NUMB * NUMB     # atom nodes + pair (Hamiltonian block) nodes = 20
N_EDGES    = 40
INPUT_DIM  = 6
IN_EMB     = 8                      # input_embed_dim  -> irreps_in  = 8x0e
NODE_DIM   = 5
NODE_EMB   = 8                      # node_embed_dim   -> node attr  = 8x0e
NBASIS     = 8                      # number_of_basis
RAD        = 16                     # radial_neurons
R_MAX      = 4.0

SIN8  = math.sin(math.pi / 8.0)
COS8  = math.cos(math.pi / 8.0)
_SQ2  = 1.0 / math.sqrt(2.0)
_SQ3  = 1.0 / math.sqrt(3.0)
_SQ6  = 1.0 / math.sqrt(6.0)
SQRT3 = math.sqrt(3.0)

_tr = 3.0 ** -0.5
_tw = 2.0 ** -0.5
IRREP2TENS = np.array(
    [[_tr, 0, 0, 0, _tr, 0, 0, 0, _tr],
     [0, 0, 0, 0, 0, _tw, 0, -_tw, 0],
     [0, 0, -_tw, 0, 0, 0, _tw, 0, 0],
     [0, _tw, 0, -_tw, 0, 0, 0, 0, 0],
     [0, 0, _tw, 0, 0, 0, _tw, 0, 0],
     [0, _tw, 0, _tw, 0, 0, 0, 0, 0],
     [-_tw * _tr, 0, 0, 0, 2 * _tw * _tr, 0, 0, 0, -_tw * _tr],
     [0, 0, 0, 0, 0, _tw, 0, _tw, 0],
     [-_tw, 0, 0, 0, 0, 0, 0, 0, _tw]], dtype=np.float32)

# Per-j output widths of the fused FullyConnectedTensorProducts.
LIN1_OT   = 16     # [in 8 | mask 8]
L1_OUT_OT = 20     # [scalars 8 | 1o m-major 4x3]         (cos(pi/8) folded on scalars)
L2_IN_OT  = 34     # [scalars 4 | 1o m-major 4x3 | sin(pi/8)*mask @ irrep2tens (18)]
L2_OUT_OT = 18     # [re 9 | im 9] with cos(pi/8) + irrep2tens already folded in

# ------------------------ packed-weight VMEM buffer layout ------------------------
_WPACK_SHAPES = (
    ("centers",  (1, NBASIS)),
    ("emxz_w",   (INPUT_DIM + NODE_DIM, IN_EMB + NODE_EMB)),
    ("emxz_b",   (1, IN_EMB + NODE_EMB)),
    ("w_lin1",   (IN_EMB, NODE_EMB * LIN1_OT)),
    ("rw1",      (NBASIS, 2 * RAD)),
    ("rw2",      (2 * RAD, 32)),
    ("w_l1_out", (32, NODE_EMB * L1_OUT_OT)),
    ("w_l2_in",  (16, NODE_EMB * L2_IN_OT)),
    ("w_l2_out", (40, NODE_EMB * L2_OUT_OT)),
)


def _build_layout(shapes):
    layout, row, maxc = {}, 0, 0
    for name, (r, c) in shapes:
        layout[name] = (row, r, c)
        row += ((r + 7) // 8) * 8        # sublane-aligned row bands -> cheap static slices
        maxc = max(maxc, c)
    return layout, row, maxc


WPACK_LAYOUT, WPACK_ROWS, WPACK_COLS = _build_layout(_WPACK_SHAPES)


# ----------------------------- fused Pallas kernel -----------------------------
def make_fused_kernel(step):
    """Whole GraphNetwork_MVN device forward as ONE VMEM-resident Pallas kernel."""
    inv_step = 1.0 / float(step)

    def kernel(xz_ref, ev_ref, deg_ref, src1h_ref, dst1h_ref, wp_ref, o_ref):
        f32 = jnp.float32

        def w(name):
            off, r, c = WPACK_LAYOUT[name]
            return wp_ref[off:off + r, 0:c]

        def mm(a, b):
            return jnp.dot(a, b, preferred_element_type=f32)

        def sig(v):
            # exact sigmoid (review flagged the approximate reciprocal feeding the gates)
            return 1.0 / (1.0 + jnp.exp(-v))

        # ----- fused input / node-attr embedding: relu(Linear(relu([x | z]))) -----
        xz = jnp.maximum(mm(jnp.maximum(xz_ref[...], 0.0), w("emxz_w")) + w("emxz_b"), 0.0)
        x = xz[:, 0:IN_EMB]
        z = xz[:, IN_EMB:IN_EMB + NODE_EMB]
        zc = [z[:, j:j + 1] for j in range(NODE_EMB)]
        degi = jax.lax.rsqrt(deg_ref[...])                                   # (N, 1)

        def fctp(lhs, wname, otot):
            # FullyConnectedTensorProduct (Kx0e x 8x0e -> Ox0e) restructured as one MXU
            # matmul + 8 broadcast FMAs (no per-column outer products, no lane concats).
            u = mm(lhs, w(wname))
            acc = zc[0] * u[:, 0:otot]
            for j in range(1, NODE_EMB):
                acc = acc + zc[j] * u[:, j * otot:(j + 1) * otot]
            return acc

        # ----- edge geometry: gaussian radial embedding + lmax=1 spherical harmonics -----
        ev = ev_ref[...]                                                     # (E, 3)
        sumsq = jnp.sum(ev * ev, axis=1, keepdims=True)
        inv_len = jax.lax.rsqrt(sumsq + 1e-24)                               # EUP rsqrt
        elen = sumsq * inv_len                                               # (E, 1)
        diff = (elen - w("centers")) * inv_step
        edge_emb = jnp.exp(-diff * diff) * (1.0 / 1.12)                      # (E, NBASIS)
        unit = ev * inv_len
        sa = SQRT3 * unit[:, 0:1]
        sb = SQRT3 * unit[:, 1:2]
        sc = SQRT3 * unit[:, 2:3]

        src1h = src1h_ref[...]                                               # (E, N) gather
        dst1h = dst1h_ref[...]                                               # (N, E) scatter

        # ----- radial MLPs of BOTH conv layers fused (shared LHS + block-diag 2nd layer) -----
        h12 = mm(edge_emb, w("rw1"))                                         # (E, 32)
        h12 = h12 * sig(h12)                                                 # silu
        ew = mm(h12, w("rw2"))                                               # (E, 32) = [layer1 16 | layer2 16]

        # ===================== layer-1 GraphConvolution =====================
        lin1 = fctp(x, "w_lin1", LIN1_OT)                                    # (N, 16) = [in | mask]
        nf = lin1[:, 0:8] * degi
        nmask_s = lin1[:, 8:16]

        xg = mm(src1h, nf)                                                   # gather: (E, 8)
        w0x = ew[:, 0:8] * xg                                                # y00 == 1
        wx = ew[:, 8:16] * xg
        ef1 = jnp.concatenate([w0x, wx * sa, wx * sb, wx * sc], axis=1)      # (E, 32)
        nf2 = mm(dst1h, ef1) * degi                                          # scatter: (N, 32)

        out20 = fctp(nf2, "w_l1_out", L1_OUT_OT)                             # (N, 20)
        h_scal = SIN8 * nmask_s + out20[:, 0:8]                              # cos(pi/8) folded in weight
        out_v = out20[:, 8:20]                                               # (N, 12) m-major

        # ----- Gate: silu on scalars, sigmoid gates on the 1o channels -----
        scal = h_scal[:, 0:4]
        gate = sig(h_scal[:, 4:8])
        hs = scal * sig(scal)                                                # (N, 4)
        lhs2 = jnp.concatenate([hs,
                                gate * out_v[:, 0:4],
                                gate * out_v[:, 4:8],
                                gate * out_v[:, 8:12]], axis=1)              # (N, 16)

        # ================ final GraphHamiltonianConvolution ================
        in34 = fctp(lhs2, "w_l2_in", L2_IN_OT)                               # (N, 34)
        nf_all = in34[:, 0:16] * degi                                        # [4x0e | 4x1o m-major]
        mask_out = in34[:, 16:34]                                            # sin(pi/8)*mask @ irrep2tens

        gall = mm(src1h, nf_all)                                             # gather: (E, 16)
        sg = gall[:, 0:4]
        vx = gall[:, 4:8]
        vy = gall[:, 8:12]
        vz = gall[:, 12:16]
        ew2 = ew[:, 16:32]
        w0 = ew2[:, 0:4]
        ws = ew2[:, 4:8]
        w1 = ew2[:, 8:12]
        w2 = ew2[:, 12:16]
        # 'uvu' TP: (4x0e + 4x1o) x (0e + 1o) -> 8x0e + 4x1e + 4x2e (m-major), lane-dense
        # TODO(synk): 2e constants approximate the e3nn wigner-3j normalization.
        ef2 = jnp.concatenate([
            w0 * sg,
            ws * (vx * sa + vy * sb + vz * sc) * _SQ3,
            w1 * (vy * sc - vz * sb) * _SQ2,
            w1 * (vz * sa - vx * sc) * _SQ2,
            w1 * (vx * sb - vy * sa) * _SQ2,
            w2 * (vx * sb + vy * sa) * _SQ2,
            w2 * (vy * sc + vz * sb) * _SQ2,
            w2 * (2.0 * vz * sc - vx * sa - vy * sb) * _SQ6,
            w2 * (vx * sc + vz * sa) * _SQ2,
            w2 * (vx * sa - vy * sb) * _SQ2], axis=1)                        # (E, 40)
        nf2b = mm(dst1h, ef2) * degi                                         # scatter: (N, 40)

        # out_s / out_1e / out_2e fused; cos(pi/8) + irrep->tensor projection folded in.
        out18 = fctp(nf2b, "w_l2_out", L2_OUT_OT)                            # (N, 18) = [re 9 | im 9]
        o_ref[...] = out18 + mask_out                                        # single lane-dense store

    return kernel


# ----------------------------- host-side weight fusion / packing -----------------------------
def _fuse_fctp(entries, otot, j=NODE_EMB):
    """Fuse FullyConnectedTensorProducts (0e x 0e) that share the node-attr operand.

    Each entry is (W, out_cols) with W of shape (K * j, len(out_cols)); the K-wide LHS
    blocks are concatenated row-wise in order.  The returned weight (sum_K, j*otot) is
    used in-kernel as: U = lhs @ weight; out = sum_j z[:, j] * U[:, j*otot:(j+1)*otot].
    """
    ktot = sum(np.asarray(wm).shape[0] // j for wm, _ in entries)
    out = np.zeros((ktot, j * otot), np.float32)
    kr = 0
    for wm, out_cols in entries:
        wm = np.asarray(wm, np.float32)
        k = wm.shape[0] // j
        wr = wm.reshape(k, j, len(out_cols))
        for jj in range(j):
            for oi, oc in enumerate(out_cols):
                out[kr:kr + k, jj * otot + oc] = wr[:, jj, oi]
        kr += k
    return out


def pack_params(params, r_max=R_MAX):
    """Fold/fuse all weights ONCE on the host and pack them into a single lane-dense
    f32 VMEM buffer addressed with static slices inside the kernel (one DMA)."""
    p = {k: np.asarray(v, np.float32) for k, v in params.items()}

    # fused emx / emz embedding (block-diagonal single Linear)
    emxz_w = np.zeros((INPUT_DIM + NODE_DIM, IN_EMB + NODE_EMB), np.float32)
    emxz_w[0:INPUT_DIM, 0:IN_EMB] = p["emx_w"]
    emxz_w[INPUT_DIM:, IN_EMB:] = p["emz_w"]
    emxz_b = np.concatenate([p["emx_b"], p["emz_b"]], axis=1)

    # layer-1 linear_input + linear_mask (same LHS -> concatenated output columns)
    w_lin1 = _fuse_fctp(
        [(np.concatenate([p["l1_lin_in"], p["l1_lin_mask"]], axis=1), list(range(16)))],
        LIN1_OT)

    # both radial MLPs fused: shared first-layer LHS, block-diagonal second layer
    rw1 = np.concatenate([p["l1_rad_w1"], p["l2_rad_w1"]], axis=1)
    rw2 = np.zeros((2 * RAD, 32), np.float32)
    rw2[0:RAD, 0:16] = p["l1_rad_w2"]
    rw2[RAD:, 16:32] = p["l2_rad_w2"]

    # layer-1 linear_output (scalars + 3 shared-weight 1o components); cos(pi/8) folded
    w_l1_out = _fuse_fctp(
        [(COS8 * p["l1_out_s"], list(range(8)))]
        + [(p["l1_out_v"], list(range(8 + 4 * m, 12 + 4 * m))) for m in range(3)],
        L1_OUT_OT)

    # layer-2 linear_input + linear_mask + in_v; mask path pre-multiplied by
    # sin(pi/8) * blockdiag(irrep2tens[0], irrep2tens[0]) so the kernel adds it straight
    # onto the final 18-lane output (removes one matmul + the re/im concats).
    mask2out = np.zeros((2, 18), np.float32)
    mask2out[0, 0:9] = SIN8 * IRREP2TENS[0, :]
    mask2out[1, 9:18] = SIN8 * IRREP2TENS[0, :]
    w_s_mask = np.concatenate([p["l2_in_s"], p["l2_mask"] @ mask2out], axis=1)  # (32, 22)
    w_l2_in = _fuse_fctp(
        [(w_s_mask, list(range(4)) + list(range(16, 34)))]
        + [(p["l2_in_v"], list(range(4 + 4 * m, 8 + 4 * m))) for m in range(3)],
        L2_IN_OT)

    # layer-2 linear_output: 2x0e + 2x1e + 2x2e (u-major = [re | im]); cos(pi/8) and the
    # irrep->3x3-tensor change of basis folded into the weight columns.
    entries = [(COS8 * p["l2_out_s"], [0, 9])]
    entries += [(p["l2_out_1e"], [1 + m, 10 + m]) for m in range(3)]
    entries += [(p["l2_out_2e"], [4 + m, 13 + m]) for m in range(5)]
    w_l2_out = _fuse_fctp(entries, L2_OUT_OT)
    t2 = np.zeros((18, 18), np.float32)
    t2[0:9, 0:9] = IRREP2TENS
    t2[9:18, 9:18] = IRREP2TENS
    w_l2_out = np.einsum("kjo,op->kjp",
                         w_l2_out.reshape(40, NODE_EMB, L2_OUT_OT), t2
                         ).reshape(40, NODE_EMB * L2_OUT_OT)

    centers = np.linspace(0.0, r_max, NBASIS, dtype=np.float32).reshape(1, NBASIS)

    packed = np.zeros((WPACK_ROWS, WPACK_COLS), np.float32)
    for name, arr in (("centers", centers), ("emxz_w", emxz_w), ("emxz_b", emxz_b),
                      ("w_lin1", w_lin1), ("rw1", rw1), ("rw2", rw2),
                      ("w_l1_out", w_l1_out), ("w_l2_in", w_l2_in),
                      ("w_l2_out", w_l2_out)):
        off, r, c = WPACK_LAYOUT[name]
        assert arr.shape == (r, c), (name, arr.shape, (r, c))
        packed[off:off + r, 0:c] = arr
    return jnp.asarray(packed)


def glue(blocks, numb, n):
    """Identical to GraphHamiltonianConvolution.glue (pure reshuffle, stays in jitted JAX)."""
    B = blocks.shape[0]                                            # n * numb * numb
    tmp = jnp.concatenate([blocks[i] for i in range(B)], axis=1)   # (3, 3B)
    tmp = tmp.T                                                    # (3B, 3)
    chunks = jnp.split(tmp, n * numb, axis=0)
    tmp = jnp.concatenate(chunks, axis=1)                          # (3*numb, 3*n*numb)
    return tmp.T.reshape(n, 3 * numb, 3 * numb)


# ----------------------------- parameters -----------------------------
def init_params(key):
    ks = jax.random.split(key, 16)

    def w(k, shape, fan_in):
        return jax.random.normal(k, shape, jnp.float32) / math.sqrt(fan_in)

    p = {}
    p["emx_w"] = w(ks[0], (INPUT_DIM, IN_EMB), INPUT_DIM)
    p["emx_b"] = jnp.zeros((1, IN_EMB), jnp.float32)
    p["emz_w"] = w(ks[1], (NODE_DIM, NODE_EMB), NODE_DIM)
    p["emz_b"] = jnp.zeros((1, NODE_EMB), jnp.float32)
    # layer 1 graph convolution (irreps_in = 8x0e, out = 4x0e + 4x0e + 4x1o)
    p["l1_lin_in"] = w(ks[2], (IN_EMB * NODE_EMB, IN_EMB), IN_EMB * NODE_EMB)
    p["l1_lin_mask"] = w(ks[3], (IN_EMB * NODE_EMB, 8), IN_EMB * NODE_EMB)
    p["l1_rad_w1"] = w(ks[4], (NBASIS, RAD), NBASIS)
    p["l1_rad_w2"] = w(ks[5], (RAD, 16), RAD)
    p["l1_out_s"] = w(ks[6], (8 * NODE_EMB, 8), 8 * NODE_EMB)
    p["l1_out_v"] = w(ks[7], (8 * NODE_EMB, 4), 8 * NODE_EMB)
    # final GraphHamiltonianConvolution (irreps_in = 4x0e + 4x1o, out = 2x0e + 2x1e + 2x2e)
    p["l2_in_s"] = w(ks[8], (4 * NODE_EMB, 4), 4 * NODE_EMB)
    p["l2_in_v"] = w(ks[9], (4 * NODE_EMB, 4), 4 * NODE_EMB)
    p["l2_mask"] = w(ks[10], (4 * NODE_EMB, 2), 4 * NODE_EMB)
    p["l2_rad_w1"] = w(ks[11], (NBASIS, RAD), NBASIS)
    p["l2_rad_w2"] = w(ks[12], (RAD, 16), RAD)
    p["l2_out_s"] = w(ks[13], (8 * NODE_EMB, 2), 8 * NODE_EMB)
    p["l2_out_1e"] = w(ks[14], (4 * NODE_EMB, 2), 4 * NODE_EMB)
    p["l2_out_2e"] = w(ks[15], (4 * NODE_EMB, 2), 4 * NODE_EMB)
    return p


# ----------------------------- device forward (single jit, single pallas_call) ---------
@partial(jax.jit, static_argnames=("r_max", "numb"))
def device_forward(wpack, x_raw, z_raw, edge_vec, edge_src, edge_dst, node_deg,
                   *, r_max, numb):
    N = x_raw.shape[0]
    step = r_max / (NBASIS - 1)

    xz_in = jnp.concatenate([x_raw, z_raw], axis=1)                   # (N, 11)
    # one-hot gather/scatter operators (built once, reused by both conv layers in-kernel)
    src1h = jax.nn.one_hot(edge_src, N, dtype=jnp.float32)            # (E, N)
    dst1h = jax.nn.one_hot(edge_dst, N, dtype=jnp.float32).T          # (N, E)

    vmem = pl.BlockSpec(memory_space=pltpu.MemorySpace.VMEM)
    # Whole working set < 1 MiB -> no grid / no tiling; everything stays VMEM-resident.
    out = pl.pallas_call(
        make_fused_kernel(float(step)),
        out_shape=jax.ShapeDtypeStruct((N, 18), jnp.float32),
        in_specs=[vmem] * 6,
        out_specs=vmem,
        cost_estimate=pl.CostEstimate(flops=950_000, transcendentals=2_000,
                                      bytes_accessed=190_000),
    )(xz_in, edge_vec, node_deg, src1h, dst1h, wpack)

    re = out[numb:, 0:9]
    im = out[numb:, 9:18]
    blocks = (re + 1j * im).astype(jnp.complex64).reshape(-1, 3, 3)
    return glue(blocks, numb, N_CELL)


def graph_network_mvn_forward(wpack, data):
    Hs = device_forward(wpack, data["x"], data["z"], data["edge_vec"],
                        data["edge_src"], data["edge_dst"], data["node_deg"],
                        r_max=float(data["r_max"]), numb=int(data["numb"]))
    # TODO(synk): general (non-Hermitian) eigendecomposition has no TPU/Pallas lowering;
    #             torch.linalg.eigvals is reproduced on the host with numpy.
    H_np = np.asarray(jax.device_get(Hs)).astype(np.complex128)
    eig = np.linalg.eigvals(H_np)
    abx = np.abs(eig)
    eps = abx[abx > 0].min() / 100.0 if np.any(abx > 0) else 1e-8
    eig = np.sqrt(eig + eps)
    return jnp.asarray(np.sort(np.real(eig), axis=-1), dtype=jnp.float32)


# ----------------------------- main -----------------------------
if __name__ == "__main__":
    key = jax.random.PRNGKey(0)
    kx, kz, kv, ks, kd = jax.random.split(key, 5)

    edge_src = jax.random.randint(ks, (N_EDGES,), 0, N_NODES)
    edge_dst = jax.random.randint(kd, (N_EDGES,), 0, N_NODES)
    node_deg = jnp.maximum(
        jnp.zeros((N_NODES,), jnp.float32).at[edge_dst].add(1.0), 1.0).reshape(N_NODES, 1)

    data = {
        "x": jax.random.normal(kx, (N_NODES, INPUT_DIM), jnp.float32),
        "z": jax.random.normal(kz, (N_NODES, NODE_DIM), jnp.float32),
        "edge_vec": 2.0 * jax.random.normal(kv, (N_EDGES, 3), jnp.float32),
        "edge_src": edge_src,
        "edge_dst": edge_dst,
        "node_deg": node_deg,
        "r_max": R_MAX,
        "numb": NUMB,
    }

    params = init_params(jax.random.PRNGKey(42))
    wpack = pack_params(params, r_max=R_MAX)        # host-side weight fusion, done once
    out = graph_network_mvn_forward(wpack, data)    # (1, 3 * numb) sorted spectra
    out = jax.block_until_ready(out)
    assert out.shape == (N_CELL, 3 * NUMB)
    print("KERNEL_OK")
</pallas_src>

<mosaic_0001>
module attributes {stable_mosaic.version = 11 : i64} {
  func.func @kernel(%arg0: memref<20x11xf32, #tpu.memory_space<vmem>>, %arg1: memref<40x3xf32, #tpu.memory_space<vmem>>, %arg2: memref<20x1xf32, #tpu.memory_space<vmem>>, %arg3: memref<40x20xf32, #tpu.memory_space<vmem>>, %arg4: memref<20x40xf32, #tpu.memory_space<vmem>>, %arg5: memref<168x272xf32, #tpu.memory_space<vmem>>, %arg6: memref<20x18xf32, #tpu.memory_space<vmem>>) attributes {dimension_semantics = [], scalar_prefetch = 0 : i64, scratch_operands = 0 : i64, tpu.core_type = #tpu.core_type<tc>} {
    %c0 = arith.constant 0 : index
    %c0_0 = arith.constant 0 : index
    %0 = vector.load %arg0[%c0, %c0_0] : memref<20x11xf32, #tpu.memory_space<vmem>>, vector<20x11xf32>
    %cst = arith.constant 0.000000e+00 : f32
    %1 = vector.broadcast %cst : f32 to vector<20x11xf32>
    %2 = arith.maximumf %0, %1 : vector<20x11xf32>
    %c8 = arith.constant 8 : index
    %c0_1 = arith.constant 0 : index
    %3 = vector.load %arg5[%c8, %c0_1] : memref<168x272xf32, #tpu.memory_space<vmem>>, vector<11x16xf32>
    %cst_2 = arith.constant dense<0.000000e+00> : vector<20x16xf32>
    %4 = tpu.matmul %2, %3, %cst_2 {dimension_numbers = #tpu.dot_dimension_numbers<[1], [0], [0], [1], [0, 0, 1, 1], [], []>} : vector<20x11xf32>, vector<11x16xf32>, vector<20x16xf32> -> vector<20x16xf32>
    %c24 = arith.constant 24 : index
    %c0_3 = arith.constant 0 : index
    %5 = vector.load %arg5[%c24, %c0_3] : memref<168x272xf32, #tpu.memory_space<vmem>>, vector<1x16xf32>
    %6 = vector.broadcast %5 : vector<1x16xf32> to vector<20x16xf32>
    %7 = arith.addf %4, %6 : vector<20x16xf32>
    %cst_4 = arith.constant 0.000000e+00 : f32
    %8 = vector.broadcast %cst_4 : f32 to vector<20x16xf32>
    %9 = arith.maximumf %7, %8 : vector<20x16xf32>
    %10 = vector.extract_strided_slice %9 {offsets = [0, 0], sizes = [20, 8], strides = [1, 1]} : vector<20x16xf32> to vector<20x8xf32>
    %11 = vector.extract_strided_slice %9 {offsets = [0, 8], sizes = [20, 8], strides = [1, 1]} : vector<20x16xf32> to vector<20x8xf32>
    %12 = vector.extract_strided_slice %11 {offsets = [0, 0], sizes = [20, 1], strides = [1, 1]} : vector<20x8xf32> to vector<20x1xf32>
    %13 = vector.extract_strided_slice %11 {offsets = [0, 1], sizes = [20, 1], strides = [1, 1]} : vector<20x8xf32> to vector<20x1xf32>
    %14 = vector.extract_strided_slice %11 {offsets = [0, 2], sizes = [20, 1], strides = [1, 1]} : vector<20x8xf32> to vector<20x1xf32>
    %15 = vector.extract_strided_slice %11 {offsets = [0, 3], sizes = [20, 1], strides = [1, 1]} : vector<20x8xf32> to vector<20x1xf32>
    %16 = vector.extract_strided_slice %11 {offsets = [0, 4], sizes = [20, 1], strides = [1, 1]} : vector<20x8xf32> to vector<20x1xf32>
    %17 = vector.extract_strided_slice %11 {offsets = [0, 5], sizes = [20, 1], strides = [1, 1]} : vector<20x8xf32> to vector<20x1xf32>
    %18 = vector.extract_strided_slice %11 {offsets = [0, 6], sizes = [20, 1], strides = [1, 1]} : vector<20x8xf32> to vector<20x1xf32>
    %19 = vector.extract_strided_slice %11 {offsets = [0, 7], sizes = [20, 1], strides = [1, 1]} : vector<20x8xf32> to vector<20x1xf32>
    %c0_5 = arith.constant 0 : index
    %c0_6 = arith.constant 0 : index
    %20 = vector.load %arg2[%c0_5, %c0_6] : memref<20x1xf32, #tpu.memory_space<vmem>>, vector<20x1xf32>
    %21 = math.rsqrt %20 : vector<20x1xf32>
    %c0_7 = arith.constant 0 : index
    %c0_8 = arith.constant 0 : index
    %22 = vector.load %arg1[%c0_7, %c0_8] : memref<40x3xf32, #tpu.memory_space<vmem>>, vector<40x3xf32>
    %23 = arith.mulf %22, %22 : vector<40x3xf32>
    %cst_9 = arith.constant dense<0.000000e+00> : vector<40xf32>
    %24 = vector.multi_reduction <add>, %23, %cst_9 [1] : vector<40x3xf32> to vector<40xf32>
    %25 = vector.shape_cast %24 : vector<40xf32> to vector<40x1xf32>
    %cst_10 = arith.constant 1.000000e-24 : f32
    %26 = vector.broadcast %cst_10 : f32 to vector<40x1xf32>
    %27 = arith.addf %25, %26 : vector<40x1xf32>
    %28 = math.rsqrt %27 : vector<40x1xf32>
    %29 = arith.mulf %25, %28 : vector<40x1xf32>
    %c0_11 = arith.constant 0 : index
    %c0_12 = arith.constant 0 : index
    %30 = vector.load %arg5[%c0_11, %c0_12] : memref<168x272xf32, #tpu.memory_space<vmem>>, vector<1x8xf32>
    %31 = vector.broadcast %29 : vector<40x1xf32> to vector<40x8xf32>
    %32 = vector.broadcast %30 : vector<1x8xf32> to vector<40x8xf32>
    %33 = arith.subf %31, %32 : vector<40x8xf32>
    %cst_13 = arith.constant 1.750000e+00 : f32
    %34 = vector.broadcast %cst_13 : f32 to vector<40x8xf32>
    %35 = arith.mulf %33, %34 : vector<40x8xf32>
    %cst_14 = arith.constant 0.000000e+00 : f32
    %36 = vector.broadcast %cst_14 : f32 to vector<40x8xf32>
    %37 = arith.subf %36, %35 : vector<40x8xf32>
    %38 = arith.mulf %37, %35 : vector<40x8xf32>
    %39 = math.exp %38 : vector<40x8xf32>
    %cst_15 = arith.constant 0.892857134 : f32
    %40 = vector.broadcast %cst_15 : f32 to vector<40x8xf32>
    %41 = arith.mulf %39, %40 : vector<40x8xf32>
    %42 = vector.broadcast %28 : vector<40x1xf32> to vector<40x3xf32>
    %43 = arith.mulf %22, %42 : vector<40x3xf32>
    %44 = vector.extract_strided_slice %43 {offsets = [0, 0], sizes = [40, 1], strides = [1, 1]} : vector<40x3xf32> to vector<40x1xf32>
    %cst_16 = arith.constant 1.73205078 : f32
    %45 = vector.broadcast %cst_16 : f32 to vector<40x1xf32>
    %46 = arith.mulf %45, %44 : vector<40x1xf32>
    %47 = vector.extract_strided_slice %43 {offsets = [0, 1], sizes = [40, 1], strides = [1, 1]} : vector<40x3xf32> to vector<40x1xf32>
    %cst_17 = arith.constant 1.73205078 : f32
    %48 = vector.broadcast %cst_17 : f32 to vector<40x1xf32>
    %49 = arith.mulf %48, %47 : vector<40x1xf32>
    %50 = vector.extract_strided_slice %43 {offsets = [0, 2], sizes = [40, 1], strides = [1, 1]} : vector<40x3xf32> to vector<40x1xf32>
    %cst_18 = arith.constant 1.73205078 : f32
    %51 = vector.broadcast %cst_18 : f32 to vector<40x1xf32>
    %52 = arith.mulf %51, %50 : vector<40x1xf32>
    %c0_19 = arith.constant 0 : index
    %c0_20 = arith.constant 0 : index
    %53 = vector.load %arg3[%c0_19, %c0_20] : memref<40x20xf32, #tpu.memory_space<vmem>>, vector<40x20xf32>
    %c0_21 = arith.constant 0 : index
    %c0_22 = arith.constant 0 : index
    %54 = vector.load %arg4[%c0_21, %c0_22] : memref<20x40xf32, #tpu.memory_space<vmem>>, vector<20x40xf32>
    %c40 = arith.constant 40 : index
    %c0_23 = arith.constant 0 : index
    %55 = vector.load %arg5[%c40, %c0_23] : memref<168x272xf32, #tpu.memory_space<vmem>>, vector<8x32xf32>
    %cst_24 = arith.constant dense<0.000000e+00> : vector<40x32xf32>
    %56 = tpu.matmul %41, %55, %cst_24 {dimension_numbers = #tpu.dot_dimension_numbers<[1], [0], [0], [1], [0, 0, 1, 1], [], []>} : vector<40x8xf32>, vector<8x32xf32>, vector<40x32xf32> -> vector<40x32xf32>
    %cst_25 = arith.constant 0.000000e+00 : f32
    %57 = vector.broadcast %cst_25 : f32 to vector<40x32xf32>
    %58 = arith.subf %57, %56 : vector<40x32xf32>
    %59 = math.exp %58 : vector<40x32xf32>
    %cst_26 = arith.constant 1.000000e+00 : f32
    %60 = vector.broadcast %cst_26 : f32 to vector<40x32xf32>
    %61 = arith.addf %60, %59 : vector<40x32xf32>
    %cst_27 = arith.constant 1.000000e+00 : f32
    %62 = vector.broadcast %cst_27 : f32 to vector<40x32xf32>
    %63 = arith.divf %62, %61 : vector<40x32xf32>
    %64 = arith.mulf %56, %63 : vector<40x32xf32>
    %c48 = arith.constant 48 : index
    %c0_28 = arith.constant 0 : index
    %65 = vector.load %arg5[%c48, %c0_28] : memref<168x272xf32, #tpu.memory_space<vmem>>, vector<32x32xf32>
    %cst_29 = arith.constant dense<0.000000e+00> : vector<40x32xf32>
    %66 = tpu.matmul %64, %65, %cst_29 {dimension_numbers = #tpu.dot_dimension_numbers<[1], [0], [0], [1], [0, 0, 1, 1], [], []>} : vector<40x32xf32>, vector<32x32xf32>, vector<40x32xf32> -> vector<40x32xf32>
    %c32 = arith.constant 32 : index
    %c0_30 = arith.constant 0 : index
    %67 = vector.load %arg5[%c32, %c0_30] : memref<168x272xf32, #tpu.memory_space<vmem>>, vector<8x128xf32>
    %cst_31 = arith.constant dense<0.000000e+00> : vector<20x128xf32>
    %68 = tpu.matmul %10, %67, %cst_31 {dimension_numbers = #tpu.dot_dimension_numbers<[1], [0], [0], [1], [0, 0, 1, 1], [], []>} : vector<20x8xf32>, vector<8x128xf32>, vector<20x128xf32> -> vector<20x128xf32>
    %69 = vector.extract_strided_slice %68 {offsets = [0, 0], sizes = [20, 16], strides = [1, 1]} : vector<20x128xf32> to vector<20x16xf32>
    %70 = vector.broadcast %12 : vector<20x1xf32> to vector<20x16xf32>
    %71 = arith.mulf %70, %69 : vector<20x16xf32>
    %72 = vector.extract_strided_slice %68 {offsets = [0, 16], sizes = [20, 16], strides = [1, 1]} : vector<20x128xf32> to vector<20x16xf32>
    %73 = vector.broadcast %13 : vector<20x1xf32> to vector<20x16xf32>
    %74 = arith.mulf %73, %72 : vector<20x16xf32>
    %75 = arith.addf %71, %74 : vector<20x16xf32>
    %76 = vector.extract_strided_slice %68 {offsets = [0, 32], sizes = [20, 16], strides = [1, 1]} : vector<20x128xf32> to vector<20x16xf32>
    %77 = vector.broadcast %14 : vector<20x1xf32> to vector<20x16xf32>
    %78 = arith.mulf %77, %76 : vector<20x16xf32>
    %79 = arith.addf %75, %78 : vector<20x16xf32>
    %80 = vector.extract_strided_slice %68 {offsets = [0, 48], sizes = [20, 16], strides = [1, 1]} : vector<20x128xf32> to vector<20x16xf32>
    %81 = vector.broadcast %15 : vector<20x1xf32> to vector<20x16xf32>
    %82 = arith.mulf %81, %80 : vector<20x16xf32>
    %83 = arith.addf %79, %82 : vector<20x16xf32>
    %84 = vector.extract_strided_slice %68 {offsets = [0, 64], sizes = [20, 16], strides = [1, 1]} : vector<20x128xf32> to vector<20x16xf32>
    %85 = vector.broadcast %16 : vector<20x1xf32> to vector<20x16xf32>
    %86 = arith.mulf %85, %84 : vector<20x16xf32>
    %87 = arith.addf %83, %86 : vector<20x16xf32>
    %88 = vector.extract_strided_slice %68 {offsets = [0, 80], sizes = [20, 16], strides = [1, 1]} : vector<20x128xf32> to vector<20x16xf32>
    %89 = vector.broadcast %17 : vector<20x1xf32> to vector<20x16xf32>
    %90 = arith.mulf %89, %88 : vector<20x16xf32>
    %91 = arith.addf %87, %90 : vector<20x16xf32>
    %92 = vector.extract_strided_slice %68 {offsets = [0, 96], sizes = [20, 16], strides = [1, 1]} : vector<20x128xf32> to vector<20x16xf32>
    %93 = vector.broadcast %18 : vector<20x1xf32> to vector<20x16xf32>
    %94 = arith.mulf %93, %92 : vector<20x16xf32>
    %95 = arith.addf %91, %94 : vector<20x16xf32>
    %96 = vector.extract_strided_slice %68 {offsets = [0, 112], sizes = [20, 16], strides = [1, 1]} : vector<20x128xf32> to vector<20x16xf32>
    %97 = vector.broadcast %19 : vector<20x1xf32> to vector<20x16xf32>
    %98 = arith.mulf %97, %96 : vector<20x16xf32>
    %99 = arith.addf %95, %98 : vector<20x16xf32>
    %100 = vector.extract_strided_slice %99 {offsets = [0, 0], sizes = [20, 8], strides = [1, 1]} : vector<20x16xf32> to vector<20x8xf32>
    %101 = vector.broadcast %21 : vector<20x1xf32> to vector<20x8xf32>
    %102 = arith.mulf %100, %101 : vector<20x8xf32>
    %103 = vector.extract_strided_slice %99 {offsets = [0, 8], sizes = [20, 8], strides = [1, 1]} : vector<20x16xf32> to vector<20x8xf32>
    %cst_32 = arith.constant dense<0.000000e+00> : vector<40x8xf32>
    %104 = tpu.matmul %53, %102, %cst_32 {dimension_numbers = #tpu.dot_dimension_numbers<[1], [0], [0], [1], [0, 0, 1, 1], [], []>} : vector<40x20xf32>, vector<20x8xf32>, vector<40x8xf32> -> vector<40x8xf32>
    %105 = vector.extract_strided_slice %66 {offsets = [0, 0], sizes = [40, 8], strides = [1, 1]} : vector<40x32xf32> to vector<40x8xf32>
    %106 = arith.mulf %105, %104 : vector<40x8xf32>
    %107 = vector.extract_strided_slice %66 {offsets = [0, 8], sizes = [40, 8], strides = [1, 1]} : vector<40x32xf32> to vector<40x8xf32>
    %108 = arith.mulf %107, %104 : vector<40x8xf32>
    %109 = vector.broadcast %46 : vector<40x1xf32> to vector<40x8xf32>
    %110 = arith.mulf %108, %109 : vector<40x8xf32>
    %111 = vector.broadcast %49 : vector<40x1xf32> to vector<40x8xf32>
    %112 = arith.mulf %108, %111 : vector<40x8xf32>
    %113 = vector.broadcast %52 : vector<40x1xf32> to vector<40x8xf32>
    %114 = arith.mulf %108, %113 : vector<40x8xf32>
    %115 = tpu.concatenate %106, %110, %112, %114 in 1 : vector<40x8xf32>, vector<40x8xf32>, vector<40x8xf32>, vector<40x8xf32> -> vector<40x32xf32>
    %cst_33 = arith.constant dense<0.000000e+00> : vector<20x32xf32>
    %116 = tpu.matmul %54, %115, %cst_33 {dimension_numbers = #tpu.dot_dimension_numbers<[1], [0], [0], [1], [0, 0, 1, 1], [], []>} : vector<20x40xf32>, vector<40x32xf32>, vector<20x32xf32> -> vector<20x32xf32>
    %117 = vector.broadcast %21 : vector<20x1xf32> to vector<20x32xf32>
    %118 = arith.mulf %116, %117 : vector<20x32xf32>
    %c80 = arith.constant 80 : index
    %c0_34 = arith.constant 0 : index
    %119 = vector.load %arg5[%c80, %c0_34] : memref<168x272xf32, #tpu.memory_space<vmem>>, vector<32x160xf32>
    %cst_35 = arith.constant dense<0.000000e+00> : vector<20x160xf32>
    %120 = tpu.matmul %118, %119, %cst_35 {dimension_numbers = #tpu.dot_dimension_numbers<[1], [0], [0], [1], [0, 0, 1, 1], [], []>} : vector<20x32xf32>, vector<32x160xf32>, vector<20x160xf32> -> vector<20x160xf32>
    %121 = vector.extract_strided_slice %120 {offsets = [0, 0], sizes = [20, 20], strides = [1, 1]} : vector<20x160xf32> to vector<20x20xf32>
    %122 = vector.broadcast %12 : vector<20x1xf32> to vector<20x20xf32>
    %123 = arith.mulf %122, %121 : vector<20x20xf32>
    %124 = vector.extract_strided_slice %120 {offsets = [0, 20], sizes = [20, 20], strides = [1, 1]} : vector<20x160xf32> to vector<20x20xf32>
    %125 = vector.broadcast %13 : vector<20x1xf32> to vector<20x20xf32>
    %126 = arith.mulf %125, %124 : vector<20x20xf32>
    %127 = arith.addf %123, %126 : vector<20x20xf32>
    %128 = vector.extract_strided_slice %120 {offsets = [0, 40], sizes = [20, 20], strides = [1, 1]} : vector<20x160xf32> to vector<20x20xf32>
    %129 = vector.broadcast %14 : vector<20x1xf32> to vector<20x20xf32>
    %130 = arith.mulf %129, %128 : vector<20x20xf32>
    %131 = arith.addf %127, %130 : vector<20x20xf32>
    %132 = vector.extract_strided_slice %120 {offsets = [0, 60], sizes = [20, 20], strides = [1, 1]} : vector<20x160xf32> to vector<20x20xf32>
    %133 = vector.broadcast %15 : vector<20x1xf32> to vector<20x20xf32>
    %134 = arith.mulf %133, %132 : vector<20x20xf32>
    %135 = arith.addf %131, %134 : vector<20x20xf32>
    %136 = vector.extract_strided_slice %120 {offsets = [0, 80], sizes = [20, 20], strides = [1, 1]} : vector<20x160xf32> to vector<20x20xf32>
    %137 = vector.broadcast %16 : vector<20x1xf32> to vector<20x20xf32>
    %138 = arith.mulf %137, %136 : vector<20x20xf32>
    %139 = arith.addf %135, %138 : vector<20x20xf32>
    %140 = vector.extract_strided_slice %120 {offsets = [0, 100], sizes = [20, 20], strides = [1, 1]} : vector<20x160xf32> to vector<20x20xf32>
    %141 = vector.broadcast %17 : vector<20x1xf32> to vector<20x20xf32>
    %142 = arith.mulf %141, %140 : vector<20x20xf32>
    %143 = arith.addf %139, %142 : vector<20x20xf32>
    %144 = vector.extract_strided_slice %120 {offsets = [0, 120], sizes = [20, 20], strides = [1, 1]} : vector<20x160xf32> to vector<20x20xf32>
    %145 = vector.broadcast %18 : vector<20x1xf32> to vector<20x20xf32>
    %146 = arith.mulf %145, %144 : vector<20x20xf32>
    %147 = arith.addf %143, %146 : vector<20x20xf32>
    %148 = vector.extract_strided_slice %120 {offsets = [0, 140], sizes = [20, 20], strides = [1, 1]} : vector<20x160xf32> to vector<20x20xf32>
    %149 = vector.broadcast %19 : vector<20x1xf32> to vector<20x20xf32>
    %150 = arith.mulf %149, %148 : vector<20x20xf32>
    %151 = arith.addf %147, %150 : vector<20x20xf32>
    %cst_36 = arith.constant 0.382683426 : f32
    %152 = vector.broadcast %cst_36 : f32 to vector<20x8xf32>
    %153 = arith.mulf %152, %103 : vector<20x8xf32>
    %154 = vector.extract_strided_slice %151 {offsets = [0, 0], sizes = [20, 8], strides = [1, 1]} : vector<20x20xf32> to vector<20x8xf32>
    %155 = arith.addf %153, %154 : vector<20x8xf32>
    %156 = vector.extract_strided_slice %151 {offsets = [0, 8], sizes = [20, 12], strides = [1, 1]} : vector<20x20xf32> to vector<20x12xf32>
    %157 = vector.extract_strided_slice %155 {offsets = [0, 0], sizes = [20, 4], strides = [1, 1]} : vector<20x8xf32> to vector<20x4xf32>
    %158 = vector.extract_strided_slice %155 {offsets = [0, 4], sizes = [20, 4], strides = [1, 1]} : vector<20x8xf32> to vector<20x4xf32>
    %cst_37 = arith.constant 0.000000e+00 : f32
    %159 = vector.broadcast %cst_37 : f32 to vector<20x4xf32>
    %160 = arith.subf %159, %158 : vector<20x4xf32>
    %161 = math.exp %160 : vector<20x4xf32>
    %cst_38 = arith.constant 1.000000e+00 : f32
    %162 = vector.broadcast %cst_38 : f32 to vector<20x4xf32>
    %163 = arith.addf %162, %161 : vector<20x4xf32>
    %cst_39 = arith.constant 1.000000e+00 : f32
    %164 = vector.broadcast %cst_39 : f32 to vector<20x4xf32>
    %165 = arith.divf %164, %163 : vector<20x4xf32>
    %cst_40 = arith.constant 0.000000e+00 : f32
    %166 = vector.broadcast %cst_40 : f32 to vector<20x4xf32>
    %167 = arith.subf %166, %157 : vector<20x4xf32>
    %168 = math.exp %167 : vector<20x4xf32>
    %cst_41 = arith.constant 1.000000e+00 : f32
    %169 = vector.broadcast %cst_41 : f32 to vector<20x4xf32>
    %170 = arith.addf %169, %168 : vector<20x4xf32>
    %cst_42 = arith.constant 1.000000e+00 : f32
    %171 = vector.broadcast %cst_42 : f32 to vector<20x4xf32>
    %172 = arith.divf %171, %170 : vector<20x4xf32>
    %173 = arith.mulf %157, %172 : vector<20x4xf32>
    %174 = vector.extract_strided_slice %156 {offsets = [0, 0], sizes = [20, 4], strides = [1, 1]} : vector<20x12xf32> to vector<20x4xf32>
    %175 = arith.mulf %165, %174 : vector<20x4xf32>
    %176 = vector.extract_strided_slice %156 {offsets = [0, 4], sizes = [20, 4], strides = [1, 1]} : vector<20x12xf32> to vector<20x4xf32>
    %177 = arith.mulf %165, %176 : vector<20x4xf32>
    %178 = vector.extract_strided_slice %156 {offsets = [0, 8], sizes = [20, 4], strides = [1, 1]} : vector<20x12xf32> to vector<20x4xf32>
    %179 = arith.mulf %165, %178 : vector<20x4xf32>
    %180 = tpu.concatenate %173, %175, %177, %179 in 1 : vector<20x4xf32>, vector<20x4xf32>, vector<20x4xf32>, vector<20x4xf32> -> vector<20x16xf32>
    %c112 = arith.constant 112 : index
    %c0_43 = arith.constant 0 : index
    %181 = vector.load %arg5[%c112, %c0_43] : memref<168x272xf32, #tpu.memory_space<vmem>>, vector<16x272xf32>
    %cst_44 = arith.constant dense<0.000000e+00> : vector<20x272xf32>
    %182 = tpu.matmul %180, %181, %cst_44 {dimension_numbers = #tpu.dot_dimension_numbers<[1], [0], [0], [1], [0, 0, 1, 1], [], []>} : vector<20x16xf32>, vector<16x272xf32>, vector<20x272xf32> -> vector<20x272xf32>
    %183 = vector.extract_strided_slice %182 {offsets = [0, 0], sizes = [20, 34], strides = [1, 1]} : vector<20x272xf32> to vector<20x34xf32>
    %184 = vector.broadcast %12 : vector<20x1xf32> to vector<20x34xf32>
    %185 = arith.mulf %184, %183 : vector<20x34xf32>
    %186 = vector.extract_strided_slice %182 {offsets = [0, 34], sizes = [20, 34], strides = [1, 1]} : vector<20x272xf32> to vector<20x34xf32>
    %187 = vector.broadcast %13 : vector<20x1xf32> to vector<20x34xf32>
    %188 = arith.mulf %187, %186 : vector<20x34xf32>
    %189 = arith.addf %185, %188 : vector<20x34xf32>
    %190 = vector.extract_strided_slice %182 {offsets = [0, 68], sizes = [20, 34], strides = [1, 1]} : vector<20x272xf32> to vector<20x34xf32>
    %191 = vector.broadcast %14 : vector<20x1xf32> to vector<20x34xf32>
    %192 = arith.mulf %191, %190 : vector<20x34xf32>
    %193 = arith.addf %189, %192 : vector<20x34xf32>
    %194 = vector.extract_strided_slice %182 {offsets = [0, 102], sizes = [20, 34], strides = [1, 1]} : vector<20x272xf32> to vector<20x34xf32>
    %195 = vector.broadcast %15 : vector<20x1xf32> to vector<20x34xf32>
    %196 = arith.mulf %195, %194 : vector<20x34xf32>
    %197 = arith.addf %193, %196 : vector<20x34xf32>
    %198 = vector.extract_strided_slice %182 {offsets = [0, 136], sizes = [20, 34], strides = [1, 1]} : vector<20x272xf32> to vector<20x34xf32>
    %199 = vector.broadcast %16 : vector<20x1xf32> to vector<20x34xf32>
    %200 = arith.mulf %199, %198 : vector<20x34xf32>
    %201 = arith.addf %197, %200 : vector<20x34xf32>
    %202 = vector.extract_strided_slice %182 {offsets = [0, 170], sizes = [20, 34], strides = [1, 1]} : vector<20x272xf32> to vector<20x34xf32>
    %203 = vector.broadcast %17 : vector<20x1xf32> to vector<20x34xf32>
    %204 = arith.mulf %203, %202 : vector<20x34xf32>
    %205 = arith.addf %201, %204 : vector<20x34xf32>
    %206 = vector.extract_strided_slice %182 {offsets = [0, 204], sizes = [20, 34], strides = [1, 1]} : vector<20x272xf32> to vector<20x34xf32>
    %207 = vector.broadcast %18 : vector<20x1xf32> to vector<20x34xf32>
    %208 = arith.mulf %207, %206 : vector<20x34xf32>
    %209 = arith.addf %205, %208 : vector<20x34xf32>
    %210 = vector.extract_strided_slice %182 {offsets = [0, 238], sizes = [20, 34], strides = [1, 1]} : vector<20x272xf32> to vector<20x34xf32>
    %211 = vector.broadcast %19 : vector<20x1xf32> to vector<20x34xf32>
    %212 = arith.mulf %211, %210 : vector<20x34xf32>
    %213 = arith.addf %209, %212 : vector<20x34xf32>
    %214 = vector.extract_strided_slice %213 {offsets = [0, 0], sizes = [20, 16], strides = [1, 1]} : vector<20x34xf32> to vector<20x16xf32>
    %215 = vector.broadcast %21 : vector<20x1xf32> to vector<20x16xf32>
    %216 = arith.mulf %214, %215 : vector<20x16xf32>
    %217 = vector.extract_strided_slice %213 {offsets = [0, 16], sizes = [20, 18], strides = [1, 1]} : vector<20x34xf32> to vector<20x18xf32>
    %cst_45 = arith.constant dense<0.000000e+00> : vector<40x16xf32>
    %218 = tpu.matmul %53, %216, %cst_45 {dimension_numbers = #tpu.dot_dimension_numbers<[1], [0], [0], [1], [0, 0, 1, 1], [], []>} : vector<40x20xf32>, vector<20x16xf32>, vector<40x16xf32> -> vector<40x16xf32>
    %219 = vector.extract_strided_slice %218 {offsets = [0, 0], sizes = [40, 4], strides = [1, 1]} : vector<40x16xf32> to vector<40x4xf32>
    %220 = vector.extract_strided_slice %218 {offsets = [0, 4], sizes = [40, 4], strides = [1, 1]} : vector<40x16xf32> to vector<40x4xf32>
    %221 = vector.extract_strided_slice %218 {offsets = [0, 8], sizes = [40, 4], strides = [1, 1]} : vector<40x16xf32> to vector<40x4xf32>
    %222 = vector.extract_strided_slice %218 {offsets = [0, 12], sizes = [40, 4], strides = [1, 1]} : vector<40x16xf32> to vector<40x4xf32>
    %223 = vector.extract_strided_slice %66 {offsets = [0, 16], sizes = [40, 16], strides = [1, 1]} : vector<40x32xf32> to vector<40x16xf32>
    %224 = vector.extract_strided_slice %223 {offsets = [0, 0], sizes = [40, 4], strides = [1, 1]} : vector<40x16xf32> to vector<40x4xf32>
    %225 = vector.extract_strided_slice %223 {offsets = [0, 4], sizes = [40, 4], strides = [1, 1]} : vector<40x16xf32> to vector<40x4xf32>
    %226 = vector.extract_strided_slice %223 {offsets = [0, 8], sizes = [40, 4], strides = [1, 1]} : vector<40x16xf32> to vector<40x4xf32>
    %227 = vector.extract_strided_slice %223 {offsets = [0, 12], sizes = [40, 4], strides = [1, 1]} : vector<40x16xf32> to vector<40x4xf32>
    %228 = arith.mulf %224, %219 : vector<40x4xf32>
    %229 = vector.broadcast %46 : vector<40x1xf32> to vector<40x4xf32>
    %230 = arith.mulf %220, %229 : vector<40x4xf32>
    %231 = vector.broadcast %49 : vector<40x1xf32> to vector<40x4xf32>
    %232 = arith.mulf %221, %231 : vector<40x4xf32>
    %233 = arith.addf %230, %232 : vector<40x4xf32>
    %234 = vector.broadcast %52 : vector<40x1xf32> to vector<40x4xf32>
    %235 = arith.mulf %222, %234 : vector<40x4xf32>
    %236 = arith.addf %233, %235 : vector<40x4xf32>
    %237 = arith.mulf %225, %236 : vector<40x4xf32>
    %cst_46 = arith.constant 0.577350259 : f32
    %238 = vector.broadcast %cst_46 : f32 to vector<40x4xf32>
    %239 = arith.mulf %237, %238 : vector<40x4xf32>
    %240 = vector.broadcast %52 : vector<40x1xf32> to vector<40x4xf32>
    %241 = arith.mulf %221, %240 : vector<40x4xf32>
    %242 = vector.broadcast %49 : vector<40x1xf32> to vector<40x4xf32>
    %243 = arith.mulf %222, %242 : vector<40x4xf32>
    %244 = arith.subf %241, %243 : vector<40x4xf32>
    %245 = arith.mulf %226, %244 : vector<40x4xf32>
    %cst_47 = arith.constant 0.707106769 : f32
    %246 = vector.broadcast %cst_47 : f32 to vector<40x4xf32>
    %247 = arith.mulf %245, %246 : vector<40x4xf32>
    %248 = vector.broadcast %46 : vector<40x1xf32> to vector<40x4xf32>
    %249 = arith.mulf %222, %248 : vector<40x4xf32>
    %250 = vector.broadcast %52 : vector<40x1xf32> to vector<40x4xf32>
    %251 = arith.mulf %220, %250 : vector<40x4xf32>
    %252 = arith.subf %249, %251 : vector<40x4xf32>
    %253 = arith.mulf %226, %252 : vector<40x4xf32>
    %cst_48 = arith.constant 0.707106769 : f32
    %254 = vector.broadcast %cst_48 : f32 to vector<40x4xf32>
    %255 = arith.mulf %253, %254 : vector<40x4xf32>
    %256 = vector.broadcast %49 : vector<40x1xf32> to vector<40x4xf32>
    %257 = arith.mulf %220, %256 : vector<40x4xf32>
    %258 = vector.broadcast %46 : vector<40x1xf32> to vector<40x4xf32>
    %259 = arith.mulf %221, %258 : vector<40x4xf32>
    %260 = arith.subf %257, %259 : vector<40x4xf32>
    %261 = arith.mulf %226, %260 : vector<40x4xf32>
    %cst_49 = arith.constant 0.707106769 : f32
    %262 = vector.broadcast %cst_49 : f32 to vector<40x4xf32>
    %263 = arith.mulf %261, %262 : vector<40x4xf32>
    %264 = vector.broadcast %49 : vector<40x1xf32> to vector<40x4xf32>
    %265 = arith.mulf %220, %264 : vector<40x4xf32>
    %266 = vector.broadcast %46 : vector<40x1xf32> to vector<40x4xf32>
    %267 = arith.mulf %221, %266 : vector<40x4xf32>
    %268 = arith.addf %265, %267 : vector<40x4xf32>
    %269 = arith.mulf %227, %268 : vector<40x4xf32>
    %cst_50 = arith.constant 0.707106769 : f32
    %270 = vector.broadcast %cst_50 : f32 to vector<40x4xf32>
    %271 = arith.mulf %269, %270 : vector<40x4xf32>
    %272 = vector.broadcast %52 : vector<40x1xf32> to vector<40x4xf32>
    %273 = arith.mulf %221, %272 : vector<40x4xf32>
    %274 = vector.broadcast %49 : vector<40x1xf32> to vector<40x4xf32>
    %275 = arith.mulf %222, %274 : vector<40x4xf32>
    %276 = arith.addf %273, %275 : vector<40x4xf32>
    %277 = arith.mulf %227, %276 : vector<40x4xf32>
    %cst_51 = arith.constant 0.707106769 : f32
    %278 = vector.broadcast %cst_51 : f32 to vector<40x4xf32>
    %279 = arith.mulf %277, %278 : vector<40x4xf32>
    %cst_52 = arith.constant 2.000000e+00 : f32
    %280 = vector.broadcast %cst_52 : f32 to vector<40x4xf32>
    %281 = arith.mulf %280, %222 : vector<40x4xf32>
    %282 = vector.broadcast %52 : vector<40x1xf32> to vector<40x4xf32>
    %283 = arith.mulf %281, %282 : vector<40x4xf32>
    %284 = vector.broadcast %46 : vector<40x1xf32> to vector<40x4xf32>
    %285 = arith.mulf %220, %284 : vector<40x4xf32>
    %286 = arith.subf %283, %285 : vector<40x4xf32>
    %287 = vector.broadcast %49 : vector<40x1xf32> to vector<40x4xf32>
    %288 = arith.mulf %221, %287 : vector<40x4xf32>
    %289 = arith.subf %286, %288 : vector<40x4xf32>
    %290 = arith.mulf %227, %289 : vector<40x4xf32>
    %cst_53 = arith.constant 0.408248305 : f32
    %291 = vector.broadcast %cst_53 : f32 to vector<40x4xf32>
    %292 = arith.mulf %290, %291 : vector<40x4xf32>
    %293 = vector.broadcast %52 : vector<40x1xf32> to vector<40x4xf32>
    %294 = arith.mulf %220, %293 : vector<40x4xf32>
    %295 = vector.broadcast %46 : vector<40x1xf32> to vector<40x4xf32>
    %296 = arith.mulf %222, %295 : vector<40x4xf32>
    %297 = arith.addf %294, %296 : vector<40x4xf32>
    %298 = arith.mulf %227, %297 : vector<40x4xf32>
    %cst_54 = arith.constant 0.707106769 : f32
    %299 = vector.broadcast %cst_54 : f32 to vector<40x4xf32>
    %300 = arith.mulf %298, %299 : vector<40x4xf32>
    %301 = vector.broadcast %46 : vector<40x1xf32> to vector<40x4xf32>
    %302 = arith.mulf %220, %301 : vector<40x4xf32>
    %303 = vector.broadcast %49 : vector<40x1xf32> to vector<40x4xf32>
    %304 = arith.mulf %221, %303 : vector<40x4xf32>
    %305 = arith.subf %302, %304 : vector<40x4xf32>
    %306 = arith.mulf %227, %305 : vector<40x4xf32>
    %cst_55 = arith.constant 0.707106769 : f32
    %307 = vector.broadcast %cst_55 : f32 to vector<40x4xf32>
    %308 = arith.mulf %306, %307 : vector<40x4xf32>
    %309 = tpu.concatenate %228, %239, %247, %255, %263, %271, %279, %292, %300, %308 in 1 : vector<40x4xf32>, vector<40x4xf32>, vector<40x4xf32>, vector<40x4xf32>, vector<40x4xf32>, vector<40x4xf32>, vector<40x4xf32>, vector<40x4xf32>, vector<40x4xf32>, vector<40x4xf32> -> vector<40x40xf32>
    %cst_56 = arith.constant dense<0.000000e+00> : vector<20x40xf32>
    %310 = tpu.matmul %54, %309, %cst_56 {dimension_numbers = #tpu.dot_dimension_numbers<[1], [0], [0], [1], [0, 0, 1, 1], [], []>} : vector<20x40xf32>, vector<40x40xf32>, vector<20x40xf32> -> vector<20x40xf32>
    %311 = vector.broadcast %21 : vector<20x1xf32> to vector<20x40xf32>
    %312 = arith.mulf %310, %311 : vector<20x40xf32>
    %c128 = arith.constant 128 : index
    %c0_57 = arith.constant 0 : index
    %313 = vector.load %arg5[%c128, %c0_57] : memref<168x272xf32, #tpu.memory_space<vmem>>, vector<40x144xf32>
    %cst_58 = arith.constant dense<0.000000e+00> : vector<20x144xf32>
    %314 = tpu.matmul %312, %313, %cst_58 {dimension_numbers = #tpu.dot_dimension_numbers<[1], [0], [0], [1], [0, 0, 1, 1], [], []>} : vector<20x40xf32>, vector<40x144xf32>, vector<20x144xf32> -> vector<20x144xf32>
    %315 = vector.extract_strided_slice %314 {offsets = [0, 0], sizes = [20, 18], strides = [1, 1]} : vector<20x144xf32> to vector<20x18xf32>
    %316 = vector.broadcast %12 : vector<20x1xf32> to vector<20x18xf32>
    %317 = arith.mulf %316, %315 : vector<20x18xf32>
    %318 = vector.extract_strided_slice %314 {offsets = [0, 18], sizes = [20, 18], strides = [1, 1]} : vector<20x144xf32> to vector<20x18xf32>
    %319 = vector.broadcast %13 : vector<20x1xf32> to vector<20x18xf32>
    %320 = arith.mulf %319, %318 : vector<20x18xf32>
    %321 = arith.addf %317, %320 : vector<20x18xf32>
    %322 = vector.extract_strided_slice %314 {offsets = [0, 36], sizes = [20, 18], strides = [1, 1]} : vector<20x144xf32> to vector<20x18xf32>
    %323 = vector.broadcast %14 : vector<20x1xf32> to vector<20x18xf32>
    %324 = arith.mulf %323, %322 : vector<20x18xf32>
    %325 = arith.addf %321, %324 : vector<20x18xf32>
    %326 = vector.extract_strided_slice %314 {offsets = [0, 54], sizes = [20, 18], strides = [1, 1]} : vector<20x144xf32> to vector<20x18xf32>
    %327 = vector.broadcast %15 : vector<20x1xf32> to vector<20x18xf32>
    %328 = arith.mulf %327, %326 : vector<20x18xf32>
    %329 = arith.addf %325, %328 : vector<20x18xf32>
    %330 = vector.extract_strided_slice %314 {offsets = [0, 72], sizes = [20, 18], strides = [1, 1]} : vector<20x144xf32> to vector<20x18xf32>
    %331 = vector.broadcast %16 : vector<20x1xf32> to vector<20x18xf32>
    %332 = arith.mulf %331, %330 : vector<20x18xf32>
    %333 = arith.addf %329, %332 : vector<20x18xf32>
    %334 = vector.extract_strided_slice %314 {offsets = [0, 90], sizes = [20, 18], strides = [1, 1]} : vector<20x144xf32> to vector<20x18xf32>
    %335 = vector.broadcast %17 : vector<20x1xf32> to vector<20x18xf32>
    %336 = arith.mulf %335, %334 : vector<20x18xf32>
    %337 = arith.addf %333, %336 : vector<20x18xf32>
    %338 = vector.extract_strided_slice %314 {offsets = [0, 108], sizes = [20, 18], strides = [1, 1]} : vector<20x144xf32> to vector<20x18xf32>
    %339 = vector.broadcast %18 : vector<20x1xf32> to vector<20x18xf32>
    %340 = arith.mulf %339, %338 : vector<20x18xf32>
    %341 = arith.addf %337, %340 : vector<20x18xf32>
    %342 = vector.extract_strided_slice %314 {offsets = [0, 126], sizes = [20, 18], strides = [1, 1]} : vector<20x144xf32> to vector<20x18xf32>
    %343 = vector.broadcast %19 : vector<20x1xf32> to vector<20x18xf32>
    %344 = arith.mulf %343, %342 : vector<20x18xf32>
    %345 = arith.addf %341, %344 : vector<20x18xf32>
    %346 = arith.addf %345, %217 : vector<20x18xf32>
    %c0_59 = arith.constant 0 : index
    %c0_60 = arith.constant 0 : index
    %347 = vector.load %arg6[%c0_59, %c0_60] : memref<20x18xf32, #tpu.memory_space<vmem>>, vector<20x18xf32>
    tpu.vector_store %arg6[%c0_59, %c0_60], %346 {strides = array<i32>} : memref<20x18xf32, #tpu.memory_space<vmem>>, vector<20x18xf32>,
    return
  }
}

</mosaic_0001>

<bundles_post_ra>
// kernel: squeeze.0
= control target key start
LH: loop header
LB: loop body
LE: loop exit
PB: predicated region body
PF: predicated region fallthrough
CT: control target
= control target key end

     0   :  { %vm7_vm0 = vcmask 23552   ;;  %s30_s8 = smov 122   ;;  %s47_s0 = inlined_call_operand.vmem [shape: f32[9], index: 0, kind: input, shape index: {}]   ;;  %s48_s1 = inlined_call_operand.vmem [shape: f32[3,3], index: 1, kind: output, shape index: {}]  }
   0x1   :  { %v4_v0 = vld [vmem:[%s47_s0] sm:$0x1]  ;;  %s29_s0 = smov 125  }
   0x2   :  { %5 = vst [vmem:[#allocation1] sm:$0x1] %v4_v0 }
   0x9   :  { %v9_v1 = vld [vmem:[#allocation1] sm:$0x1]  }
   0xa   :  { %v6_v2 = vld [vmem:[#allocation1] sm:$0x1]   ;;  %10 = vrot.lane.b32.xlu0 %v9_v1, %s29_s0 }
   0xb   :  { %8 = vst.msk [vmem:[#allocation0] sm:$0x1] %vm7_vm0, %v6_v2   ;;  %v15_v3 = vld [vmem:[#allocation1] sm:$0x1]  }
   0xe   :  { %16 = vrot.lane.b32.xlu0 %v15_v3, %s30_s8 }
  0x7c   :  { %v11_v4 = vpop.permute.xlu0 %10  }
  0x7d   :  { %14 = vst.msk [vmem:[#allocation0 + $0x1] sm:$0x1] %vm7_vm0, %v11_v4  }
  0x80   :  { %v17_v5 = vpop.permute.xlu0 %16  }
  0x81   :  { %20 = vst.msk [vmem:[#allocation0 + $0x2] sm:$0x1] %vm7_vm0, %v17_v5  }
  0x88   :  { %v24_v6 = vld [vmem:[#allocation0] sm:$0xf] }
  0x89   :  { %26 = vst [vmem:[%s48_s1] sm:$0xf] %v24_v6 }

// kernel: custom-call
= control target key start
LH: loop header
LB: loop body
LE: loop exit
PB: predicated region body
PF: predicated region fallthrough
CT: control target
= control target key end

     0   :  { %s62_s0 = inlined_call_operand.vmem [shape: f32[1,12,12], index: 0, kind: input, shape index: {}]   ;;  %s63_s1 = inlined_call_operand.vmem [shape: f32[1,12,12], index: 1, kind: input, shape index: {}]   ;;  %s64_s2 = inlined_call_operand.vmem [shape: c64[1,12,12], index: 2, kind: output, shape index: {}]  }
   0x1   :  { %v5_v0 = vld [vmem:[%s62_s0] sm:$0xff]  ;;  %v18_v1 = vld [vmem:[%s62_s0 + $0x8] sm:$0xff] }
   0x2   :  { %v11_v2 = vld [vmem:[%s63_s1] sm:$0xff]  ;;  %6 = vst [vmem:[%s64_s2] sm:$0xff] %v5_v0  ;;  %19 = vst [vmem:[%s64_s2 + $0x8] sm:$0xff] %v18_v1  ;;  %v21_v3 = vld [vmem:[%s63_s1 + $0x8] sm:$0xff] }
   0x3   :  { %20 = vst [vmem:[%s64_s2 + $0x10] sm:$0xff] %v11_v2  ;;  %22 = vst [vmem:[%s64_s2 + $0x18] sm:$0xff] %v21_v3 }

// kernel: device_forward.1
= control target key start
LH: loop header
LB: loop body
LE: loop exit
PB: predicated region body
PF: predicated region fallthrough
CT: control target
= control target key end

     0   :  { %11 = vsyncpa [#allocation3], 0  ;;  %s3668_s21 = smov [#allocation2]   ;;  %s5076_s0 = inlined_call_operand.vmem [shape: f32[20,11], index: 0, kind: input, shape index: {}]   ;;  %s5077_s1 = inlined_call_operand.vmem [shape: f32[40,3], index: 1, kind: input, shape index: {}]   ;;  %s5078_s2 = inlined_call_operand.vmem [shape: f32[20,1], index: 2, kind: input, shape index: {}]   ;;  %s5079_s3 = inlined_call_operand.vmem [shape: f32[40,20], index: 3, kind: input, shape index: {}]   ;;  %s5080_s4 = inlined_call_operand.vmem [shape: f32[20,40], index: 4, kind: input, shape index: {}]   ;;  %s5081_s5 = inlined_call_operand.hbm [shape: f32[168,272], index: 5, kind: input, shape index: {}]   ;;  %s5082_s6 = inlined_call_operand.vmem [shape: f32[20,18], index: 6, kind: output, shape index: {}]  }
   0x1   :  { %s27_s22 = sshll.u32 %s3668_s21, 4  ;;  %s3644_s25 = scalar_lea.hbm %s5081_s5, 8064  ;;  %s28_s22 = int_to_ptr.vmem [resolvable:$true] %s27_s22 }
   0x2   :  { %p3645_p0 = scmp.ne.s32.totalorder %s5081_s5, %s3644_s25  ;;  %p3648_p1 = scmp.lt.u32.totalorder %s3644_s25, %s5081_s5 }
   0x4   :  { %p3650_p2 = pnand %p3648_p1, %p3645_p0 }
   0x6   :  { %3653 = shalt.err (!%p3650_p2)
}
   0x7   :  { %s3654_s30 = scalar_lea.vmem %s28_s22, 8064  ;;  %p3659_p4 = scmp.lt.s32.totalorder %s28_s22, %s28_s22 }
   0x8   :  { %p3655_p3 = scmp.ne.s32.totalorder %s28_s22, %s3654_s30  ;;  %p3660_p5 = scmp.lt.s32.totalorder %s3654_s30, %s3654_s30 }
   0xa   :  { %p3661_p6 = por %p3660_p5, %p3659_p4 }
   0xc   :  { %p3662_p7 = pnand %p3661_p6, %p3655_p3 }
   0xe   :  { %3665 = shalt.err (!%p3662_p7)
}
   0xf   :  { %s3669_s7 = smov 384   ;;  %s3670_s8 = smov 24  }
  0x10   :  { %33 = dma.hbm_to_vmem [thread:$0]  %s5081_s5, 8064, %s28_s22, [#allocation3], %s3669_s7, %s3669_s7, %s3670_s8  }
  0x11   :  { %3666 = dma.done.wait [#allocation3], 8064  }
  0x12   :  { %3667 = vsyncadd [#allocation3], 4294959232  ;;  %v5085_v0 = vmov 0.0|0.0   ;;  %vm3672_vm0 = vmmov 0   ;;  %v5083_v1 = vmov 0.0   ;;  %vm56_vm1 = vcmask 1042432  }
  0x13   :  { %3332 = vmatprep.subr.bf16.mxu0 %v5085_v0  ;;  %3383 = vmatprep.subr.bf16.mxu1 %v5085_v0  ;;  %vm3674_vm2 = vmmov 1   ;;  %v43_v3 = vld [vmem:[#allocation2 + $0x18] sm:$0xff]  ;;  %v44_v4 = vld [vmem:[#allocation2 + $0x30] sm:$0x7]  ;;  %v3777_v5 = vld [vmem:[%s5077_s1] sm:$0xff]  ;;  %vm159_vm4 = vcmask 23552  }
  0x14   :  { %3179 = vmatprep.mubr.msk.f32.mxu0 %vm3672_vm0, %v5083_v1  ;;  %3185 = vmatprep.mubr.msk.f32.mxu1 %vm3672_vm0, %v5083_v1  ;;  %vm3770_vm3 = vmpackc.low %vm56_vm1, %vm3674_vm2  ;;  %v3333_v6 = vpack.c.bf16 %v44_v4, %v43_v3  ;;  %v154_v7 = vmul.f32 %v3777_v5, %v3777_v5  ;;  %v37_v8 = vld [vmem:[%s5076_s0] sm:$0xff]  ;;  %v3787_v9 = vld [vmem:[%s5077_s1 + $0x8] sm:$0xff]  ;;  %vm46_vm5 = vcmask 89088   ;;  %v3675_v28 = vmov 13   ;;  %s3685_s28 = smov 112   ;;  %s3686_s29 = smov 64  }
  0x15   :  { %v40_v10 = vmax.f32 %v37_v8, 0.0  ;;  %v155_v11 = vmul.f32 %v3787_v9, %v3787_v9  ;;  %v3794_v12 = vld [vmem:[%s5077_s1 + $0x10] sm:$0xff]  ;;  %v3802_v14 = vld [vmem:[%s5077_s1 + $0x18] sm:$0xff]  ;;  %v38_v16 = vld [vmem:[%s5076_s0 + $0x8] sm:$0xff]  ;;  %3439 = vset.pattern.permute.xlu0 %v3675_v28  ;;  %v3676_v29 = vmov 9   ;;  %vm245_vm6 = vcmask 64512  }
  0x16   :  { %v39_v13 = vld [vmem:[%s5076_s0 + $0x10] sm:$0xf]  ;;  %3335 = vmatpush3.bf16.msk.msra.mxu0 %vm3770_vm3, %v3333_v6  ;;  %v160_v15 = vsel %vm159_vm4, %v154_v7, 0.0  ;;  %3384 = vmatpush3.bf16.msk.msra.mxu1 %vm3770_vm3, %v3333_v6  ;;  %v156_v17 = vmul.f32 %v3794_v12, %v3794_v12  ;;  %v157_v19 = vmul.f32 %v3802_v14, %v3802_v14  ;;  %v3819_v20 = vld [vmem:[%s5077_s1 + $0x20] sm:$0xff]  ;;  %v41_v24 = vmax.f32 %v38_v16, 0.0  ;;  %v244_v27 = vld [vmem:[#allocation2 + $0x78] sm:$0xff] }
  0x17   :  { %v42_v18 = vmax.f32 %v39_v13, 0.0  ;;  %161 = vadd.xlane.f32.xlu0 %v160_v15  ;;  %3188 = vmatprep.subr.mxu1 %v5083_v1  ;;  %v163_v21 = vsel %vm159_vm4, %v155_v11, 0.0  ;;  %v158_v23 = vmul.f32 %v3819_v20, %v3819_v20  ;;  %v190_v41 = vld [vmem:[#allocation2] ss:$0 sm:$0xff]  ;;  %vm390_vm7 = vcmask 261120   ;;  %s3687_s30 = smov 96  }
  0x18   :  { %v166_v22 = vsel %vm159_vm4, %v156_v17, 0.0  ;;  %3336 = vmatprep.subr.bf16.mxu0 %v5085_v0  ;;  %v169_v25 = vsel %vm159_vm4, %v157_v19, 0.0  ;;  %3433 = vset.pattern.permute.xlu1 %v3676_v29  ;;  %s3688_s7 = smov 48   ;;  %s3689_s9 = smov 80   ;;  %vm845_vm8 = vcmask 1043456   ;;  %vm829_vm9 = vcmask 162816  }
  0x19   :  { %3180 = vmatmul.mubr.msk.f32.vlgmr.msra.gmra.mrb[0].mxu0 %vm46_vm5, %v40_v10  ;;  %167 = vadd.xlane.f32.xlu1 %v166_v22  ;;  %v172_v26 = vsel %vm159_vm4, %v158_v23, 0.0  ;;  %s3690_s10 = smov 16   ;;  %s3691_s5 = smov 32   ;;  %vm1094_vm10 = vcmask 130048   ;;  %vm1100_vm11 = vcmask 195584   ;;  %vm1106_vm12 = vcmask 326656  }
  0x1a   :  { %3182 = vmatprep.mubr.msk.f32.mxu0 %vm3672_vm0, %v5083_v1  ;;  %3186 = vmatmul.mubr.msk.f32.vlgmr.msra.gmra.mrb[0].mxu1 %vm46_vm5, %v42_v18  ;;  %s3693_s22 = smov 8   ;;  %s3694_s27 = smov 88   ;;  %vm1545_vm13 = vcmask 31744   ;;  %vm1552_vm14 = vcmask 97280   ;;  %vm1797_vm15 = vcmask 211968   ;;  %vm1885_vm1 = vcmask 146432  }
  0x1b   :  { %164 = vadd.xlane.f32.xlu0 %v163_v21  ;;  %3190 = vmatprep.mubr.msk.f32.mxu1 %vm3672_vm0, %v5083_v1  ;;  %v496_v21 = vld [vmem:[#allocation2 + $0x60] sm:$0xff]  ;;  %s3700_s11 = smov 124   ;;  %s3701_s12 = smov 120   ;;  %vm2696_vm2 = vcmask 228352   ;;  %vm2707_vm3 = vcmask 293888   ;;  %vm3060_vm4 = vcmask 142336  }
  0x1c   :  { %3189 = vmatpush3.msra.mxu1 %v244_v27  ;;  %s3703_s13 = smov 94   ;;  %s3704_s14 = smov 60  }
  0x1d   :  { %3183 = vmatmul.mubr.msk.f32.gmra.mrb[2].mxu0 %vm46_vm5, %v41_v24  ;;  %170 = vadd.xlane.f32.xlu1 %v169_v25  ;;  %s3705_s15 = smov 26   ;;  %s3706_s16 = smov 86  }
  0x1e   :  { %3213 = vmatprep.mubr.msk.f32.mxu0 %vm3672_vm0, %v5083_v1  ;;  %3228 = vmatprep.subr.mxu1 %v5083_v1  ;;  %s3707_s17 = smov 52  }
  0x1f   :  { %173 = vadd.xlane.f32.xlu0 %v172_v26 }
  0xa4   :  { %v162_v30 = vpop.xlane.xlu0 %161 }
  0xa5   :  { %v175_v31 = vadd.f32 1e-24, %v162_v30 }
  0xa6   :  { %v168_v32 = vpop.xlane.xlu1 %167 }
  0xa7   :  { %3578 = vrsqrt.f32 %v175_v31  ;;  %v177_v33 = vadd.f32 1e-24, %v168_v32 }
  0xa8   :  { %v165_v34 = vpop.xlane.xlu0 %164 }
  0xa9   :  { %v176_v35 = vadd.f32 1e-24, %v165_v34  ;;  %3580 = vrsqrt.f32 %v177_v33 }
  0xaa   :  { %v171_v36 = vpop.xlane.xlu1 %170 }
  0xab   :  { %3582 = vrsqrt.f32 %v176_v35  ;;  %v178_v37 = vadd.f32 1e-24, %v171_v36 }
  0xac   :  { %v174_v38 = vpop.xlane.xlu0 %173 }
  0xad   :  { %3584 = vrsqrt.f32 %v178_v37  ;;  %v179_v39 = vadd.f32 1e-24, %v174_v38 }
  0xaf   :  { %3586 = vrsqrt.f32 %v179_v39 }
  0xb1   :  { %v3841_v40 = vpop.eup %3578 }
  0xb2   :  { %v185_v42 = vmul.f32 %v3841_v40, %v162_v30 }
  0xb3   :  { %v3844_v43 = vpop.eup %3580 }
  0xb4   :  { %v191_v44 = vsub.f32 %v185_v42, %v190_v41  ;;  %v187_v45 = vmul.f32 %v3844_v43, %v168_v32  ;;  %v45_v32 = vld [vmem:[#allocation2 + $0x48] ss:$0 sm:$0xff] }
  0xb5   :  { %v3847_v46 = vpop.eup %3582 }
  0xb6   :  { %v196_v47 = vmul.f32 1.75, %v191_v44  ;;  %v186_v48 = vmul.f32 %v3847_v46, %v165_v34  ;;  %v193_v49 = vsub.f32 %v187_v45, %v190_v41 }
  0xb7   :  { %v3850_v50 = vpop.eup %3584 }
  0xb8   :  { %v201_v51 = vsub.f32 0.0, %v196_v47  ;;  %v192_v52 = vsub.f32 %v186_v48, %v190_v41  ;;  %v198_v53 = vmul.f32 1.75, %v193_v49  ;;  %v188_v54 = vmul.f32 %v3850_v50, %v171_v36 }
  0xb9   :  { %v3853_v55 = vpop.eup %3586  ;;  %v3678_v48 = vmov 10  }
  0xba   :  { %v206_v56 = vmul.f32 %v201_v51, %v196_v47  ;;  %v197_v57 = vmul.f32 1.75, %v192_v52  ;;  %v203_v58 = vsub.f32 0.0, %v198_v53  ;;  %v194_v59 = vsub.f32 %v188_v54, %v190_v41  ;;  %v143_v51 = vld [vmem:[%s5078_s2] sm:$0xff] }
  0xbb   :  { %v189_v60 = vmul.f32 %v3853_v55, %v174_v38  ;;  %v3677_v47 = vmov 14   ;;  %v3679_v52 = vmov 11   ;;  %v3681_v54 = vmov 12  }
  0xbc   :  { %v211_v61 = vmul.f32 1.442695, %v206_v56  ;;  %v202_v62 = vsub.f32 0.0, %v197_v57  ;;  %v208_v63 = vmul.f32 %v203_v58, %v198_v53  ;;  %v199_v2 = vmul.f32 1.75, %v194_v59  ;;  %v386_v58 = vld [vmem:[#allocation2 + $0x90] sm:$0xff]  ;;  %v387_v59 = vld [vmem:[#allocation2 + $0xa8] sm:$0xff] }
  0xbd   :  { %v195_v3 = vsub.f32 %v189_v60, %v190_v41  ;;  %v3680_v53 = vmov 15   ;;  %v3337_v60 = vpack.c.bf16 %v387_v59, %v386_v58 }
  0xbe   :  { %3588 = vpow2.f32 %v211_v61  ;;  %v207_v4 = vmul.f32 %v202_v62, %v197_v57  ;;  %v215_v6 = vmul.f32 1.442695, %v208_v63  ;;  %v204_v7 = vsub.f32 0.0, %v199_v2  ;;  %v388_v61 = vld [vmem:[#allocation2 + $0xc0] sm:$0xff]  ;;  %v389_v62 = vld [vmem:[#allocation2 + $0xd8] sm:$0xff] }
  0xbf   :  { %v200_v8 = vmul.f32 1.75, %v195_v3  ;;  %v3682_v57 = vmov 0   ;;  %3338 = vmatpush3.bf16.msra.mxu0 %v3337_v60  ;;  %v3340_v63 = vpack.c.bf16 %v389_v62, %v388_v61  ;;  %v3684_v3 = vmov 1  }
  0xc0   :  { %v213_v10 = vmul.f32 1.442695, %v207_v4  ;;  %v209_v11 = vmul.f32 %v204_v7, %v199_v2  ;;  %3590 = vpow2.f32 %v215_v6  ;;  %3339 = vmatprep.subr.bf16.mxu0 %v5085_v0  ;;  %v144_v2 = vld [vmem:[%s5078_s2 + $0x8] sm:$0xff] }
  0xc1   :  { %v205_v13 = vsub.f32 0.0, %v200_v8 }
  0xc2   :  { %3592 = vpow2.f32 %v213_v10  ;;  %v217_v15 = vmul.f32 1.442695, %v209_v11 }
  0xc3   :  { %v210_v16 = vmul.f32 %v205_v13, %v200_v8  ;;  %3341 = vmatpush3.bf16.msra.mxu0 %v3340_v63 }
  0xc4   :  { %3594 = vpow2.f32 %v217_v15  ;;  %3345 = vmatprep.subr.bf16.mxu0 %v5085_v0 }
  0xc5   :  { %v219_v17 = vmul.f32 1.442695, %v210_v16 }
  0xc7   :  { %3596 = vpow2.f32 %v219_v17 }
  0xc8   :  { %v3589_v18 = vpop.eup %3588  ;;  %3598 = vrsqrt.f32 %v143_v51 }
  0xc9   :  { %v221_v19 = vmul.f32 0.89285713, %v3589_v18  ;;  %3600 = vrsqrt.f32 %v144_v2 }
  0xca   :  { %v3591_v22 = vpop.eup %3590 }
  0xcb   :  { %3191 = vmatmul.mubr.msk.f32.vlgmr.msra.gmra.mrb[2].mxu1 %vm245_vm6, %v221_v19  ;;  %v223_v25 = vmul.f32 0.89285713, %v3591_v22 }
  0xcc   :  { %v3593_v23 = vpop.eup %3592  ;;  %3193 = vmatprep.mubr.msk.f32.mxu1 %vm3672_vm0, %v5083_v1  ;;  %3229 = vmatpush3.msra.mxu1 %v496_v21 }
  0xcd   :  { %v222_v24 = vmul.f32 0.89285713, %v3593_v23  ;;  %3342 = vmatprep.subr.bf16.mxu1 %v5085_v0 }
  0xce   :  { %v3595_v26 = vpop.eup %3594 }
  0xcf   :  { %3194 = vmatmul.mubr.msk.f32.gmra.mrb[4].mxu1 %vm245_vm6, %v222_v24  ;;  %v224_v27 = vmul.f32 0.89285713, %v3595_v26 }
  0xd0   :  { %3196 = vmatprep.mubr.msk.f32.mxu1 %vm3672_vm0, %v5083_v1 }
  0xd1   :  { %v3597_v30 = vpop.eup %3596 }
  0xd2   :  { %v225_v31 = vmul.f32 0.89285713, %v3597_v30  ;;  %v3599_v56 = vpop.eup %3598 }
  0xd3   :  { %3197 = vmatmul.mubr.msk.f32.gmra.mrb[6].mxu1 %vm245_vm6, %v223_v25 }
  0xd4   :  { %3199 = vmatprep.mubr.msk.f32.mxu1 %vm3672_vm0, %v5083_v1 }
  0xd7   :  { %3200 = vmatmul.mubr.msk.f32.gmra.mrb[8].mxu1 %vm245_vm6, %v224_v27 }
  0xd8   :  { %3202 = vmatprep.mubr.msk.f32.mxu1 %vm3672_vm0, %v5083_v1 }
  0xdb   :  { %3203 = vmatmul.mubr.msk.f32.gmra.mrb[10].mxu1 %vm245_vm6, %v225_v31 }
  0xdc   :  { %3230 = vmatprep.mubr.msk.f32.mxu1 %vm3672_vm0, %v5083_v1 }
  0xec   :  { %v126_v33 = vpop.f32.mrb[0].mxu0 }
  0xed   :  { %v127_v34 = vadd.f32 %v126_v33, %v45_v32  ;;  %v3181_v35 = vpop.f32.mrb[1].mxu0  ;;  %v136_v36 = vpop.f32.mrb[0].mxu1 }
  0xee   :  { %v3187_v37 = vpop.f32.mrb[1].mxu1  ;;  %v137_v44 = vadd.f32 %v136_v36, %v45_v32 }
  0xef   :  { %v3872_v38 = vmax.f32 %v127_v34, 0.0 }
  0xf0   :  { %v131_v39 = vpop.f32.mrb[2].mxu0  ;;  %v3880_v49 = vmax.f32 %v137_v44, 0.0 }
  0xf1   :  { %v132_v41 = vadd.f32 %v131_v39, %v45_v32  ;;  %722 = vperm.xlu0 %3439, %v3872_v38   ;;  %602 = vperm.xlu1 %3433, %v3872_v38   ;;  %v3184_v42 = vpop.f32.mrb[3].mxu0 }
  0xf2   :  { %3231 = vmatmul.mubr.msk.f32.vlgmr.msra.gmra.mrb[12].mxu1 %vm245_vm6, %v3872_v38 }
  0xf3   :  { %v141_v45 = vmax.f32 %v132_v41, 0.0  ;;  %3233 = vmatprep.mubr.msk.f32.mxu1 %vm3672_vm0, %v5083_v1 }
  0xf5   :  { %3441 = vset.pattern.permute.xlu0 %v3677_v47  ;;  %3434 = vset.pattern.permute.xlu1 %v3678_v48 }
  0xf6   :  { %3234 = vmatmul.mubr.msk.f32.gmra.mrb[14].mxu1 %vm245_vm6, %v141_v45  ;;  %752 = vperm.xlu0 %3441, %v3872_v38  }
  0xf7   :  { %632 = vperm.xlu1 %3434, %v3872_v38   ;;  %3236 = vmatprep.mubr.msk.f32.mxu1 %vm3672_vm0, %v5083_v1 }
  0xfa   :  { %3237 = vmatmul.mubr.msk.f32.gmra.mrb[16].mxu1 %vm245_vm6, %v3880_v49  ;;  %3443 = vset.pattern.permute.xlu0 %v3676_v29 }
  0xfb   :  { %3435 = vset.pattern.permute.xlu1 %v3679_v52  ;;  %606 = vperm.xlu0 %3443, %v141_v45  }
  0xfc   :  { %662 = vperm.xlu1 %3435, %v3872_v38   ;;  %3245 = vmatprep.mubr.msk.f32.mxu1 %vm3672_vm0, %v5083_v1 }
  0xff   :  { %3444 = vset.pattern.permute.xlu0 %v3680_v53 }
 0x100   :  { %3436 = vset.pattern.permute.xlu1 %v3676_v29  ;;  %782 = vperm.xlu0 %3444, %v3872_v38   ;;  %v3683_v29 = vmov 8  }
 0x101   :  { %610 = vperm.xlu1 %3436, %v3880_v49  }
 0x104   :  { %3452 = vset.pattern.permute.xlu0 %v3677_v47 }
 0x105   :  { %3437 = vset.pattern.permute.xlu1 %v3681_v54  ;;  %760 = vperm.xlu0 %3452, %v3880_v49  }
 0x106   :  { %692 = vperm.xlu1 %3437, %v3872_v38  }
 0x109   :  { %3455 = vset.pattern.permute.xlu0 %v3682_v57 }
 0x10a   :  { %3438 = vset.pattern.permute.xlu1 %v3678_v48  ;;  %813 = vperm.xlu0 %3455, %v3599_v56  }
 0x10b   :  { %640 = vperm.xlu1 %3438, %v3880_v49  }
 0x10e   :  { %3457 = vset.pattern.permute.xlu0 %v3683_v29 }
 0x10f   :  { %3440 = vset.pattern.permute.xlu1 %v3679_v52  ;;  %591 = vperm.xlu0 %3457, %v141_v45  }
 0x110   :  { %670 = vperm.xlu1 %3440, %v3880_v49  }
 0x113   :  { %3458 = vset.pattern.permute.xlu0 %v3682_v57 }
 0x114   :  { %3442 = vset.pattern.permute.xlu1 %v3681_v54 }
 0x115   :  { %700 = vperm.xlu1 %3442, %v3880_v49  }
 0x119   :  { %3445 = vset.pattern.permute.xlu1 %v3678_v48 }
 0x11a   :  { %636 = vperm.xlu1 %3445, %v141_v45  }
 0x11e   :  { %3446 = vset.pattern.permute.xlu1 %v3679_v52 }
 0x11f   :  { %666 = vperm.xlu1 %3446, %v141_v45  }
 0x123   :  { %3447 = vset.pattern.permute.xlu1 %v3681_v54 }
 0x124   :  { %696 = vperm.xlu1 %3447, %v141_v45  }
 0x128   :  { %3448 = vset.pattern.permute.xlu1 %v3675_v28 }
 0x129   :  { %726 = vperm.xlu1 %3448, %v141_v45  }
 0x12d   :  { %3449 = vset.pattern.permute.xlu1 %v3677_v47 }
 0x12e   :  { %756 = vperm.xlu1 %3449, %v141_v45  }
 0x132   :  { %3450 = vset.pattern.permute.xlu1 %v3680_v53 }
 0x133   :  { %786 = vperm.xlu1 %3450, %v141_v45  }
 0x137   :  { %3451 = vset.pattern.permute.xlu1 %v3675_v28  ;;  %v3601_v28 = vpop.eup %3600 }
 0x138   :  { %730 = vperm.xlu1 %3451, %v3880_v49  }
 0x13c   :  { %3453 = vset.pattern.permute.xlu1 %v3680_v53 }
 0x13d   :  { %790 = vperm.xlu1 %3453, %v3880_v49  }
 0x141   :  { %3454 = vset.pattern.permute.xlu1 %v3683_v29 }
 0x142   :  { %587 = vperm.xlu1 %3454, %v3872_v38  }
 0x146   :  { %595 = vperm.xlu1 %3454, %v3880_v49  }
 0x14a   :  { %3456 = vset.pattern.permute.xlu1 %v3682_v57 }
 0x14b   :  { %818 = vperm.xlu1 %3456, %v3601_v28  }
 0x14f   :  { %3459 = vset.pattern.permute.xlu1 %v3684_v3 }
 0x170   :  { %v3919_v4 = vpop.permute.xlu1 %602  ;;  %v3935_v54 = vpop.permute.xlu0 %722 }
 0x175   :  { %v3945_v61 = vpop.permute.xlu0 %752 }
 0x176   :  { %v3921_v6 = vpop.permute.xlu1 %632 }
 0x17b   :  { %v3923_v8 = vpop.permute.xlu1 %662 }
 0x180   :  { %v3925_v16 = vpop.permute.xlu1 %610 }
 0x181   :  { %5126 = vst [vmem:[#allocation5_spill] sm:$0xff] %v3925_v16 }
 0x185   :  { %v3927_v24 = vpop.permute.xlu1 %692 }
 0x18a   :  { %v3929_v32 = vpop.permute.xlu1 %640 }
 0x18b   :  { %5127 = vst [vmem:[#allocation6_spill] sm:$0xff] %v3929_v32 }
 0x18f   :  { %v3931_v42 = vpop.permute.xlu1 %670 }
 0x190   :  { %5128 = vst [vmem:[#allocation7_spill] sm:$0xff] %v3931_v42 }
 0x194   :  { %v3933_v48 = vpop.permute.xlu1 %700 }
 0x195   :  { %5129 = vst [vmem:[#allocation8_spill] sm:$0xff] %v3933_v48 }
 0x199   :  { %v3940_v58 = vpop.permute.xlu1 %636 }
 0x19e   :  { %v327_v7 = vpop.f32.mrb[2].mxu1  ;;  %v3947_v63 = vpop.permute.xlu1 %666 }
 0x19f   :  { %v351_v10 = vsub.f32 0.0, %v327_v7  ;;  %v3192_v11 = vpop.f32.mrb[3].mxu1  ;;  %5130 = vst [vmem:[#allocation9_spill] sm:$0xff] %v3947_v63 }
 0x1a1   :  { %v356_v13 = vmul.f32 1.442695, %v351_v10 }
 0x1a2   :  { %v332_v15 = vpop.f32.mrb[4].mxu1 }
 0x1a3   :  { %3602 = vpow2.f32 %v356_v13  ;;  %v352_v17 = vsub.f32 0.0, %v332_v15  ;;  %v3195_v18 = vpop.f32.mrb[5].mxu1  ;;  %v3958_v13 = vpop.permute.xlu0 %606 }
 0x1a5   :  { %v358_v19 = vmul.f32 1.442695, %v352_v17 }
 0x1a6   :  { %v337_v21 = vpop.f32.mrb[6].mxu1 }
 0x1a7   :  { %3604 = vpow2.f32 %v358_v19  ;;  %v353_v22 = vsub.f32 0.0, %v337_v21  ;;  %v3198_v23 = vpop.f32.mrb[7].mxu1 }
 0x1a8   :  { %v3971_v23 = vpop.permute.xlu1 %696 }
 0x1a9   :  { %v360_v25 = vmul.f32 1.442695, %v353_v22  ;;  %5131 = vst [vmem:[#allocation10_spill] sm:$0xff] %v3971_v23 }
 0x1aa   :  { %v342_v26 = vpop.f32.mrb[8].mxu1 }
 0x1ab   :  { %3606 = vpow2.f32 %v360_v25  ;;  %v354_v27 = vsub.f32 0.0, %v342_v26  ;;  %v3201_v30 = vpop.f32.mrb[9].mxu1 }
 0x1ad   :  { %v3603_v31 = vpop.eup %3602  ;;  %v362_v33 = vmul.f32 1.442695, %v354_v27 }
 0x1ae   :  { %v366_v34 = vadd.f32 1.0, %v3603_v31  ;;  %v347_v35 = vpop.f32.mrb[10].mxu1 }
 0x1af   :  { %3608 = vpow2.f32 %v362_v33  ;;  %v355_v36 = vsub.f32 0.0, %v347_v35  ;;  %v3204_v37 = vpop.f32.mrb[11].mxu1 }
 0x1b0   :  { %3610 = vrcp.f32 %v366_v34  ;;  %v3987_v34 = vpop.permute.xlu1 %726 }
 0x1b1   :  { %v3605_v38 = vpop.eup %3604  ;;  %v364_v39 = vmul.f32 1.442695, %v355_v36  ;;  %5132 = vst [vmem:[#allocation11_spill] sm:$0xff] %v3987_v34 }
 0x1b2   :  { %v367_v41 = vadd.f32 1.0, %v3605_v38 }
 0x1b3   :  { %3612 = vpow2.f32 %v364_v39 }
 0x1b4   :  { %3614 = vrcp.f32 %v367_v41  ;;  %v3999_v39 = vpop.permute.xlu1 %756  ;;  %v145_v41 = vld [vmem:[%s5078_s2 + $0x10] sm:$0xf]  ;;  %s3702_s2 = smov 18  }
 0x1b5   :  { %v3607_v44 = vpop.eup %3606  ;;  %5133 = vst [vmem:[#allocation12_spill] sm:$0xff] %v3999_v39 }
 0x1b6   :  { %v368_v45 = vadd.f32 1.0, %v3607_v44 }
 0x1b8   :  { %3616 = vrcp.f32 %v368_v45 }
 0x1b9   :  { %v3609_v47 = vpop.eup %3608 }
 0x1ba   :  { %v3611_v49 = vpop.eup %3610  ;;  %v369_v51 = vadd.f32 1.0, %v3609_v47  ;;  %v4011_v47 = vpop.permute.xlu1 %786 }
 0x1bb   :  { %v381_v52 = vmul.f32 %v3611_v49, %v327_v7  ;;  %5134 = vst [vmem:[#allocation13_spill] sm:$0xff] %v4011_v47 }
 0x1bc   :  { %3618 = vrcp.f32 %v369_v51 }
 0x1bd   :  { %v3613_v53 = vpop.eup %3612  ;;  %3214 = vmatmul.mubr.msk.f32.vlgmr.msra.gmra.mrb[4].mxu0 %vm390_vm7, %v381_v52 }
 0x1be   :  { %v3615_v56 = vpop.eup %3614  ;;  %v370_v29 = vadd.f32 1.0, %v3613_v53  ;;  %3216 = vmatprep.mubr.msk.f32.mxu0 %vm3672_vm0, %v5083_v1 }
 0x1bf   :  { %v382_v59 = vmul.f32 %v3615_v56, %v332_v15 }
 0x1c0   :  { %3620 = vrcp.f32 %v370_v29 }
 0x1c1   :  { %3217 = vmatmul.mubr.msk.f32.gmra.mrb[6].mxu0 %vm390_vm7, %v382_v59  ;;  %3622 = vrsqrt.f32 %v145_v41 }
 0x1c2   :  { %v3617_v60 = vpop.eup %3616  ;;  %3219 = vmatprep.mubr.msk.f32.mxu0 %vm3672_vm0, %v5083_v1 }
 0x1c3   :  { %v383_v62 = vmul.f32 %v3617_v60, %v337_v21 }
 0x1c5   :  { %v3949_v2 = vpop.f32.mrb[12].mxu1  ;;  %3220 = vmatmul.mubr.msk.f32.gmra.mrb[8].mxu0 %vm390_vm7, %v383_v62 }
 0x1c6   :  { %v3619_v28 = vpop.eup %3618  ;;  %v3232_v7 = vpop.f32.mrb[13].mxu1  ;;  %v613_v10 = vmul.f32 %v3919_v4, %v3949_v2  ;;  %v703_v11 = vmul.f32 %v3927_v24, %v3949_v2  ;;  %3222 = vmatprep.mubr.msk.f32.mxu0 %vm3672_vm0, %v5083_v1  ;;  %v643_v19 = vmul.f32 %v3921_v6, %v3949_v2  ;;  %v733_v21 = vmul.f32 %v3935_v54, %v3949_v2 }
 0x1c7   :  { %v384_v15 = vmul.f32 %v3619_v28, %v342_v26  ;;  %v3975_v26 = vpop.permute.xlu0 %782  ;;  %v673_v30 = vmul.f32 %v3923_v8, %v3949_v2  ;;  %v227_v28 = vmul.f32 %v3847_v46, %v3787_v9  ;;  %v4035_v7 = vpop.permute.xlu1 %730 }
 0x1c8   :  { %619 = vrot.lane.b32.xlu1 %v613_v10, %s3685_s28  ;;  %709 = vrot.lane.b32.xlu0 %v703_v11, %s3686_s29  ;;  %v793_v31 = vmul.f32 %v3975_v26, %v3949_v2  ;;  %5136 = vst [vmem:[#allocation15_spill] sm:$0xff] %v4035_v7  ;;  %v3692_v10 = vmov 2  }
 0x1c9   :  { %v3962_v17 = vpop.f32.mrb[14].mxu1  ;;  %3223 = vmatmul.mubr.msk.f32.gmra.mrb[10].mxu0 %vm390_vm7, %v384_v15  ;;  %v4040_v11 = vmul.f32 1.7320508, %v227_v28 }
 0x1ca   :  { %v3621_v18 = vpop.eup %3620  ;;  %v3235_v22 = vpop.f32.mrb[15].mxu1  ;;  %3225 = vmatprep.mubr.msk.f32.mxu0 %vm3672_vm0, %v5083_v1  ;;  %v614_v36 = vmul.f32 %v3958_v13, %v3962_v17  ;;  %v704_v37 = vmul.f32 %v3971_v23, %v3962_v17  ;;  %v644_v38 = vmul.f32 %v3940_v58, %v3962_v17  ;;  %v734_v44 = vmul.f32 %v3987_v34, %v3962_v17 }
 0x1cb   :  { %v385_v25 = vmul.f32 %v3621_v18, %v347_v35  ;;  %v763_v35 = vmul.f32 %v3945_v61, %v3949_v2  ;;  %v674_v45 = vmul.f32 %v3947_v63, %v3962_v17  ;;  %v794_v49 = vmul.f32 %v4011_v47, %v3962_v17  ;;  %v3623_v56 = vpop.eup %3622  ;;  %v4027_v59 = vpop.permute.xlu0 %760 }
 0x1cc   :  { %649 = vrot.lane.b32.xlu1 %v643_v19, %s3687_s30  ;;  %739 = vrot.lane.b32.xlu0 %v733_v21, %s3688_s7  ;;  %v764_v51 = vmul.f32 %v3999_v39, %v3962_v17  ;;  %5135 = vst [vmem:[#allocation14_spill] sm:$0xff] %v4027_v59  ;;  %v228_v18 = vmul.f32 %v3844_v43, %v3794_v12  ;;  %v4048_v9 = vpop.permute.xlu1 %790 }
 0x1cd   :  { %v3977_v27 = vpop.f32.mrb[16].mxu1  ;;  %3226 = vmatmul.mubr.msk.f32.gmra.mrb[12].mxu0 %vm390_vm7, %v385_v25  ;;  %5137 = vst [vmem:[#allocation16_spill] sm:$0xff] %v4048_v9  ;;  %v226_v21 = vmul.f32 %v3841_v40, %v3777_v5  ;;  %v229_v12 = vmul.f32 %v3850_v50, %v3802_v14 }
 0x1ce   :  { %v3238_v33 = vpop.f32.mrb[17].mxu1  ;;  %3270 = vmatprep.mubr.msk.f32.mxu0 %vm3672_vm0, %v5083_v1  ;;  %v675_v52 = vmul.f32 %v3931_v42, %v3977_v27  ;;  %v615_v53 = vmul.f32 %v3925_v16, %v3977_v27  ;;  %v645_v29 = vmul.f32 %v3929_v32, %v3977_v27  ;;  %v765_v60 = vmul.f32 %v4027_v59, %v3977_v27 }
 0x1cf   :  { %v705_v62 = vmul.f32 %v3933_v48, %v3977_v27  ;;  %v735_v15 = vmul.f32 %v4035_v7, %v3977_v27  ;;  %v4050_v46 = vmul.f32 1.7320508, %v228_v18  ;;  %v795_v19 = vmul.f32 %v4048_v9, %v3977_v27  ;;  %v4076_v43 = vpop.permute.xlu0 %813 }
 0x1d0   :  { %679 = vrot.lane.b32.xlu1 %v673_v30, %s3689_s9  ;;  %799 = vrot.lane.b32.xlu0 %v793_v31, %s3690_s10  ;;  %v4058_v22 = vmul.f32 1.7320508, %v226_v21  ;;  %v4069_v5 = vmul.f32 1.7320508, %v229_v12  ;;  %v4074_v40 = vpop.permute.xlu1 %587 }
 0x1d1   :  { %5138 = vst [vmem:[#allocation17_spill] sm:$0xff] %v4074_v40 }
 0x1d3   :  { %v4082_v14 = vpop.permute.xlu0 %591 }
 0x1d4   :  { %769 = vrot.lane.b32.xlu1 %v763_v35, %s3691_s5  ;;  %621 = vrot.lane.b32.xlu0 %v614_v36, %s3685_s28  ;;  %v4078_v25 = vpop.permute.xlu1 %595  ;;  %5140 = vst [vmem:[#allocation19_spill] sm:$0xff] %v4082_v14  ;;  %v598_v35 = vmul.f32 %v4074_v40, %v3949_v2 }
 0x1d5   :  { %5139 = vst [vmem:[#allocation18_spill] sm:$0xff] %v4078_v25 }
 0x1d8   :  { %711 = vrot.lane.b32.xlu1 %v704_v37, %s3686_s29  ;;  %651 = vrot.lane.b32.xlu0 %v644_v38, %s3687_s30  ;;  %v4080_v30 = vpop.permute.xlu1 %818 }
 0x1dc   :  { %741 = vrot.lane.b32.xlu1 %v734_v44, %s3688_s7  ;;  %681 = vrot.lane.b32.xlu0 %v674_v45, %s3689_s9 }
 0x1e0   :  { %801 = vrot.lane.b32.xlu1 %v794_v49, %s3690_s10  ;;  %771 = vrot.lane.b32.xlu0 %v764_v51, %s3691_s5 }
 0x1e4   :  { %683 = vrot.lane.b32.xlu0 %v675_v52, %s3689_s9  ;;  %623 = vrot.lane.b32.xlu1 %v615_v53, %s3685_s28  ;;  %v599_v52 = vmul.f32 %v4082_v14, %v3962_v17  ;;  %s3697_s9 = smov 116  }
 0x1e8   :  { %823 = vperm.xlu0 %3458, %v3623_v56   ;;  %653 = vrot.lane.b32.xlu1 %v645_v29, %s3687_s30  ;;  %s3696_s30 = smov 68  }
 0x1ec   :  { %773 = vrot.lane.b32.xlu0 %v765_v60, %s3691_s5  ;;  %713 = vrot.lane.b32.xlu1 %v705_v62, %s3686_s29  ;;  %s3695_s29 = smov 108   ;;  %s3698_s5 = smov 28  }
 0x1ed   :  { %3461 = vset.pattern.permute.xlu0 %v3692_v10 }
 0x1f0   :  { %1029 = vperm.xlu0 %3461, %v4040_v11   ;;  %743 = vrot.lane.b32.xlu1 %v735_v15, %s3688_s7 }
 0x1f4   :  { %1033 = vperm.xlu0 %3461, %v4050_v46   ;;  %803 = vrot.lane.b32.xlu1 %v795_v19, %s3690_s10 }
 0x1f8   :  { %3463 = vset.pattern.permute.xlu0 %v3684_v3  ;;  %1004 = vperm.xlu1 %3459, %v4040_v11  }
 0x1f9   :  { %1000 = vperm.xlu0 %3463, %v4058_v22  }
 0x1fc   :  { %3460 = vset.pattern.permute.xlu1 %v3692_v10 }
 0x1fd   :  { %1025 = vperm.xlu1 %3460, %v4058_v22  }
 0x201   :  { %3462 = vset.pattern.permute.xlu1 %v3684_v3 }
 0x202   :  { %1008 = vperm.xlu1 %3462, %v4050_v46  }
 0x206   :  { %1012 = vperm.xlu1 %3462, %v4069_v5  }
 0x20a   :  { %3464 = vset.pattern.permute.xlu1 %v3692_v10 }
 0x20b   :  { %1037 = vperm.xlu1 %3464, %v4069_v5  }
 0x23a   :  { %v620_v50 = vpop.permute.xlu1 %619  ;;  %v710_v3 = vpop.permute.xlu0 %709 }
 0x23b   :  { %v628_v36 = vadd.f32 %v620_v50, %v598_v35 }
 0x23e   :  { %v650_v31 = vpop.permute.xlu1 %649  ;;  %v740_v33 = vpop.permute.xlu0 %739 }
 0x23f   :  { %v658_v41 = vadd.f32 %v650_v31, %v628_v36 }
 0x242   :  { %v680_v37 = vpop.permute.xlu1 %679  ;;  %v800_v38 = vpop.permute.xlu0 %799 }
 0x243   :  { %v688_v44 = vadd.f32 %v680_v37, %v658_v41 }
 0x245   :  { %v718_v51 = vadd.f32 %v710_v3, %v688_v44  ;;  %v600_v44 = vmul.f32 %v4078_v25, %v3977_v27 }
 0x246   :  { %v770_v45 = vpop.permute.xlu1 %769  ;;  %v622_v49 = vpop.permute.xlu0 %621 }
 0x247   :  { %v629_v29 = vadd.f32 %v622_v49, %v599_v52  ;;  %v748_v60 = vadd.f32 %v740_v33, %v718_v51 }
 0x249   :  { %v778_v2 = vadd.f32 %v770_v45, %v748_v60 }
 0x24a   :  { %v712_v53 = vpop.permute.xlu1 %711  ;;  %v652_v56 = vpop.permute.xlu0 %651 }
 0x24b   :  { %v659_v62 = vadd.f32 %v652_v56, %v629_v29  ;;  %v4088_v31 = vadd.f32 %v800_v38, %v778_v2  ;;  %v236_v2 = vld [vmem:[%s5079_s3] sm:$0xff] }
 0x24d   :  { %v826_v17 = vmul.f32 %v4076_v43, %v4088_v31 }
 0x24e   :  { %v742_v28 = vpop.permute.xlu1 %741  ;;  %v682_v15 = vpop.permute.xlu0 %681 }
 0x24f   :  { %v689_v18 = vadd.f32 %v682_v15, %v659_v62 }
 0x251   :  { %v719_v19 = vadd.f32 %v712_v53, %v689_v18 }
 0x252   :  { %v802_v21 = vpop.permute.xlu1 %801  ;;  %v772_v50 = vpop.permute.xlu0 %771 }
 0x253   :  { %v749_v12 = vadd.f32 %v742_v28, %v719_v19  ;;  %v237_v19 = vld [vmem:[%s5079_s3 + $0x8] sm:$0xff] }
 0x255   :  { %v779_v35 = vadd.f32 %v772_v50, %v749_v12  ;;  %v239_v12 = vld [vmem:[%s5079_s3 + $0x18] sm:$0xff]  ;;  %v240_v50 = vld [vmem:[%s5079_s3 + $0x20] sm:$0xff] }
 0x256   :  { %v624_v3 = vpop.permute.xlu1 %623  ;;  %v684_v51 = vpop.permute.xlu0 %683 }
 0x257   :  { %v4090_v36 = vadd.f32 %v802_v21, %v779_v35  ;;  %v630_v45 = vadd.f32 %v624_v3, %v600_v44  ;;  %v238_v21 = vld [vmem:[%s5079_s3 + $0x10] sm:$0xff] }
 0x259   :  { %v827_v33 = vmul.f32 %v4080_v30, %v4090_v36 }
 0x25a   :  { %v654_v37 = vpop.permute.xlu1 %653 }
 0x25b   :  { %v3343_v41 = vpack.c.bf16 %v827_v33, %v826_v17  ;;  %v660_v38 = vadd.f32 %v654_v37, %v630_v45 }
 0x25d   :  { %3344 = vmatpush3.bf16.msra.mxu1 %v3343_v41  ;;  %v690_v52 = vadd.f32 %v684_v51, %v660_v38 }
 0x25e   :  { %3243 = vmatprep.subr.mxu1 %v5083_v1  ;;  %v714_v49 = vpop.permute.xlu1 %713 }
 0x25f   :  { %v720_v29 = vadd.f32 %v714_v49, %v690_v52 }
 0x262   :  { %v744_v53 = vpop.permute.xlu1 %743 }
 0x263   :  { %v750_v60 = vadd.f32 %v744_v53, %v720_v29 }
 0x266   :  { %v804_v15 = vpop.permute.xlu1 %803 }
 0x267   :  { %v4099_v56 = vpop.permute.xlu0 %823 }
 0x26b   :  { %v774_v62 = vpop.permute.xlu0 %773 }
 0x26c   :  { %v780_v28 = vadd.f32 %v774_v62, %v750_v60 }
 0x26e   :  { %v4101_v18 = vadd.f32 %v804_v15, %v780_v28  ;;  %v230_v28 = vmul.f32 %v3853_v55, %v3819_v20 }
 0x270   :  { %v828_v27 = vmul.f32 %v4099_v56, %v4101_v18 }
 0x272   :  { %3244 = vmatpush3.msk.msra.mxu1 %vm845_vm8, %v828_v27 }
 0x273   :  { %3246 = vmatmul.mubr.msk.f32.vlgmr.msra.gmra.mrb[18].mxu1 %vm829_vm9, %v236_v2 }
 0x274   :  { %3248 = vmatprep.mubr.msk.f32.mxu1 %vm3672_vm0, %v5083_v1 }
 0x277   :  { %3249 = vmatmul.mubr.msk.f32.gmra.mrb[20].mxu1 %vm829_vm9, %v237_v19  ;;  %v235_v19 = vmul.f32 1.7320508, %v230_v28  ;;  %v4172_v55 = vpop.permute.xlu1 %1004 }
 0x278   :  { %3251 = vmatprep.mubr.msk.f32.mxu1 %vm3672_vm0, %v5083_v1 }
 0x27b   :  { %3252 = vmatmul.mubr.msk.f32.gmra.mrb[22].mxu1 %vm829_vm9, %v238_v21 }
 0x27c   :  { %3254 = vmatprep.mubr.msk.f32.mxu1 %vm3672_vm0, %v5083_v1 }
 0x27f   :  { %3255 = vmatmul.mubr.msk.f32.gmra.mrb[24].mxu1 %vm829_vm9, %v239_v12 }
 0x280   :  { %3257 = vmatprep.mubr.msk.f32.mxu1 %vm3672_vm0, %v5083_v1 }
 0x283   :  { %3258 = vmatmul.mubr.msk.f32.gmra.mrb[26].mxu1 %vm829_vm9, %v240_v50 }
 0x284   :  { %1635 = vmatprep.mubr.f32.mxu1 %v5083_v1 }
 0x290   :  { %v4135_v35 = vpop.f32.mrb[4].mxu0 }
 0x291   :  { %5141 = vst [vmem:[#allocation20_spill] sm:$0xff] %v4135_v35  ;;  %v3215_v3 = vpop.f32.mrb[5].mxu0 }
 0x294   :  { %v4137_v17 = vpop.f32.mrb[6].mxu0 }
 0x295   :  { %5142 = vst [vmem:[#allocation21_spill] sm:$0xff] %v4137_v17  ;;  %v3218_v33 = vpop.f32.mrb[7].mxu0 }
 0x298   :  { %v4139_v37 = vpop.f32.mrb[8].mxu0 }
 0x299   :  { %5143 = vst [vmem:[#allocation22_spill] sm:$0xff] %v4139_v37  ;;  %v3221_v41 = vpop.f32.mrb[9].mxu0 }
 0x29a   :  { %v4174_v41 = vpop.permute.xlu1 %1025 }
 0x29c   :  { %v4141_v44 = vpop.f32.mrb[10].mxu0 }
 0x29d   :  { %5144 = vst [vmem:[#allocation23_spill] sm:$0xff] %v4141_v44  ;;  %v3224_v45 = vpop.f32.mrb[11].mxu0 }
 0x29e   :  { %v4176_v45 = vpop.permute.xlu0 %1029 }
 0x2a0   :  { %v4143_v38 = vpop.f32.mrb[12].mxu0 }
 0x2a1   :  { %5145 = vst [vmem:[#allocation24_spill] sm:$0xff] %v4143_v38  ;;  %v3227_v49 = vpop.f32.mrb[13].mxu0 }
 0x2a2   :  { %v4180_v49 = vpop.permute.xlu0 %1033 }
 0x346   :  { %v915_v51 = vpop.f32.mrb[18].mxu1 }
 0x347   :  { %v4146_v52 = vmul.f32 %v915_v51, %v4135_v35  ;;  %949 = vrot.lane.b32.xlu0 %v915_v51, %s3693_s22  ;;  %v3247_v53 = vpop.f32.mrb[19].mxu1 }
 0x34a   :  { %v920_v29 = vpop.f32.mrb[20].mxu1 }
 0x34b   :  { %v4150_v60 = vmul.f32 %v920_v29, %v4137_v17  ;;  %951 = vrot.lane.b32.xlu1 %v920_v29, %s3693_s22  ;;  %v3250_v62 = vpop.f32.mrb[21].mxu1 }
 0x34e   :  { %v925_v15 = vpop.f32.mrb[22].mxu1 }
 0x34f   :  { %v4156_v27 = vmul.f32 %v925_v15, %v4139_v37  ;;  %953 = vrot.lane.b32.xlu0 %v925_v15, %s3693_s22  ;;  %v3253_v2 = vpop.f32.mrb[23].mxu1 }
 0x352   :  { %v930_v21 = vpop.f32.mrb[24].mxu1 }
 0x353   :  { %v942_v12 = vmul.f32 %v930_v21, %v4141_v44  ;;  %1016 = vperm.xlu0 %3463, %v235_v19   ;;  %955 = vrot.lane.b32.xlu1 %v930_v21, %s3693_s22  ;;  %v3256_v50 = vpop.f32.mrb[25].mxu1 }
 0x356   :  { %v935_v3 = vpop.f32.mrb[26].mxu1 }
 0x357   :  { %v4162_v33 = vmul.f32 %v935_v3, %v4143_v38  ;;  %3465 = vset.pattern.permute.xlu0 %v3682_v57  ;;  %1041 = vperm.xlu1 %3464, %v235_v19   ;;  %v3259_v20 = vpop.f32.mrb[27].mxu1 }
 0x358   :  { %971 = vperm.xlu0 %3465, %v4058_v22   ;;  %v4178_v22 = vpop.permute.xlu1 %1008 }
 0x35b   :  { %957 = vrot.lane.b32.xlu1 %v935_v3, %s3693_s22 }
 0x35c   :  { %986 = vperm.xlu0 %3465, %v4069_v5   ;;  %3466 = vset.pattern.permute.xlu1 %v3682_v57  ;;  %v4182_v5 = vpop.permute.xlu1 %1012  ;;  %v4184_v57 = vpop.permute.xlu0 %1000 }
 0x35d   :  { %5146 = vst [vmem:[#allocation25_spill] sm:$0xff] %v4182_v5 }
 0x35f   :  { %976 = vperm.xlu1 %3466, %v4040_v11  }
 0x360   :  { %3577 = vset.pattern.permute.xlu0 %v3692_v10  ;;  %v4186_v11 = vpop.permute.xlu1 %1037 }
 0x361   :  { %5147 = vst [vmem:[#allocation26_spill] sm:$0xff] %v4186_v11 }
 0x363   :  { %981 = vperm.xlu1 %3466, %v4050_v46  }
 0x367   :  { %991 = vperm.xlu1 %3466, %v235_v19  }
 0x3b9   :  { %v950_v10 = vpop.permute.xlu0 %949 }
 0x3ba   :  { %v964_v46 = vmul.f32 %v950_v10, %v4135_v35 }
 0x3bc   :  { %v1044_v29 = vmul.f32 %v4174_v41, %v964_v46  ;;  %v1019_v28 = vmul.f32 %v4184_v57, %v964_v46 }
 0x3bd   :  { %v952_v51 = vpop.permute.xlu1 %951 }
 0x3be   :  { %v965_v53 = vmul.f32 %v952_v51, %v4137_v17 }
 0x3c0   :  { %v1045_v62 = vmul.f32 %v4176_v45, %v965_v53  ;;  %v1020_v15 = vmul.f32 %v4172_v55, %v965_v53 }
 0x3c1   :  { %v954_v2 = vpop.permute.xlu0 %953 }
 0x3c2   :  { %v3472_v19 = vpack.i.bf16 %v1045_v62, %v1044_v29  ;;  %v3467_v21 = vpack.i.bf16 %v1020_v15, %v1019_v28  ;;  %v966_v50 = vmul.f32 %v954_v2, %v4139_v37 }
 0x3c4   :  { %3473 = vrot.lane.b32.xlu1 %v3472_v19, %s3690_s10  ;;  %3468 = vrot.lane.b32.xlu0 %v3467_v21, %s3693_s22  ;;  %v1046_v10 = vmul.f32 %v4180_v49, %v966_v50  ;;  %v1021_v1 = vmul.f32 %v4178_v22, %v966_v50 }
 0x3c5   :  { %v956_v3 = vpop.permute.xlu1 %955 }
 0x3c6   :  { %v967_v20 = vmul.f32 %v956_v3, %v4141_v44 }
 0x3c8   :  { %v1047_v51 = vmul.f32 %v4186_v11, %v967_v20  ;;  %v1022_v0 = vmul.f32 %v4182_v5, %v967_v20 }
 0x3ca   :  { %v3482_v17 = vpack.i.bf16 %v1047_v51, %v1046_v10  ;;  %v3477_v29 = vpack.i.bf16 %v1022_v0, %v1021_v1 }
 0x3cc   :  { %3483 = vrot.lane.b32.xlu1 %v3482_v17, %s3690_s10  ;;  %3478 = vrot.lane.b32.xlu0 %v3477_v29, %s3693_s22 }
 0x3d2   :  { %v4204_v62 = vpop.permute.xlu0 %1016 }
 0x3d3   :  { %5148 = vst [vmem:[#allocation27_spill] sm:$0xff] %v4204_v62 }
 0x3d6   :  { %v4206_v28 = vpop.permute.xlu1 %1041 }
 0x3d7   :  { %5149 = vst [vmem:[#allocation28_spill] sm:$0xff] %v4206_v28  ;;  %v4208_v15 = vpop.permute.xlu0 %971 }
 0x3d8   :  { %v994_v2 = vmul.f32 %v4208_v15, %v964_v46 }
 0x3da   :  { %v1089_v19 = vsel %vm245_vm6, %v4146_v52, %v994_v2  ;;  %v958_v21 = vpop.permute.xlu1 %957 }
 0x3db   :  { %v968_v3 = vmul.f32 %v958_v21, %v4143_v38  ;;  %v4214_v10 = vpop.permute.xlu0 %986 }
 0x3dc   :  { %5150 = vst [vmem:[#allocation29_spill] sm:$0xff] %v4214_v10  ;;  %v997_v0 = vmul.f32 %v4214_v10, %v967_v20 }
 0x3dd   :  { %v1048_v1 = vmul.f32 %v4206_v28, %v968_v3  ;;  %v1023_v17 = vmul.f32 %v4204_v62, %v968_v3 }
 0x3de   :  { %v1092_v51 = vsel %vm245_vm6, %v942_v12, %v997_v0  ;;  %v4220_v29 = vpop.permute.xlu1 %976 }
 0x3df   :  { %v995_v46 = vmul.f32 %v4220_v29, %v965_v53  ;;  %1082 = vrot.lane.b32.xlu1 %v1048_v1, %s3690_s10  ;;  %1062 = vrot.lane.b32.xlu0 %v1023_v17, %s3693_s22 }
 0x3e1   :  { %v1090_v52 = vsel %vm245_vm6, %v4150_v60, %v995_v46 }
 0x3e2   :  { %v4227_v2 = vpop.permute.xlu1 %981 }
 0x3e3   :  { %v996_v20 = vmul.f32 %v4227_v2, %v966_v50 }
 0x3e5   :  { %v1091_v21 = vsel %vm245_vm6, %v4156_v27, %v996_v20 }
 0x3e6   :  { %v4232_v38 = vpop.permute.xlu1 %991 }
 0x3e7   :  { %5151 = vst [vmem:[#allocation30_spill] sm:$0xff] %v4232_v38  ;;  %v998_v12 = vmul.f32 %v4232_v38, %v968_v3 }
 0x3e9   :  { %v1093_v53 = vsel %vm245_vm6, %v4162_v33, %v998_v12  ;;  %v5152_v12 = vmov 0.0|0.0  }
 0x436   :  { %v3474_v0 = vpop.permute.xlu1 %3473  ;;  %v3469_v1 = vpop.permute.xlu0 %3468 }
 0x437   :  { %v3476_v17 = vunpack.i.h.bf16 %v3474_v0  ;;  %v3475_v60 = vunpack.i.l.bf16 %v3474_v0  ;;  %v3471_v46 = vunpack.i.h.bf16 %v3469_v1  ;;  %v3470_v44 = vunpack.i.l.bf16 %v3469_v1 }
 0x439   :  { %v1095_v50 = vsel %vm1094_vm10, %v1089_v19, %v3470_v44  ;;  %v1096_v37 = vsel %vm1094_vm10, %v1090_v52, %v3471_v46  ;;  %v1202_v46 = vld [vmem:[#allocation2 + $0x110] sm:$0xff] }
 0x43a   :  { %v1101_v27 = vsel %vm1100_vm11, %v1095_v50, %v3475_v60  ;;  %v1102_v20 = vsel %vm1100_vm11, %v1096_v37, %v3476_v17  ;;  %v5153_v37 = vmov 0.0   ;;  %v1200_v17 = vld [vmem:[#allocation2 + $0xf8] sm:$0xff]  ;;  %v1199_v50 = vld [vmem:[#allocation2 + $0xf0] sm:$0xff] }
 0x43b   :  { %v3346_v3 = vpack.c.bf16 %v1102_v20, %v1101_v27  ;;  %v1201_v27 = vld [vmem:[#allocation2 + $0x108] sm:$0xff]  ;;  %v3351_v10 = vpack.c.bf16 %v1202_v46, %v1200_v17 }
 0x43c   :  { %v1204_v20 = vld [vmem:[#allocation2 + $0x128] sm:$0xff] }
 0x43d   :  { %3347 = vmatpush3.bf16.msra.mxu0 %v3346_v3 }
 0x43e   :  { %v3484_v35 = vpop.permute.xlu1 %3483  ;;  %v3479_v33 = vpop.permute.xlu0 %3478  ;;  %3348 = vmatprep.subr.bf16.mxu0 %v5152_v12 }
 0x43f   :  { %v3486_v38 = vunpack.i.h.bf16 %v3484_v35  ;;  %v3485_v28 = vunpack.i.l.bf16 %v3484_v35  ;;  %v3481_v62 = vunpack.i.h.bf16 %v3479_v33  ;;  %v3480_v0 = vunpack.i.l.bf16 %v3479_v33  ;;  %v1206_v35 = vld [vmem:[#allocation2 + $0x140] sm:$0xff] }
 0x441   :  { %v1097_v1 = vsel %vm1094_vm10, %v1091_v21, %v3480_v0  ;;  %v1098_v44 = vsel %vm1094_vm10, %v1092_v51, %v3481_v62  ;;  %v241_v62 = vld [vmem:[%s5080_s4] sm:$0xff]  ;;  %v3355_v51 = vpack.c.bf16 %v1206_v35, %v1204_v20  ;;  %v243_v0 = vld [vmem:[%s5080_s4 + $0x10] sm:$0xf] }
 0x442   :  { %v1103_v19 = vsel %vm1100_vm11, %v1097_v1, %v3485_v28  ;;  %v1104_v52 = vsel %vm1100_vm11, %v1098_v44, %v3486_v38  ;;  %v3353_v38 = vpack.c.bf16 %v1201_v27, %v1199_v50  ;;  %v1205_v1 = vld [vmem:[#allocation2 + $0x138] sm:$0xff] }
 0x443   :  { %v3349_v60 = vpack.c.bf16 %v1104_v52, %v1103_v19 }
 0x445   :  { %3350 = vmatpush3.bf16.msra.mxu0 %v3349_v60 }
 0x446   :  { %3268 = vmatprep.subr.mxu0 %v5153_v37 }
 0x451   :  { %v1083_v3 = vpop.permute.xlu1 %1082  ;;  %v1063_v33 = vpop.permute.xlu0 %1062 }
 0x452   :  { %v1099_v21 = vsel %vm1094_vm10, %v1093_v53, %v1063_v33  ;;  %v242_v53 = vld [vmem:[%s5080_s4 + $0x8] sm:$0xff] }
 0x453   :  { %v1105_v28 = vsel %vm1100_vm11, %v1099_v21, %v1083_v3 }
 0x454   :  { %3269 = vmatpush3.msra.mxu0 %v1105_v28 }
 0x455   :  { %3271 = vmatmul.mubr.msk.f32.vlgmr.msra.gmra.mrb[14].mxu0 %vm1106_vm12, %v241_v62  ;;  %3352 = vmatprep.subr.bf16.mxu0 %v3351_v10  ;;  %v1203_v10 = vld [vmem:[#allocation2 + $0x120] sm:$0xff] }
 0x456   :  { %3273 = vmatprep.mubr.msk.f32.mxu0 %vm3672_vm0, %v5153_v37  ;;  %3354 = vmatpush1.bf16.msra.mxu0 %v3353_v38  ;;  %v3357_v44 = vpack.c.bf16 %v1205_v1, %v1203_v10 }
 0x457   :  { %3356 = vmatprep.subr.bf16.mxu0 %v3355_v51 }
 0x459   :  { %3274 = vmatmul.mubr.msk.f32.gmra.mrb[16].mxu0 %vm1106_vm12, %v242_v53 }
 0x45a   :  { %3276 = vmatprep.mubr.msk.f32.mxu0 %vm3672_vm0, %v5153_v37  ;;  %3358 = vmatpush1.bf16.msra.mxu0 %v3357_v44 }
 0x45b   :  { %3363 = vmatprep.subr.bf16.mxu0 %v5152_v12 }
 0x45d   :  { %3277 = vmatmul.mubr.msk.f32.gmra.mrb[18].mxu0 %vm1106_vm12, %v243_v0 }
 0x45e   :  { %1280 = vmatprep.mubr.f32.mxu0 %v5153_v37 }
 0x528   :  { %v1182_v19 = vpop.f32.mrb[14].mxu0 }
 0x529   :  { %v1196_v52 = vmul.f32 %v1182_v19, %v4076_v43  ;;  %v3272_v60 = vpop.f32.mrb[15].mxu0 }
 0x52b   :  { %3093 = vmatmul.mubr.msk.f32.vlgmr.msra.gmra.mrb[20].mxu0 %vm390_vm7, %v1196_v52 }
 0x52c   :  { %v1187_v17 = vpop.f32.mrb[16].mxu0  ;;  %1286 = vmatprep.mubr.f32.mxu0 %v5153_v37 }
 0x52d   :  { %v1197_v46 = vmul.f32 %v1187_v17, %v4080_v30  ;;  %v3275_v50 = vpop.f32.mrb[17].mxu0 }
 0x52f   :  { %3094 = vmatmul.mubr.msk.f32.gmra.mrb[22].mxu0 %vm390_vm7, %v1197_v46 }
 0x530   :  { %v1192_v27 = vpop.f32.mrb[18].mxu0  ;;  %1292 = vmatprep.mubr.f32.mxu0 %v5153_v37 }
 0x531   :  { %v1198_v20 = vmul.f32 %v1192_v27, %v4099_v56  ;;  %v3278_v35 = vpop.f32.mrb[19].mxu0 }
 0x533   :  { %3095 = vmatmul.mubr.msk.f32.gmra.mrb[24].mxu0 %vm390_vm7, %v1198_v20 }
 0x534   :  { %3283 = vmatprep.mubr.msk.f32.mxu0 %vm3672_vm0, %v5153_v37 }
 0x5fe   :  { %v1282_v3 = vpop.f32.mrb[20].mxu0 }
 0x5ff   :  { %v1284_v33 = vpop.f32.mrb[21].mxu0  ;;  %v1320_v21 = vmul.f32 %v1282_v3, %v3921_v6  ;;  %v1302_v62 = vmul.f32 %v1282_v3, %v3919_v4  ;;  %v1338_v51 = vmul.f32 %v1282_v3, %v3923_v8  ;;  %v1392_v53 = vmul.f32 %v1282_v3, %v3945_v61 }
 0x600   :  { %v1425_v10 = vmul.f32 %v1284_v33, %v3975_v26  ;;  %v1356_v44 = vmul.f32 %v1282_v3, %v3927_v24  ;;  %v1374_v19 = vmul.f32 %v1282_v3, %v3935_v54  ;;  %v1393_v60 = vmul.f32 %v1284_v33, %v3945_v61 }
 0x601   :  { %1326 = vrot.lane.b32.xlu1 %v1320_v21, %s3694_s27  ;;  %1308 = vrot.lane.b32.xlu0 %v1302_v62, %s3695_s29 }
 0x602   :  { %v4281_v38 = vpop.f32.mrb[22].mxu0 }
 0x603   :  { %v1290_v28 = vpop.f32.mrb[23].mxu0  ;;  %v1303_v52 = vmul.f32 %v4281_v38, %v3958_v13  ;;  %v1321_v17 = vmul.f32 %v4281_v38, %v3940_v58  ;;  %v1357_v46 = vmul.f32 %v4281_v38, %v3971_v23  ;;  %v1339_v50 = vmul.f32 %v4281_v38, %v3947_v63 }
 0x604   :  { %v1395_v27 = vmul.f32 %v1290_v28, %v3999_v39  ;;  %v1375_v20 = vmul.f32 %v4281_v38, %v3987_v34  ;;  %v1394_v35 = vmul.f32 %v4281_v38, %v3999_v39  ;;  %v1426_v21 = vmul.f32 %v1290_v28, %v4011_v47 }
 0x605   :  { %1344 = vrot.lane.b32.xlu1 %v1338_v51, %s3696_s30  ;;  %1404 = vrot.lane.b32.xlu0 %v1392_v53, %s3693_s22 }
 0x606   :  { %v4287_v0 = vpop.f32.mrb[24].mxu0 }
 0x607   :  { %v1296_v1 = vpop.f32.mrb[25].mxu0  ;;  %v1304_v33 = vmul.f32 %v4287_v0, %v3925_v16  ;;  %v1322_v62 = vmul.f32 %v4287_v0, %v3929_v32  ;;  %v1340_v51 = vmul.f32 %v4287_v0, %v3931_v42  ;;  %v1358_v53 = vmul.f32 %v4287_v0, %v3933_v48 }
 0x608   :  { %v1396_v28 = vmul.f32 %v4287_v0, %v4027_v59 }
 0x609   :  { %1362 = vrot.lane.b32.xlu1 %v1356_v44, %s3688_s7  ;;  %1431 = vrot.lane.b32.xlu0 %v1425_v10, %s3697_s9  ;;  %v1376_v10 = vmul.f32 %v4287_v0, %v4035_v7  ;;  %v1397_v44 = vmul.f32 %v1296_v1, %v4027_v59 }
 0x60d   :  { %1380 = vrot.lane.b32.xlu1 %v1374_v19, %s3698_s5  ;;  %1310 = vrot.lane.b32.xlu0 %v1303_v52, %s3695_s29  ;;  %v1427_v19 = vmul.f32 %v1296_v1, %v4048_v9  ;;  %v1300_v1 = vmul.f32 %v4281_v38, %v4082_v14 }
 0x611   :  { %1406 = vrot.lane.b32.xlu1 %v1393_v60, %s3693_s22  ;;  %1328 = vrot.lane.b32.xlu0 %v1321_v17, %s3694_s27  ;;  %v1299_v17 = vmul.f32 %v1282_v3, %v4074_v40 }
 0x615   :  { %1364 = vrot.lane.b32.xlu1 %v1357_v46, %s3688_s7  ;;  %1346 = vrot.lane.b32.xlu0 %v1339_v50, %s3696_s30 }
 0x619   :  { %1382 = vrot.lane.b32.xlu1 %v1375_v20, %s3698_s5  ;;  %1410 = vrot.lane.b32.xlu0 %v1395_v27, %s3693_s22 }
 0x61d   :  { %1408 = vrot.lane.b32.xlu1 %v1394_v35, %s3693_s22  ;;  %1312 = vrot.lane.b32.xlu0 %v1304_v33, %s3695_s29 }
 0x621   :  { %1433 = vrot.lane.b32.xlu1 %v1426_v21, %s3697_s9  ;;  %1330 = vrot.lane.b32.xlu0 %v1322_v62, %s3694_s27  ;;  %s3709_s27 = smov 20  }
 0x625   :  { %1348 = vrot.lane.b32.xlu1 %v1340_v51, %s3696_s30  ;;  %1366 = vrot.lane.b32.xlu0 %v1358_v53, %s3688_s7  ;;  %s3699_s7 = smov 4  }
 0x629   :  { %1412 = vrot.lane.b32.xlu1 %v1396_v28, %s3693_s22  ;;  %1384 = vrot.lane.b32.xlu0 %v1376_v10, %s3698_s5  ;;  %s3711_s5 = smov 110  }
 0x62d   :  { %1435 = vrot.lane.b32.xlu1 %v1427_v19, %s3697_s9  ;;  %1414 = vrot.lane.b32.xlu0 %v1397_v44, %s3693_s22 }
 0x673   :  { %v1327_v52 = vpop.permute.xlu1 %1326  ;;  %v1309_v60 = vpop.permute.xlu0 %1308 }
 0x674   :  { %v1317_v46 = vadd.f32 %v1309_v60, %v1299_v17 }
 0x676   :  { %v1335_v20 = vadd.f32 %v1327_v52, %v1317_v46 }
 0x677   :  { %v1345_v50 = vpop.permute.xlu1 %1344  ;;  %v1405_v27 = vpop.permute.xlu0 %1404 }
 0x678   :  { %v1353_v21 = vadd.f32 %v1345_v50, %v1335_v20 }
 0x67b   :  { %v1363_v35 = vpop.permute.xlu1 %1362  ;;  %v1432_v33 = vpop.permute.xlu0 %1431 }
 0x67c   :  { %v1371_v53 = vadd.f32 %v1363_v35, %v1353_v21 }
 0x67f   :  { %v1381_v62 = vpop.permute.xlu1 %1380  ;;  %v1311_v51 = vpop.permute.xlu0 %1310 }
 0x680   :  { %v1389_v28 = vadd.f32 %v1381_v62, %v1371_v53  ;;  %v1318_v19 = vadd.f32 %v1311_v51, %v1300_v1 }
 0x683   :  { %v1407_v10 = vpop.permute.xlu1 %1406  ;;  %v1329_v44 = vpop.permute.xlu0 %1328 }
 0x684   :  { %v1416_v11 = vsel %vm245_vm6, %v1405_v27, %v1407_v10  ;;  %v1336_v60 = vadd.f32 %v1329_v44, %v1318_v19 }
 0x685   :  { %v1422_v3 = vadd.f32 %v1416_v11, %v1389_v28  ;;  %v1301_v11 = vmul.f32 %v4287_v0, %v4078_v25 }
 0x687   :  { %v4345_v17 = vadd.f32 %v1432_v33, %v1422_v3  ;;  %v1365_v52 = vpop.permute.xlu1 %1364  ;;  %v1347_v46 = vpop.permute.xlu0 %1346 }
 0x688   :  { %v1354_v5 = vadd.f32 %v1347_v46, %v1336_v60 }
 0x689   :  { %1449 = vrot.lane.b32.xlu0 %v4345_v17, %s3693_s22 }
 0x68a   :  { %v1372_v20 = vadd.f32 %v1365_v52, %v1354_v5 }
 0x68b   :  { %v1383_v50 = vpop.permute.xlu1 %1382  ;;  %v1411_v35 = vpop.permute.xlu0 %1410 }
 0x68c   :  { %v1390_v38 = vadd.f32 %v1383_v50, %v1372_v20 }
 0x68f   :  { %v1409_v21 = vpop.permute.xlu1 %1408  ;;  %v1313_v62 = vpop.permute.xlu0 %1312 }
 0x690   :  { %v1417_v51 = vsel %vm245_vm6, %v1409_v21, %v1411_v35  ;;  %v1319_v1 = vadd.f32 %v1313_v62, %v1301_v11  ;;  %v1557_v21 = vld [vmem:[#allocation2 + $0x158] sm:$0xff]  ;;  %v1560_v62 = vld [vmem:[#allocation2 + $0x170] sm:$0xff]  ;;  %v1559_v11 = vld [vmem:[#allocation2 + $0x168] sm:$0xff] }
 0x691   :  { %v1423_v53 = vadd.f32 %v1417_v51, %v1390_v38  ;;  %v1556_v51 = vld [vmem:[#allocation2 + $0x150] sm:$0xff] }
 0x693   :  { %v1434_v27 = vpop.permute.xlu1 %1433  ;;  %v1331_v33 = vpop.permute.xlu0 %1330 }
 0x694   :  { %v4352_v28 = vadd.f32 %v1434_v27, %v1423_v53  ;;  %v1337_v10 = vadd.f32 %v1331_v33, %v1319_v1  ;;  %v3359_v53 = vpack.c.bf16 %v1560_v62, %v1557_v21  ;;  %v3361_v27 = vpack.c.bf16 %v1559_v11, %v1556_v51 }
 0x695   :  { %v1443_v33 = vmul.f32 0.38268343, %v4088_v31  ;;  %v1445_v31 = vmul.f32 0.38268343, %v4101_v18 }
 0x696   :  { %1451 = vrot.lane.b32.xlu1 %v4352_v28, %s3693_s22  ;;  %3360 = vmatprep.subr.bf16.mxu1 %v3359_v53 }
 0x697   :  { %v1349_v5 = vpop.permute.xlu1 %1348  ;;  %v1367_v44 = vpop.permute.xlu0 %1366  ;;  %3362 = vmatpush1.bf16.msra.mxu1 %v3361_v27 }
 0x698   :  { %v1355_v19 = vadd.f32 %v1349_v5, %v1337_v10  ;;  %3366 = vmatprep.subr.bf16.mxu1 %v5152_v12 }
 0x69a   :  { %1482 = vrot.lane.b32.xlu1 %v4345_v17, %s3699_s7  ;;  %v1373_v3 = vadd.f32 %v1367_v44, %v1355_v19  ;;  %v1444_v19 = vmul.f32 0.38268343, %v4090_v36 }
 0x69b   :  { %v1385_v60 = vpop.permute.xlu0 %1384  ;;  %v1413_v52 = vpop.permute.xlu1 %1412 }
 0x69c   :  { %v1391_v0 = vadd.f32 %v1385_v60, %v1373_v3 }
 0x69f   :  { %v1415_v46 = vpop.permute.xlu0 %1414  ;;  %v1436_v35 = vpop.permute.xlu1 %1435 }
 0x6a0   :  { %v1418_v50 = vsel %vm245_vm6, %v1413_v52, %v1415_v46 }
 0x6a1   :  { %v1424_v20 = vadd.f32 %v1418_v50, %v1391_v0 }
 0x6a3   :  { %v4359_v38 = vadd.f32 %v1436_v35, %v1424_v20  ;;  %v1558_v20 = vld [vmem:[#allocation2 + $0x160] sm:$0xff]  ;;  %v1561_v35 = vld [vmem:[#allocation2 + $0x178] sm:$0xff] }
 0x6a4   :  { %v3364_v21 = vpack.c.bf16 %v1561_v35, %v1558_v20 }
 0x6a5   :  { %1486 = vrot.lane.b32.xlu1 %v4359_v38, %s3699_s7  ;;  %1453 = vrot.lane.b32.xlu0 %v4359_v38, %s3693_s22 }
 0x6a6   :  { %3365 = vmatpush3.bf16.msra.mxu0 %v3364_v21 }
 0x6a7   :  { %3369 = vmatprep.subr.bf16.mxu0 %v5152_v12 }
 0x6a9   :  { %1484 = vrot.lane.b32.xlu0 %v4352_v28, %s3699_s7 }
 0x6ad   :  { %1497 = vrot.lane.b32.xlu0 %v4345_v17, %s3700_s11 }
 0x6b1   :  { %1499 = vrot.lane.b32.xlu0 %v4352_v28, %s3700_s11 }
 0x6fb   :  { %v1450_v1 = vpop.permute.xlu0 %1449 }
 0x6fc   :  { %v1458_v10 = vadd.f32 %v1450_v1, %v1443_v33 }
 0x6fe   :  { %v1461_v5 = vsub.f32 0.0, %v1458_v10 }
 0x700   :  { %v1464_v44 = vmul.f32 1.442695, %v1461_v5 }
 0x702   :  { %3624 = vpow2.f32 %v1464_v44 }
 0x708   :  { %v1452_v3 = vpop.permute.xlu1 %1451 }
 0x709   :  { %v1459_v60 = vadd.f32 %v1452_v3, %v1444_v19 }
 0x70b   :  { %v1462_v52 = vsub.f32 0.0, %v1459_v60 }
 0x70c   :  { %v3625_v0 = vpop.eup %3624  ;;  %v1483_v36 = vpop.permute.xlu1 %1482 }
 0x70d   :  { %v1470_v46 = vadd.f32 1.0, %v3625_v0  ;;  %v1466_v50 = vmul.f32 1.442695, %v1462_v52 }
 0x70f   :  { %3626 = vrcp.f32 %v1470_v46 }
 0x710   :  { %3628 = vpow2.f32 %v1466_v50 }
 0x717   :  { %v1454_v62 = vpop.permute.xlu0 %1453  ;;  %v1487_v20 = vpop.permute.xlu1 %1486 }
 0x718   :  { %v1460_v51 = vadd.f32 %v1454_v62, %v1445_v31 }
 0x719   :  { %v3627_v53 = vpop.eup %3626 }
 0x71a   :  { %v3629_v11 = vpop.eup %3628  ;;  %v1479_v27 = vmul.f32 %v3627_v53, %v1458_v10  ;;  %v1491_v33 = vmul.f32 %v3627_v53, %v1483_v36  ;;  %v1463_v1 = vsub.f32 0.0, %v1460_v51  ;;  %v1494_v19 = vmul.f32 %v3627_v53, %v4345_v17 }
 0x71b   :  { %v1471_v5 = vadd.f32 1.0, %v3629_v11  ;;  %v1485_v3 = vpop.permute.xlu0 %1484 }
 0x71c   :  { %v1468_v44 = vmul.f32 1.442695, %v1463_v1  ;;  %1524 = vrot.lane.b32.xlu0 %v1491_v33, %s3701_s12  ;;  %1512 = vrot.lane.b32.xlu1 %v1479_v27, %s3701_s12 }
 0x71d   :  { %3630 = vrcp.f32 %v1471_v5 }
 0x71e   :  { %3632 = vpow2.f32 %v1468_v44 }
 0x71f   :  { %v1498_v31 = vpop.permute.xlu0 %1497 }
 0x720   :  { %1536 = vrot.lane.b32.xlu1 %v1494_v19, %s3700_s11  ;;  %v1506_v11 = vmul.f32 %v3627_v53, %v1498_v31 }
 0x723   :  { %v1500_v62 = vpop.permute.xlu0 %1499 }
 0x727   :  { %v3631_v18 = vpop.eup %3630 }
 0x728   :  { %v3633_v52 = vpop.eup %3632  ;;  %v1480_v0 = vmul.f32 %v3631_v18, %v1459_v60  ;;  %v1492_v10 = vmul.f32 %v3631_v18, %v1485_v3  ;;  %v1495_v50 = vmul.f32 %v3631_v18, %v4352_v28  ;;  %v1507_v44 = vmul.f32 %v3631_v18, %v1500_v62 }
 0x729   :  { %v1472_v46 = vadd.f32 1.0, %v3633_v52 }
 0x72a   :  { %1514 = vrot.lane.b32.xlu1 %v1480_v0, %s3701_s12  ;;  %1526 = vrot.lane.b32.xlu0 %v1492_v10, %s3701_s12 }
 0x72b   :  { %3634 = vrcp.f32 %v1472_v46 }
 0x72e   :  { %1538 = vrot.lane.b32.xlu1 %v1495_v50, %s3700_s11  ;;  %1501 = vrot.lane.b32.xlu0 %v4359_v38, %s3700_s11 }
 0x735   :  { %v3635_v17 = vpop.eup %3634 }
 0x736   :  { %v1481_v35 = vmul.f32 %v3635_v17, %v1460_v51  ;;  %v1493_v21 = vmul.f32 %v3635_v17, %v1487_v20  ;;  %v1496_v60 = vmul.f32 %v3635_v17, %v4359_v38 }
 0x738   :  { %1516 = vrot.lane.b32.xlu1 %v1481_v35, %s3701_s12  ;;  %1528 = vrot.lane.b32.xlu0 %v1493_v21, %s3701_s12 }
 0x73c   :  { %1540 = vrot.lane.b32.xlu1 %v1496_v60, %s3700_s11 }
 0x78e   :  { %v1513_v28 = vpop.permute.xlu1 %1512  ;;  %v1525_v36 = vpop.permute.xlu0 %1524 }
 0x78f   :  { %v1546_v27 = vsel %vm1545_vm13, %v1513_v28, %v1525_v36 }
 0x792   :  { %v1537_v33 = vpop.permute.xlu1 %1536 }
 0x793   :  { %v1549_v51 = vsel %vm245_vm6, %v1546_v27, %v1537_v33 }
 0x794   :  { %v1553_v1 = vsel %vm1552_vm14, %v1549_v51, %v1506_v11 }
 0x795   :  { %3096 = vmatmul.mubr.msk.f32.vlgmr.msra.gmra.mrb[28].mxu1 %vm1094_vm10, %v1553_v1  ;;  %3284 = vmatmul.mubr.msk.f32.vlgmr.msra.gmra.mrb[26].mxu0 %vm1094_vm10, %v1553_v1 }
 0x796   :  { %1641 = vmatprep.mubr.f32.mxu1 %v5153_v37  ;;  %3286 = vmatprep.mubr.msk.f32.mxu0 %vm3672_vm0, %v5153_v37 }
 0x79c   :  { %v1515_v38 = vpop.permute.xlu1 %1514  ;;  %v1527_v5 = vpop.permute.xlu0 %1526 }
 0x79d   :  { %v1547_v53 = vsel %vm1545_vm13, %v1515_v38, %v1527_v5 }
 0x7a0   :  { %v1539_v19 = vpop.permute.xlu1 %1538  ;;  %v1502_v0 = vpop.permute.xlu0 %1501 }
 0x7a1   :  { %v1550_v3 = vsel %vm245_vm6, %v1547_v53, %v1539_v19  ;;  %v1508_v18 = vmul.f32 %v3635_v17, %v1502_v0 }
 0x7a2   :  { %v1554_v52 = vsel %vm1552_vm14, %v1550_v3, %v1507_v44 }
 0x7a3   :  { %3097 = vmatmul.mubr.msk.f32.gmra.mrb[30].mxu1 %vm1094_vm10, %v1554_v52  ;;  %3287 = vmatmul.mubr.msk.f32.gmra.mrb[28].mxu0 %vm1094_vm10, %v1554_v52 }
 0x7a4   :  { %1647 = vmatprep.mubr.f32.mxu1 %v5153_v37  ;;  %3289 = vmatprep.mubr.msk.f32.mxu0 %vm3672_vm0, %v5153_v37 }
 0x7aa   :  { %v1517_v10 = vpop.permute.xlu1 %1516  ;;  %v1529_v46 = vpop.permute.xlu0 %1528 }
 0x7ab   :  { %v1548_v50 = vsel %vm1545_vm13, %v1517_v10, %v1529_v46 }
 0x7ae   :  { %v1541_v20 = vpop.permute.xlu1 %1540 }
 0x7af   :  { %v1551_v35 = vsel %vm245_vm6, %v1548_v50, %v1541_v20 }
 0x7b0   :  { %v1555_v21 = vsel %vm1552_vm14, %v1551_v35, %v1508_v18 }
 0x7b1   :  { %3098 = vmatmul.mubr.msk.f32.gmra.mrb[32].mxu1 %vm1094_vm10, %v1555_v21  ;;  %3290 = vmatmul.mubr.msk.f32.gmra.mrb[30].mxu0 %vm1094_vm10, %v1555_v21 }
 0x7b2   :  { %3298 = vmatprep.mubr.msk.f32.mxu1 %vm3672_vm0, %v5153_v37  ;;  %3323 = vmatprep.mubr.msk.f32.mxu0 %vm3672_vm0, %v5153_v37 }
 0x868   :  { %v4415_v60 = vpop.f32.mrb[28].mxu1  ;;  %v1720_v17 = vpop.f32.mrb[26].mxu0 }
 0x869   :  { %v1737_v31 = vmul.f32 %v4415_v60, %v3919_v4  ;;  %v1862_v62 = vmul.f32 %v1720_v17, %v3975_v26  ;;  %v1639_v28 = vpop.f32.mrb[29].mxu1  ;;  %v3285_v36 = vpop.f32.mrb[27].mxu0  ;;  %v1755_v11 = vmul.f32 %v4415_v60, %v3921_v6  ;;  %v1773_v33 = vmul.f32 %v4415_v60, %v3923_v8 }
 0x86a   :  { %v1774_v27 = vmul.f32 %v1639_v28, %v3923_v8  ;;  %v1807_v51 = vmul.f32 %v1639_v28, %v3927_v24  ;;  %v1825_v1 = vmul.f32 %v1639_v28, %v3935_v54  ;;  %v1843_v3 = vmul.f32 %v1639_v28, %v3945_v61 }
 0x86b   :  { %1875 = vrot.lane.b32.xlu1 %v1862_v62, %s3702_s2  ;;  %1743 = vrot.lane.b32.xlu0 %v1737_v31, %s3703_s13  ;;  %v1861_v0 = vmul.f32 %v1639_v28, %v3975_v26 }
 0x86f   :  { %1761 = vrot.lane.b32.xlu0 %v1755_v11, %s3704_s14  ;;  %1787 = vrot.lane.b32.xlu1 %v1774_v27, %s3705_s15 }
 0x873   :  { %1785 = vrot.lane.b32.xlu0 %v1773_v33, %s3705_s15  ;;  %1813 = vrot.lane.b32.xlu1 %v1807_v51, %s3701_s12 }
 0x876   :  { %v4433_v38 = vpop.f32.mrb[30].mxu1  ;;  %v1725_v5 = vpop.f32.mrb[28].mxu0 }
 0x877   :  { %v1738_v44 = vmul.f32 %v4433_v38, %v3958_v13  ;;  %v1645_v53 = vpop.f32.mrb[31].mxu1  ;;  %v3288_v19 = vpop.f32.mrb[29].mxu0  ;;  %1831 = vrot.lane.b32.xlu0 %v1825_v1, %s3706_s16  ;;  %v1756_v52 = vmul.f32 %v4433_v38, %v3940_v58  ;;  %v1864_v10 = vmul.f32 %v1725_v5, %v4011_v47  ;;  %v1775_v46 = vmul.f32 %v4433_v38, %v3947_v63 }
 0x878   :  { %v1776_v18 = vmul.f32 %v1645_v53, %v3947_v63  ;;  %v1808_v17 = vmul.f32 %v1645_v53, %v3971_v23  ;;  %v1826_v31 = vmul.f32 %v1645_v53, %v3987_v34  ;;  %v1863_v62 = vmul.f32 %v1645_v53, %v4011_v47 }
 0x879   :  { %1745 = vrot.lane.b32.xlu1 %v1738_v44, %s3703_s13  ;;  %v1844_v28 = vmul.f32 %v1645_v53, %v3999_v39 }
 0x87b   :  { %1849 = vrot.lane.b32.xlu0 %v1843_v3, %s3707_s17 }
 0x87d   :  { %1763 = vrot.lane.b32.xlu1 %v1756_v52, %s3704_s14 }
 0x87f   :  { %1873 = vrot.lane.b32.xlu0 %v1861_v0, %s3702_s2 }
 0x881   :  { %1879 = vrot.lane.b32.xlu1 %v1864_v10, %s3702_s2 }
 0x883   :  { %1789 = vrot.lane.b32.xlu0 %v1775_v46, %s3705_s15 }
 0x884   :  { %v4452_v50 = vpop.f32.mrb[32].mxu1  ;;  %v1730_v20 = vpop.f32.mrb[30].mxu0 }
 0x885   :  { %1791 = vrot.lane.b32.xlu1 %v1776_v18, %s3705_s15  ;;  %v1651_v35 = vpop.f32.mrb[33].mxu1  ;;  %v3291_v21 = vpop.f32.mrb[31].mxu0  ;;  %v1739_v36 = vmul.f32 %v4452_v50, %v3925_v16  ;;  %v1757_v11 = vmul.f32 %v4452_v50, %v3929_v32  ;;  %v1777_v27 = vmul.f32 %v4452_v50, %v3931_v42  ;;  %v1866_v53 = vmul.f32 %v1730_v20, %v4048_v9  ;;  %v5163_v16 = vld [vmem:[#allocation21_spill] sm:$0xff] }
 0x886   :  { %v1778_v33 = vmul.f32 %v1651_v35, %v3931_v42  ;;  %v1809_v51 = vmul.f32 %v1651_v35, %v3933_v48  ;;  %v1827_v1 = vmul.f32 %v1651_v35, %v4035_v7  ;;  %v1845_v5 = vmul.f32 %v1651_v35, %v4027_v59  ;;  %v5162_v42 = vld [vmem:[#allocation20_spill] sm:$0xff] }
 0x887   :  { %1815 = vrot.lane.b32.xlu0 %v1808_v17, %s3701_s12  ;;  %v1865_v44 = vmul.f32 %v1651_v35, %v4048_v9  ;;  %v1734_v17 = vmul.f32 %v4415_v60, %v4074_v40 }
 0x889   :  { %1833 = vrot.lane.b32.xlu1 %v1826_v31, %s3706_s16 }
 0x88b   :  { %1877 = vrot.lane.b32.xlu0 %v1863_v62, %s3702_s2 }
 0x88d   :  { %1851 = vrot.lane.b32.xlu1 %v1844_v28, %s3707_s17 }
 0x88f   :  { %1747 = vrot.lane.b32.xlu0 %v1739_v36, %s3703_s13 }
 0x891   :  { %1765 = vrot.lane.b32.xlu1 %v1757_v11, %s3704_s14 }
 0x893   :  { %1793 = vrot.lane.b32.xlu0 %v1777_v27, %s3705_s15  ;;  %v1735_v27 = vmul.f32 %v4433_v38, %v4082_v14 }
 0x895   :  { %1795 = vrot.lane.b32.xlu1 %v1778_v33, %s3705_s15 }
 0x897   :  { %1817 = vrot.lane.b32.xlu0 %v1809_v51, %s3701_s12 }
 0x899   :  { %1835 = vrot.lane.b32.xlu1 %v1827_v1, %s3706_s16 }
 0x89b   :  { %1853 = vrot.lane.b32.xlu0 %v1845_v5, %s3707_s17 }
 0x89d   :  { %1881 = vrot.lane.b32.xlu1 %v1865_v44, %s3702_s2 }
 0x89f   :  { %1883 = vrot.lane.b32.xlu0 %v1866_v53, %s3702_s2  ;;  %s3715_s2 = smov 2  }
 0x8dd   :  { %v1876_v19 = vpop.permute.xlu1 %1875  ;;  %v1744_v3 = vpop.permute.xlu0 %1743 }
 0x8de   :  { %v1752_v35 = vadd.f32 %v1744_v3, %v1734_v17 }
 0x8e1   :  { %v1788_v52 = vpop.permute.xlu1 %1787  ;;  %v1762_v0 = vpop.permute.xlu0 %1761 }
 0x8e2   :  { %v1770_v28 = vadd.f32 %v1762_v0, %v1752_v35 }
 0x8e5   :  { %v1814_v10 = vpop.permute.xlu1 %1813  ;;  %v1786_v46 = vpop.permute.xlu0 %1785 }
 0x8e6   :  { %v1798_v20 = vsel %vm1797_vm15, %v1786_v46, %v1788_v52 }
 0x8e7   :  { %v1804_v11 = vadd.f32 %v1798_v20, %v1770_v28 }
 0x8e9   :  { %v1832_v18 = vpop.permute.xlu0 %1831  ;;  %v1822_v5 = vadd.f32 %v1814_v10, %v1804_v11 }
 0x8eb   :  { %v1746_v21 = vpop.permute.xlu1 %1745  ;;  %v1840_v3 = vadd.f32 %v1832_v18, %v1822_v5 }
 0x8ec   :  { %v1753_v51 = vadd.f32 %v1746_v21, %v1735_v27 }
 0x8ed   :  { %v1850_v31 = vpop.permute.xlu0 %1849 }
 0x8ee   :  { %v1858_v20 = vadd.f32 %v1850_v31, %v1840_v3 }
 0x8ef   :  { %v1764_v62 = vpop.permute.xlu1 %1763 }
 0x8f0   :  { %v1771_v44 = vadd.f32 %v1764_v62, %v1753_v51  ;;  %v1736_v62 = vmul.f32 %v4452_v50, %v4078_v25 }
 0x8f1   :  { %v1874_v36 = vpop.permute.xlu0 %1873 }
 0x8f2   :  { %v1886_v0 = vsel %vm1885_vm1, %v1874_v36, %v1876_v19 }
 0x8f3   :  { %v1880_v33 = vpop.permute.xlu1 %1879  ;;  %v4491_v28 = vadd.f32 %v1886_v0, %v1858_v20 }
 0x8f5   :  { %v1790_v1 = vpop.permute.xlu0 %1789 }
 0x8f7   :  { %v1792_v53 = vpop.permute.xlu1 %1791 }
 0x8f8   :  { %v1799_v60 = vsel %vm1797_vm15, %v1790_v1, %v1792_v53 }
 0x8f9   :  { %v1805_v40 = vadd.f32 %v1799_v60, %v1771_v44  ;;  %v1816_v9 = vpop.permute.xlu0 %1815 }
 0x8fb   :  { %v1823_v52 = vadd.f32 %v1816_v9, %v1805_v40  ;;  %v1834_v46 = vpop.permute.xlu1 %1833  ;;  %v1895_v40 = vmul.f32 %v4491_v28, %v4076_v43 }
 0x8fd   :  { %v1841_v17 = vadd.f32 %v1834_v46, %v1823_v52  ;;  %v1878_v35 = vpop.permute.xlu0 %1877 }
 0x8fe   :  { %v1887_v10 = vsel %vm1885_vm1, %v1878_v35, %v1880_v33 }
 0x8ff   :  { %v1852_v38 = vpop.permute.xlu1 %1851 }
 0x900   :  { %v1859_v21 = vadd.f32 %v1852_v38, %v1841_v17  ;;  %v3636_v38 = vld [vmem:[%s5079_s3] sm:$0xff] }
 0x901   :  { %v1748_v11 = vpop.permute.xlu0 %1747 }
 0x902   :  { %v4496_v27 = vadd.f32 %v1887_v10, %v1859_v21  ;;  %v1754_v18 = vadd.f32 %v1748_v11, %v1736_v62  ;;  %v3637_v21 = vld [vmem:[%s5079_s3 + $0x8] sm:$0xff]  ;;  %v3638_v10 = vld [vmem:[%s5079_s3 + $0x10] sm:$0xff]  ;;  %v3639_v62 = vld [vmem:[%s5079_s3 + $0x18] sm:$0xff] }
 0x903   :  { %v1766_v9 = vpop.permute.xlu1 %1765  ;;  %v3640_v11 = vld [vmem:[%s5079_s3 + $0x20] sm:$0xff]  ;;  %s3708_s3 = smov 12  }
 0x904   :  { %5154 = vst [vmem:[#allocation31_spill] sm:$0xff] %v4496_v27  ;;  %v1896_v19 = vmul.f32 %v4496_v27, %v4080_v30  ;;  %v1772_v51 = vadd.f32 %v1766_v9, %v1754_v18 }
 0x905   :  { %v1794_v31 = vpop.permute.xlu0 %1793 }
 0x906   :  { %v3367_v36 = vpack.c.bf16 %v1896_v19, %v1895_v40 }
 0x907   :  { %v1796_v1 = vpop.permute.xlu1 %1795 }
 0x908   :  { %v1800_v33 = vsel %vm1797_vm15, %v1794_v31, %v1796_v1  ;;  %3368 = vmatpush3.bf16.msra.mxu1 %v3367_v36 }
 0x909   :  { %v1806_v5 = vadd.f32 %v1800_v33, %v1772_v51  ;;  %v1818_v50 = vpop.permute.xlu0 %1817  ;;  %3296 = vmatprep.subr.mxu1 %v5153_v37 }
 0x90b   :  { %v1824_v44 = vadd.f32 %v1818_v50, %v1806_v5  ;;  %v1836_v53 = vpop.permute.xlu1 %1835 }
 0x90d   :  { %v1842_v60 = vadd.f32 %v1836_v53, %v1824_v44  ;;  %v1854_v3 = vpop.permute.xlu0 %1853 }
 0x90f   :  { %v1860_v52 = vadd.f32 %v1854_v3, %v1842_v60  ;;  %v1882_v46 = vpop.permute.xlu1 %1881 }
 0x911   :  { %v1884_v0 = vpop.permute.xlu0 %1883 }
 0x912   :  { %v1888_v17 = vsel %vm1885_vm1, %v1882_v46, %v1884_v0  ;;  %v5158_v0 = vld [vmem:[#allocation29_spill] sm:$0xff] }
 0x913   :  { %v4505_v35 = vadd.f32 %v1888_v17, %v1860_v52  ;;  %v5157_v52 = vld [vmem:[#allocation26_spill] sm:$0xff] }
 0x915   :  { %5155 = vst [vmem:[#allocation32_spill] sm:$0xff] %v4505_v35  ;;  %v1897_v20 = vmul.f32 %v4505_v35, %v4099_v56 }
 0x917   :  { %3297 = vmatpush3.msk.msra.mxu1 %vm845_vm8, %v1897_v20  ;;  %v5159_v20 = vld [vmem:[#allocation27_spill] sm:$0xff] }
 0x918   :  { %3299 = vmatmul.mubr.msk.f32.vlgmr.msra.gmra.mrb[34].mxu1 %vm829_vm9, %v3636_v38 }
 0x919   :  { %3301 = vmatprep.mubr.msk.f32.mxu1 %vm3672_vm0, %v5153_v37 }
 0x91c   :  { %3302 = vmatmul.mubr.msk.f32.gmra.mrb[36].mxu1 %vm829_vm9, %v3637_v21  ;;  %v5160_v21 = vld [vmem:[#allocation28_spill] sm:$0xff] }
 0x91d   :  { %3304 = vmatprep.mubr.msk.f32.mxu1 %vm3672_vm0, %v5153_v37 }
 0x920   :  { %3305 = vmatmul.mubr.msk.f32.gmra.mrb[38].mxu1 %vm829_vm9, %v3638_v10 }
 0x921   :  { %3307 = vmatprep.mubr.msk.f32.mxu1 %vm3672_vm0, %v5153_v37 }
 0x924   :  { %3308 = vmatmul.mubr.msk.f32.gmra.mrb[40].mxu1 %vm829_vm9, %v3639_v62  ;;  %v5161_v62 = vld [vmem:[#allocation30_spill] sm:$0xff] }
 0x925   :  { %3310 = vmatprep.mubr.msk.f32.mxu1 %vm3672_vm0, %v5153_v37 }
 0x928   :  { %3311 = vmatmul.mubr.msk.f32.gmra.mrb[42].mxu1 %vm829_vm9, %v3640_v11 }
 0x9eb   :  { %v4538_v18 = vpop.f32.mrb[34].mxu1 }
 0x9ec   :  { %1996 = vrot.lane.b32.xlu0 %v4538_v18, %s3690_s10  ;;  %v3300_v9 = vpop.f32.mrb[35].mxu1  ;;  %v4544_v40 = vmul.f32 %v4538_v18, %v4184_v57  ;;  %v4548_v19 = vmul.f32 %v4538_v18, %v4208_v15  ;;  %v4556_v36 = vmul.f32 %v4538_v18, %v4174_v41 }
 0x9ee   :  { %2031 = vrot.lane.b32.xlu1 %v4544_v40, %s3700_s11 }
 0x9ef   :  { %v4552_v31 = vpop.f32.mrb[36].mxu1 }
 0x9f0   :  { %2331 = vrot.lane.b32.xlu0 %v4548_v19, %s3693_s22  ;;  %v3303_v51 = vpop.f32.mrb[37].mxu1  ;;  %v4570_v1 = vmul.f32 %v4552_v31, %v4172_v55  ;;  %v4578_v50 = vmul.f32 %v4552_v31, %v4176_v45  ;;  %v4592_v53 = vmul.f32 %v4552_v31, %v4220_v29 }
 0x9f2   :  { %2061 = vrot.lane.b32.xlu1 %v4556_v36, %s3701_s12 }
 0x9f3   :  { %v4562_v57 = vpop.f32.mrb[38].mxu1 }
 0x9f4   :  { %2351 = vrot.lane.b32.xlu0 %v4544_v40, %s3699_s7  ;;  %v3306_v15 = vpop.f32.mrb[39].mxu1  ;;  %v4608_v29 = vmul.f32 %v4562_v57, %v4178_v22  ;;  %v4612_v60 = vmul.f32 %v4562_v57, %v4227_v2  ;;  %v4618_v3 = vmul.f32 %v4562_v57, %v4180_v49  ;;  %v5156_v22 = vld [vmem:[#allocation25_spill] sm:$0xff] }
 0x9f6   :  { %2146 = vrot.lane.b32.xlu1 %v4556_v36, %s3693_s22 }
 0x9f7   :  { %v4572_v33 = vpop.f32.mrb[40].mxu1 }
 0x9f8   :  { %2033 = vrot.lane.b32.xlu0 %v4570_v1, %s3700_s11  ;;  %v3309_v5 = vpop.f32.mrb[41].mxu1  ;;  %v4630_v2 = vmul.f32 %v4572_v33, %v5156_v22  ;;  %v4636_v46 = vmul.f32 %v4572_v33, %v5157_v52  ;;  %v4648_v17 = vmul.f32 %v4572_v33, %v5158_v0 }
 0x9fa   :  { %2201 = vrot.lane.b32.xlu1 %v4548_v19, %s3700_s11 }
 0x9fb   :  { %v4582_v44 = vpop.f32.mrb[42].mxu1 }
 0x9fc   :  { %2063 = vrot.lane.b32.xlu0 %v4578_v50, %s3701_s12  ;;  %v3312_v55 = vpop.f32.mrb[43].mxu1  ;;  %v4664_v38 = vmul.f32 %v4582_v44, %v5159_v20  ;;  %v4668_v10 = vmul.f32 %v4582_v44, %v5160_v21  ;;  %v4676_v11 = vmul.f32 %v4582_v44, %v5161_v62 }
 0x9fe   :  { %2401 = vrot.lane.b32.xlu1 %v4548_v19, %s3701_s12 }
 0xa00   :  { %2148 = vrot.lane.b32.xlu0 %v4578_v50, %s3693_s22 }
 0xa02   :  { %1998 = vrot.lane.b32.xlu1 %v4552_v31, %s3690_s10 }
 0xa04   :  { %2203 = vrot.lane.b32.xlu0 %v4592_v53, %s3700_s11 }
 0xa06   :  { %2333 = vrot.lane.b32.xlu1 %v4592_v53, %s3693_s22 }
 0xa08   :  { %2403 = vrot.lane.b32.xlu0 %v4592_v53, %s3701_s12 }
 0xa0a   :  { %2353 = vrot.lane.b32.xlu1 %v4570_v1, %s3699_s7 }
 0xa0c   :  { %2000 = vrot.lane.b32.xlu0 %v4562_v57, %s3690_s10 }
 0xa0e   :  { %2035 = vrot.lane.b32.xlu1 %v4608_v29, %s3700_s11 }
 0xa10   :  { %2335 = vrot.lane.b32.xlu0 %v4612_v60, %s3693_s22 }
 0xa12   :  { %2065 = vrot.lane.b32.xlu1 %v4618_v3, %s3701_s12 }
 0xa14   :  { %2355 = vrot.lane.b32.xlu0 %v4608_v29, %s3699_s7 }
 0xa16   :  { %2150 = vrot.lane.b32.xlu1 %v4618_v3, %s3693_s22 }
 0xa18   :  { %2037 = vrot.lane.b32.xlu0 %v4630_v2, %s3700_s11 }
 0xa1a   :  { %2205 = vrot.lane.b32.xlu1 %v4612_v60, %s3700_s11 }
 0xa1c   :  { %2067 = vrot.lane.b32.xlu0 %v4636_v46, %s3701_s12 }
 0xa1e   :  { %2405 = vrot.lane.b32.xlu1 %v4612_v60, %s3701_s12 }
 0xa20   :  { %2152 = vrot.lane.b32.xlu0 %v4636_v46, %s3693_s22 }
 0xa22   :  { %2002 = vrot.lane.b32.xlu1 %v4572_v33, %s3690_s10 }
 0xa24   :  { %2207 = vrot.lane.b32.xlu0 %v4648_v17, %s3700_s11 }
 0xa26   :  { %2337 = vrot.lane.b32.xlu1 %v4648_v17, %s3693_s22 }
 0xa28   :  { %2407 = vrot.lane.b32.xlu0 %v4648_v17, %s3701_s12 }
 0xa2a   :  { %2357 = vrot.lane.b32.xlu1 %v4630_v2, %s3699_s7 }
 0xa2c   :  { %2004 = vrot.lane.b32.xlu0 %v4582_v44, %s3690_s10 }
 0xa2e   :  { %2039 = vrot.lane.b32.xlu1 %v4664_v38, %s3700_s11 }
 0xa30   :  { %2069 = vrot.lane.b32.xlu0 %v4668_v10, %s3701_s12 }
 0xa32   :  { %2154 = vrot.lane.b32.xlu1 %v4668_v10, %s3693_s22 }
 0xa34   :  { %2209 = vrot.lane.b32.xlu0 %v4676_v11, %s3700_s11 }
 0xa36   :  { %2409 = vrot.lane.b32.xlu1 %v4676_v11, %s3701_s12 }
 0xa38   :  { %2339 = vrot.lane.b32.xlu0 %v4676_v11, %s3693_s22 }
 0xa3a   :  { %2359 = vrot.lane.b32.xlu1 %v4664_v38, %s3699_s7 }
 0xa5e   :  { %v1997_v9 = vpop.permute.xlu0 %1996 }
 0xa5f   :  { %v4704_v48 = vmul.f32 %v1997_v9, %v5162_v42 }
 0xa60   :  { %v2032_v51 = vpop.permute.xlu1 %2031 }
 0xa61   :  { %v2111_v15 = vsub.f32 %v4556_v36, %v2032_v51 }
 0xa62   :  { %v4689_v5 = vpop.permute.xlu0 %2331 }
 0xa63   :  { %2121 = vrot.lane.b32.xlu0 %v2111_v15, %s3690_s10 }
 0xa64   :  { %v2062_v55 = vpop.permute.xlu1 %2061 }
 0xa66   :  { %v4692_v22 = vpop.permute.xlu0 %2351 }
 0xa68   :  { %v2147_v0 = vpop.permute.xlu1 %2146 }
 0xa69   :  { %v2161_v20 = vsub.f32 %v4548_v19, %v2147_v0 }
 0xa6a   :  { %v2034_v62 = vpop.permute.xlu0 %2033 }
 0xa6b   :  { %2171 = vrot.lane.b32.xlu0 %v2161_v20, %s3708_s3  ;;  %v2112_v25 = vsub.f32 %v4578_v50, %v2034_v62 }
 0xa6c   :  { %v2202_v14 = vpop.permute.xlu1 %2201 }
 0xa6d   :  { %v2216_v27 = vsub.f32 %v4544_v40, %v2202_v14  ;;  %2123 = vrot.lane.b32.xlu1 %v2112_v25, %s3690_s10  ;;  %v2251_v7 = vadd.f32 %v2202_v14, %v4544_v40  ;;  %v2286_v25 = vadd.f32 %v4556_v36, %v2032_v51  ;;  %v2451_v14 = vsub.f32 %v4548_v19, %v2032_v51 }
 0xa6e   :  { %v2064_v35 = vpop.permute.xlu0 %2063 }
 0xa6f   :  { %2226 = vrot.lane.b32.xlu0 %v2216_v27, %s3709_s27 }
 0xa70   :  { %v2402_v15 = vpop.permute.xlu1 %2401 }
 0xa72   :  { %v2149_v59 = vpop.permute.xlu0 %2148 }
 0xa73   :  { %v2162_v0 = vsub.f32 %v4592_v53, %v2149_v59  ;;  %2261 = vrot.lane.b32.xlu0 %v2251_v7, %s3670_s8  ;;  %v2416_v7 = vadd.f32 %v2402_v15, %v4556_v36  ;;  %v2287_v36 = vadd.f32 %v4578_v50, %v2034_v62 }
 0xa74   :  { %v1999_v20 = vpop.permute.xlu1 %1998 }
 0xa75   :  { %v4707_v32 = vmul.f32 %v1999_v20, %v5163_v16  ;;  %2173 = vrot.lane.b32.xlu1 %v2162_v0, %s3708_s3 }
 0xa76   :  { %v2204_v27 = vpop.permute.xlu0 %2203 }
 0xa77   :  { %v2217_v40 = vsub.f32 %v4570_v1, %v2204_v27  ;;  %2296 = vrot.lane.b32.xlu0 %v2286_v25, %s3709_s27  ;;  %v2252_v20 = vadd.f32 %v2204_v27, %v4570_v1  ;;  %v2046_v25 = vadd.f32 %v2032_v51, %v4548_v19  ;;  %v2452_v51 = vsub.f32 %v4592_v53, %v2034_v62 }
 0xa78   :  { %v4715_v59 = vpop.permute.xlu1 %2333 }
 0xa79   :  { %2228 = vrot.lane.b32.xlu1 %v2217_v40, %s3709_s27  ;;  %v2076_v40 = vadd.f32 %v2062_v55, %v2046_v25 }
 0xa7a   :  { %v2404_v9 = vpop.permute.xlu0 %2403 }
 0xa7b   :  { %2426 = vrot.lane.b32.xlu0 %v2416_v7, %s3670_s8  ;;  %v2417_v27 = vadd.f32 %v2404_v9, %v4578_v50 }
 0xa7c   :  { %v4721_v0 = vpop.permute.xlu1 %2353 }
 0xa7d   :  { %2263 = vrot.lane.b32.xlu1 %v2252_v20, %s3670_s8 }
 0xa7e   :  { %v2001_v47 = vpop.permute.xlu0 %2000 }
 0xa7f   :  { %2461 = vrot.lane.b32.xlu0 %v2451_v14, %s3670_s8  ;;  %v2047_v14 = vadd.f32 %v2034_v62, %v4592_v53 }
 0xa80   :  { %v2036_v15 = vpop.permute.xlu1 %2035 }
 0xa81   :  { %2298 = vrot.lane.b32.xlu1 %v2287_v36, %s3709_s27  ;;  %v2113_v20 = vsub.f32 %v4618_v3, %v2036_v15  ;;  %v2077_v9 = vadd.f32 %v2064_v35, %v2047_v14 }
 0xa82   :  { %v4729_v1 = vpop.permute.xlu0 %2335 }
 0xa83   :  { %2086 = vrot.lane.b32.xlu0 %v2076_v40, %s3690_s10 }
 0xa84   :  { %v2066_v7 = vpop.permute.xlu1 %2065 }
 0xa85   :  { %2428 = vrot.lane.b32.xlu1 %v2417_v27, %s3670_s8 }
 0xa86   :  { %v4735_v19 = vpop.permute.xlu0 %2355 }
 0xa87   :  { %2125 = vrot.lane.b32.xlu0 %v2113_v20, %s3690_s10  ;;  %v2453_v20 = vsub.f32 %v4612_v60, %v2036_v15 }
 0xa88   :  { %v2151_v55 = vpop.permute.xlu1 %2150 }
 0xa89   :  { %v2163_v25 = vsub.f32 %v4612_v60, %v2151_v55  ;;  %2463 = vrot.lane.b32.xlu1 %v2452_v51, %s3670_s8  ;;  %v5164_v55 = vld [vmem:[#allocation22_spill] sm:$0xff] }
 0xa8a   :  { %v2038_v50 = vpop.permute.xlu0 %2037  ;;  %v2013_v14 = vmul.f32 %v2001_v47, %v5164_v55  ;;  %v2048_v47 = vadd.f32 %v2036_v15, %v4612_v60 }
 0xa8b   :  { %2175 = vrot.lane.b32.xlu0 %v2163_v25, %s3708_s3  ;;  %v2114_v35 = vsub.f32 %v4636_v46, %v2038_v50  ;;  %v5165_v25 = vld [vmem:[#allocation23_spill] sm:$0xff]  ;;  %v2289_v60 = vadd.f32 %v4636_v46, %v2038_v50 }
 0xa8c   :  { %v2206_v36 = vpop.permute.xlu1 %2205 }
 0xa8d   :  { %v2218_v40 = vsub.f32 %v4608_v29, %v2206_v36  ;;  %2088 = vrot.lane.b32.xlu1 %v2077_v9, %s3690_s10  ;;  %v2253_v53 = vadd.f32 %v2206_v36, %v4608_v29 }
 0xa8e   :  { %v2068_v27 = vpop.permute.xlu0 %2067 }
 0xa8f   :  { %2230 = vrot.lane.b32.xlu0 %v2218_v40, %s3709_s27  ;;  %v2288_v40 = vadd.f32 %v4618_v3, %v2036_v15 }
 0xa90   :  { %v2406_v34 = vpop.permute.xlu1 %2405 }
 0xa91   :  { %2465 = vrot.lane.b32.xlu1 %v2453_v20, %s3670_s8  ;;  %v2418_v20 = vadd.f32 %v2406_v34, %v4618_v3 }
 0xa92   :  { %v2153_v62 = vpop.permute.xlu0 %2152 }
 0xa93   :  { %2265 = vrot.lane.b32.xlu0 %v2253_v53, %s3670_s8  ;;  %v2164_v63 = vsub.f32 %v4648_v17, %v2153_v62 }
 0xa94   :  { %v2003_v51 = vpop.permute.xlu1 %2002 }
 0xa95   :  { %v2014_v9 = vmul.f32 %v2003_v51, %v5165_v25  ;;  %2127 = vrot.lane.b32.xlu1 %v2114_v35, %s3690_s10  ;;  %v2078_v35 = vadd.f32 %v2066_v7, %v2048_v47  ;;  %v2321_v47 = vmul.f32 2.0, %v4538_v18 }
 0xa96   :  { %v2208_v39 = vpop.permute.xlu0 %2207 }
 0xa97   :  { %v3492_v29 = vpack.i.bf16 %v2014_v9, %v2013_v14  ;;  %2300 = vrot.lane.b32.xlu0 %v2288_v40, %s3709_s27  ;;  %v2219_v51 = vsub.f32 %v4630_v2, %v2208_v39  ;;  %v2254_v14 = vadd.f32 %v2208_v39, %v4630_v2  ;;  %v2049_v2 = vadd.f32 %v2038_v50, %v4648_v17 }
 0xa98   :  { %v2338_v36 = vpop.permute.xlu1 %2337 }
 0xa99   :  { %2177 = vrot.lane.b32.xlu1 %v2164_v63, %s3708_s3  ;;  %v2454_v63 = vsub.f32 %v4648_v17, %v2038_v50  ;;  %v2079_v40 = vadd.f32 %v2068_v27, %v2049_v2  ;;  %v2326_v17 = vmul.f32 %v2321_v47, %v4174_v41  ;;  %v2322_v41 = vmul.f32 2.0, %v4552_v31 }
 0xa9a   :  { %v2408_v53 = vpop.permute.xlu0 %2407  ;;  %v5166_v31 = vpack.i.bf16 %v4707_v32, %v4704_v48  ;;  %v5167_v32 = vld [vmem:[#allocation24_spill] sm:$0xff] }
 0xa9b   :  { %2430 = vrot.lane.b32.xlu0 %v2418_v20, %s3670_s8  ;;  %v2419_v7 = vadd.f32 %v2408_v53, %v4636_v46 }
 0xa9c   :  { %v2358_v23 = vpop.permute.xlu1 %2357 }
 0xa9d   :  { %2232 = vrot.lane.b32.xlu1 %v2219_v51, %s3709_s27 }
 0xa9e   :  { %v2005_v62 = vpop.permute.xlu0 %2004 }
 0xa9f   :  { %2090 = vrot.lane.b32.xlu0 %v2078_v35, %s3690_s10  ;;  %v2346_v35 = vsub.f32 %v2326_v17, %v4689_v5  ;;  %v2015_v48 = vmul.f32 %v2005_v62, %v5167_v32 }
 0xaa0   :  { %v2040_v3 = vpop.permute.xlu1 %2039 }
 0xaa1   :  { %2267 = vrot.lane.b32.xlu1 %v2254_v14, %s3670_s8  ;;  %v2050_v9 = vadd.f32 %v2040_v3, %v4676_v11  ;;  %v2115_v46 = vsub.f32 %v4668_v10, %v2040_v3  ;;  %v2290_v53 = vadd.f32 %v4668_v10, %v2040_v3  ;;  %v2455_v27 = vsub.f32 %v4676_v11, %v2040_v3 }
 0xaa2   :  { %v2070_v34 = vpop.permute.xlu0 %2069  ;;  %v2366_v18 = vsub.f32 %v2346_v35, %v4692_v22  ;;  %v2324_v14 = vmul.f32 2.0, %v4572_v33  ;;  %v2327_v33 = vmul.f32 %v2322_v41, %v4176_v45  ;;  %v2325_v45 = vmul.f32 2.0, %v4582_v44 }
 0xaa3   :  { %2467 = vrot.lane.b32.xlu0 %v2454_v63, %s3670_s8  ;;  %v2080_v20 = vadd.f32 %v2070_v34, %v2050_v9 }
 0xaa4   :  { %v2155_v51 = vpop.permute.xlu1 %2154  ;;  %v2347_v3 = vsub.f32 %v2327_v33, %v4715_v59  ;;  %v2330_v59 = vmul.f32 %v2325_v45, %v5160_v21 }
 0xaa5   :  { %2302 = vrot.lane.b32.xlu1 %v2289_v60, %s3709_s27  ;;  %v2165_v50 = vsub.f32 %v4676_v11, %v2155_v51  ;;  %v2329_v11 = vmul.f32 %v2324_v14, %v5157_v52 }
 0xaa6   :  { %v2210_v15 = vpop.permute.xlu0 %2209  ;;  %v2367_v52 = vsub.f32 %v2347_v3, %v4721_v0 }
 0xaa7   :  { %v2255_v39 = vadd.f32 %v2210_v15, %v4664_v38  ;;  %v2220_v63 = vsub.f32 %v4664_v38, %v2210_v15  ;;  %v2349_v60 = vsub.f32 %v2329_v11, %v2338_v36  ;;  %v2323_v38 = vmul.f32 2.0, %v4562_v57 }
 0xaa8   :  { %v2410_v34 = vpop.permute.xlu1 %2409 }
 0xaa9   :  { %2432 = vrot.lane.b32.xlu1 %v2419_v7, %s3670_s8  ;;  %2269 = vrot.lane.b32.xlu0 %v2255_v39, %s3670_s8  ;;  %v2420_v5 = vadd.f32 %v2410_v34, %v4668_v10  ;;  %v2369_v22 = vsub.f32 %v2349_v60, %v2358_v23  ;;  %v2328_v10 = vmul.f32 %v2323_v38, %v4180_v49 }
 0xaaa   :  { %v2340_v57 = vpop.permute.xlu0 %2339 }
 0xaab   :  { %v2350_v36 = vsub.f32 %v2330_v59, %v2340_v57 }
 0xaac   :  { %v2360_v15 = vpop.permute.xlu1 %2359 }
 0xaad   :  { %2092 = vrot.lane.b32.xlu1 %v2079_v40, %s3690_s10  ;;  %2094 = vrot.lane.b32.xlu0 %v2080_v20, %s3690_s10  ;;  %v2370_v49 = vsub.f32 %v2350_v36, %v2360_v15 }
 0xab1   :  { %2129 = vrot.lane.b32.xlu1 %v2115_v46, %s3690_s10  ;;  %2304 = vrot.lane.b32.xlu0 %v2290_v53, %s3709_s27 }
 0xab5   :  { %2179 = vrot.lane.b32.xlu1 %v2165_v50, %s3708_s3  ;;  %2469 = vrot.lane.b32.xlu0 %v2455_v27, %s3670_s8 }
 0xab9   :  { %2234 = vrot.lane.b32.xlu1 %v2220_v63, %s3709_s27  ;;  %2376 = vrot.lane.b32.xlu0 %v2366_v18, %s3690_s10 }
 0xabd   :  { %2434 = vrot.lane.b32.xlu1 %v2420_v5, %s3670_s8  ;;  %3493 = vrot.lane.b32.xlu0 %v3492_v29, %s3685_s28  ;;  %v2348_v29 = vsub.f32 %v2328_v10, %v4729_v1 }
 0xabf   :  { %v2368_v23 = vsub.f32 %v2348_v29, %v4735_v19 }
 0xac1   :  { %3488 = vrot.lane.b32.xlu1 %v5166_v31, %s3685_s28  ;;  %2382 = vrot.lane.b32.xlu0 %v2369_v22, %s3690_s10 }
 0xac5   :  { %2378 = vrot.lane.b32.xlu1 %v2367_v52, %s3690_s10 }
 0xac9   :  { %2380 = vrot.lane.b32.xlu1 %v2368_v23, %s3690_s10 }
 0xacd   :  { %2499 = vrot.lane.b32.xlu1 %v2015_v48, %s3685_s28 }
 0xad1   :  { %2384 = vrot.lane.b32.xlu1 %v2370_v49, %s3690_s10 }
 0xad5   :  { %v2122_v0 = vpop.permute.xlu0 %2121 }
 0xad6   :  { %v2136_v1 = vmul.f32 %v2122_v0, %v5162_v42 }
 0xad8   :  { %v2141_v21 = vmul.f32 0.70710677, %v2136_v1 }
 0xadd   :  { %v2172_v44 = vpop.permute.xlu0 %2171 }
 0xade   :  { %v2186_v62 = vmul.f32 %v2172_v44, %v5162_v42 }
 0xadf   :  { %v2124_v7 = vpop.permute.xlu1 %2123 }
 0xae0   :  { %v2137_v19 = vmul.f32 %v2124_v7, %v5163_v16  ;;  %v2191_v53 = vmul.f32 0.70710677, %v2186_v62 }
 0xae1   :  { %v2227_v9 = vpop.permute.xlu0 %2226 }
 0xae2   :  { %v2142_v39 = vmul.f32 0.70710677, %v2137_v19  ;;  %v2241_v51 = vmul.f32 %v2227_v9, %v5162_v42 }
 0xae4   :  { %v3497_v2 = vpack.i.bf16 %v2142_v39, %v2141_v21  ;;  %v2246_v14 = vmul.f32 0.70710677, %v2241_v51 }
 0xae5   :  { %v2262_v40 = vpop.permute.xlu0 %2261 }
 0xae6   :  { %3498 = vrot.lane.b32.xlu1 %v3497_v2, %s3685_s28  ;;  %v2276_v63 = vmul.f32 %v2262_v40, %v5162_v42 }
 0xae7   :  { %v2174_v20 = vpop.permute.xlu1 %2173 }
 0xae8   :  { %v2187_v47 = vmul.f32 %v2174_v20, %v5163_v16  ;;  %v2281_v33 = vmul.f32 0.70710677, %v2276_v63 }
 0xae9   :  { %v2297_v46 = vpop.permute.xlu0 %2296 }
 0xaea   :  { %v2192_v17 = vmul.f32 0.70710677, %v2187_v47  ;;  %v2311_v38 = vmul.f32 %v2297_v46, %v5162_v42 }
 0xaeb   :  { %v2229_v50 = vpop.permute.xlu1 %2228 }
 0xaec   :  { %v3502_v27 = vpack.i.bf16 %v2192_v17, %v2191_v53  ;;  %v2242_v35 = vmul.f32 %v2229_v50, %v5163_v16  ;;  %v2316_v29 = vmul.f32 0.70710677, %v2311_v38 }
 0xaed   :  { %v2427_v18 = vpop.permute.xlu0 %2426 }
 0xaee   :  { %v2247_v34 = vmul.f32 0.70710677, %v2242_v35  ;;  %3503 = vrot.lane.b32.xlu0 %v3502_v27, %s3697_s9  ;;  %v2441_v45 = vmul.f32 %v2427_v18, %v5162_v42 }
 0xaef   :  { %v2264_v41 = vpop.permute.xlu1 %2263 }
 0xaf0   :  { %v3507_v11 = vpack.i.bf16 %v2247_v34, %v2246_v14  ;;  %v2277_v5 = vmul.f32 %v2264_v41, %v5163_v16  ;;  %v2446_v15 = vmul.f32 0.70710677, %v2441_v45 }
 0xaf1   :  { %v2462_v60 = vpop.permute.xlu0 %2461 }
 0xaf2   :  { %v2282_v22 = vmul.f32 0.70710677, %v2277_v5  ;;  %3508 = vrot.lane.b32.xlu1 %v3507_v11, %s3701_s12  ;;  %v2476_v49 = vmul.f32 %v2462_v60, %v5162_v42 }
 0xaf3   :  { %v2299_v3 = vpop.permute.xlu1 %2298 }
 0xaf4   :  { %v3512_v31 = vpack.i.bf16 %v2282_v22, %v2281_v33  ;;  %v2312_v52 = vmul.f32 %v2299_v3, %v5163_v16  ;;  %v2481_v9 = vmul.f32 0.70710677, %v2476_v49 }
 0xaf5   :  { %v2087_v10 = vpop.permute.xlu0 %2086 }
 0xaf6   :  { %v2317_v23 = vmul.f32 0.70710677, %v2312_v52  ;;  %3513 = vrot.lane.b32.xlu0 %v3512_v31, %s3701_s12  ;;  %v2101_v21 = vmul.f32 %v2087_v10, %v5162_v42 }
 0xaf7   :  { %v2429_v57 = vpop.permute.xlu1 %2428 }
 0xaf8   :  { %v3517_v59 = vpack.i.bf16 %v2317_v23, %v2316_v29  ;;  %v2442_v48 = vmul.f32 %v2429_v57, %v5163_v16  ;;  %v2106_v47 = vmul.f32 0.57735026, %v2101_v21 }
 0xaf9   :  { %v2126_v36 = vpop.permute.xlu0 %2125 }
 0xafa   :  { %v2447_v0 = vmul.f32 0.70710677, %v2442_v48  ;;  %3518 = vrot.lane.b32.xlu0 %v3517_v59, %s3700_s11  ;;  %v2138_v50 = vmul.f32 %v2126_v36, %v5164_v55 }
 0xafb   :  { %v2464_v44 = vpop.permute.xlu1 %2463 }
 0xafc   :  { %v3522_v1 = vpack.i.bf16 %v2447_v0, %v2446_v15  ;;  %v2477_v7 = vmul.f32 %v2464_v44, %v5163_v16  ;;  %v2143_v14 = vmul.f32 0.70710677, %v2138_v50 }
 0xafd   :  { %v2176_v19 = vpop.permute.xlu0 %2175 }
 0xafe   :  { %v2482_v39 = vmul.f32 0.70710677, %v2477_v7  ;;  %3523 = vrot.lane.b32.xlu1 %v3522_v1, %s3699_s7  ;;  %v2188_v63 = vmul.f32 %v2176_v19, %v5164_v55 }
 0xaff   :  { %v2089_v2 = vpop.permute.xlu1 %2088 }
 0xb00   :  { %v3527_v40 = vpack.i.bf16 %v2482_v39, %v2481_v9  ;;  %v2102_v62 = vmul.f32 %v2089_v2, %v5163_v16  ;;  %v2193_v33 = vmul.f32 0.70710677, %v2188_v63 }
 0xb01   :  { %v2231_v20 = vpop.permute.xlu0 %2230 }
 0xb02   :  { %v2107_v46 = vmul.f32 0.57735026, %v2102_v62  ;;  %3528 = vrot.lane.b32.xlu1 %v3527_v40, %s3693_s22  ;;  %v2243_v38 = vmul.f32 %v2231_v20, %v5164_v55 }
 0xb03   :  { %v2466_v53 = vpop.permute.xlu1 %2465 }
 0xb04   :  { %v3532_v51 = vpack.i.bf16 %v2107_v46, %v2106_v47  ;;  %v2248_v29 = vmul.f32 0.70710677, %v2243_v38  ;;  %v2478_v59 = vmul.f32 %v2466_v53, %v5164_v55 }
 0xb05   :  { %v2266_v17 = vpop.permute.xlu0 %2265 }
 0xb06   :  { %3533 = vrot.lane.b32.xlu0 %v3532_v51, %s3685_s28  ;;  %v2278_v45 = vmul.f32 %v2266_v17, %v5164_v55  ;;  %v2483_v19 = vmul.f32 0.70710677, %v2478_v59 }
 0xb07   :  { %v2128_v27 = vpop.permute.xlu1 %2127 }
 0xb08   :  { %v2139_v35 = vmul.f32 %v2128_v27, %v5165_v25  ;;  %v2283_v49 = vmul.f32 0.70710677, %v2278_v45 }
 0xb09   :  { %v2301_v18 = vpop.permute.xlu0 %2300 }
 0xb0a   :  { %v2144_v34 = vmul.f32 0.70710677, %v2139_v35  ;;  %v2313_v0 = vmul.f32 %v2301_v18, %v5164_v55 }
 0xb0b   :  { %v2178_v41 = vpop.permute.xlu1 %2177 }
 0xb0c   :  { %v3537_v11 = vpack.i.bf16 %v2144_v34, %v2143_v14  ;;  %v2189_v5 = vmul.f32 %v2178_v41, %v5165_v25  ;;  %v2318_v2 = vmul.f32 0.70710677, %v2313_v0 }
 0xb0d   :  { %v2431_v60 = vpop.permute.xlu0 %2430 }
 0xb0e   :  { %v2194_v22 = vmul.f32 0.70710677, %v2189_v5  ;;  %3538 = vrot.lane.b32.xlu1 %v3537_v11, %s3685_s28  ;;  %v2443_v40 = vmul.f32 %v2431_v60, %v5164_v55 }
 0xb0f   :  { %v2233_v3 = vpop.permute.xlu1 %2232 }
 0xb10   :  { %v3542_v31 = vpack.i.bf16 %v2194_v22, %v2193_v33  ;;  %v2244_v52 = vmul.f32 %v2233_v3, %v5165_v25  ;;  %v2448_v51 = vmul.f32 0.70710677, %v2443_v40 }
 0xb11   :  { %v2091_v10 = vpop.permute.xlu0 %2090 }
 0xb12   :  { %v2249_v23 = vmul.f32 0.70710677, %v2244_v52  ;;  %3543 = vrot.lane.b32.xlu1 %v3542_v31, %s3697_s9  ;;  %v2103_v17 = vmul.f32 %v2091_v10, %v5164_v55 }
 0xb13   :  { %v2268_v57 = vpop.permute.xlu1 %2267 }
 0xb14   :  { %v3547_v48 = vpack.i.bf16 %v2249_v23, %v2248_v29  ;;  %v2279_v36 = vmul.f32 %v2268_v57, %v5165_v25  ;;  %v2108_v63 = vmul.f32 0.57735026, %v2103_v17 }
 0xb15   :  { %v2468_v15 = vpop.permute.xlu0 %2467 }
 0xb16   :  { %v2284_v44 = vmul.f32 0.70710677, %v2279_v36  ;;  %v2479_v1 = vmul.f32 %v2468_v15, %v5165_v25  ;;  %3548 = vrot.lane.b32.xlu0 %v3547_v48, %s3701_s12 }
 0xb17   :  { %v2303_v7 = vpop.permute.xlu1 %2302 }
 0xb18   :  { %v3552_v9 = vpack.i.bf16 %v2284_v44, %v2283_v49  ;;  %v2484_v21 = vmul.f32 0.70710677, %v2479_v1  ;;  %v2314_v39 = vmul.f32 %v2303_v7, %v5165_v25 }
 0xb1a   :  { %v3572_v62 = vpack.i.bf16 %v2484_v21, %v2483_v19  ;;  %v2319_v20 = vmul.f32 0.70710677, %v2314_v39  ;;  %3553 = vrot.lane.b32.xlu0 %v3552_v9, %s3701_s12 }
 0xb1b   :  { %v2433_v47 = vpop.permute.xlu1 %2432  ;;  %v2270_v14 = vpop.permute.xlu0 %2269 }
 0xb1c   :  { %v3557_v46 = vpack.i.bf16 %v2319_v20, %v2318_v2  ;;  %v2444_v53 = vmul.f32 %v2433_v47, %v5165_v25  ;;  %v2280_v31 = vmul.f32 %v2270_v14, %v5167_v32 }
 0xb1e   :  { %v2449_v50 = vmul.f32 0.70710677, %v2444_v53  ;;  %3558 = vrot.lane.b32.xlu0 %v3557_v46, %s3700_s11  ;;  %v2285_v59 = vmul.f32 0.70710677, %v2280_v31 }
 0xb1f   :  { %v2093_v27 = vpop.permute.xlu1 %2092  ;;  %v2095_v5 = vpop.permute.xlu0 %2094 }
 0xb20   :  { %v3562_v35 = vpack.i.bf16 %v2449_v50, %v2448_v51  ;;  %v2104_v18 = vmul.f32 %v2093_v27, %v5165_v25  ;;  %v2105_v45 = vmul.f32 %v2095_v5, %v5167_v32 }
 0xb22   :  { %v2109_v34 = vmul.f32 0.57735026, %v2104_v18  ;;  %3563 = vrot.lane.b32.xlu0 %v3562_v35, %s3699_s7  ;;  %v2110_v36 = vmul.f32 0.57735026, %v2105_v45 }
 0xb23   :  { %v2130_v41 = vpop.permute.xlu1 %2129  ;;  %v2305_v29 = vpop.permute.xlu0 %2304 }
 0xb24   :  { %v3567_v11 = vpack.i.bf16 %v2109_v34, %v2108_v63  ;;  %v2140_v33 = vmul.f32 %v2130_v41, %v5167_v32  ;;  %v2315_v15 = vmul.f32 %v2305_v29, %v5167_v32 }
 0xb26   :  { %3568 = vrot.lane.b32.xlu1 %v3567_v11, %s3685_s28  ;;  %v2145_v52 = vmul.f32 0.70710677, %v2140_v33  ;;  %v2320_v44 = vmul.f32 0.70710677, %v2315_v15 }
 0xb27   :  { %v2180_v60 = vpop.permute.xlu1 %2179  ;;  %v2470_v49 = vpop.permute.xlu0 %2469 }
 0xb28   :  { %v2190_v38 = vmul.f32 %v2180_v60, %v5167_v32  ;;  %v2480_v1 = vmul.f32 %v2470_v49, %v5167_v32 }
 0xb2a   :  { %v2195_v22 = vmul.f32 0.70710677, %v2190_v38  ;;  %3573 = vrot.lane.b32.xlu1 %v3572_v62, %s3693_s22  ;;  %v2485_v7 = vmul.f32 0.70710677, %v2480_v1 }
 0xb2b   :  { %v2235_v3 = vpop.permute.xlu1 %2234  ;;  %v2377_v9 = vpop.permute.xlu0 %2376 }
 0xb2c   :  { %v2245_v10 = vmul.f32 %v2235_v3, %v5167_v32  ;;  %2559 = vrot.lane.b32.xlu0 %v2195_v22, %s3697_s9  ;;  %v2391_v63 = vmul.f32 %v2377_v9, %v5162_v42 }
 0xb2e   :  { %v2250_v23 = vmul.f32 0.70710677, %v2245_v10  ;;  %2539 = vrot.lane.b32.xlu1 %v2145_v52, %s3685_s28 }
 0xb2f   :  { %v2435_v57 = vpop.permute.xlu1 %2434  ;;  %v4884_v39 = vpop.permute.xlu0 %3493 }
 0xb30   :  { %v2445_v48 = vmul.f32 %v2435_v57, %v5167_v32  ;;  %2579 = vrot.lane.b32.xlu0 %v2250_v23, %s3701_s12 }
 0xb32   :  { %2599 = vrot.lane.b32.xlu1 %v2285_v59, %s3701_s12  ;;  %v2450_v0 = vmul.f32 0.70710677, %v2445_v48  ;;  %s3714_s12 = smov 38  }
 0xb33   :  { %v3489_v19 = vpop.permute.xlu1 %3488  ;;  %v4888_v40 = vpop.permute.xlu0 %2382 }
 0xb34   :  { %2519 = vrot.lane.b32.xlu0 %v2110_v36, %s3685_s28  ;;  %v3491_v27 = vunpack.i.h.bf16 %v3489_v19  ;;  %v3490_v35 = vunpack.i.l.bf16 %v3489_v19  ;;  %v2396_v36 = vmul.f32 0.4082483, %v2391_v63 }
 0xb36   :  { %2639 = vrot.lane.b32.xlu1 %v2450_v0, %s3699_s7  ;;  %s3712_s7 = smov 56  }
 0xb37   :  { %v2379_v21 = vpop.permute.xlu1 %2378 }
 0xb38   :  { %2619 = vrot.lane.b32.xlu0 %v2320_v44, %s3700_s11  ;;  %v2392_v34 = vmul.f32 %v2379_v21, %v5163_v16  ;;  %s3713_s11 = smov 74  }
 0xb3a   :  { %3046 = vrot.lane.b32.xlu1 %v4491_v28, %s3685_s28  ;;  %v2397_v15 = vmul.f32 0.4082483, %v2392_v34 }
 0xb3b   :  { %v4886_v2 = vpop.permute.xlu1 %2380 }
 0xb3c   :  { %2659 = vrot.lane.b32.xlu0 %v2485_v7, %s3693_s22 }
 0xb3f   :  { %v4890_v62 = vpop.permute.xlu1 %2499 }
 0xb43   :  { %v4892_v47 = vpop.permute.xlu1 %2384 }
 0xb58   :  { %v3499_v53 = vpop.permute.xlu1 %3498 }
 0xb59   :  { %v3501_v41 = vunpack.i.h.bf16 %v3499_v53  ;;  %v3500_v11 = vunpack.i.l.bf16 %v3499_v53 }
 0xb60   :  { %v3504_v20 = vpop.permute.xlu0 %3503 }
 0xb61   :  { %v3506_v5 = vunpack.i.h.bf16 %v3504_v20  ;;  %v3505_v60 = vunpack.i.l.bf16 %v3504_v20 }
 0xb64   :  { %v3509_v51 = vpop.permute.xlu1 %3508 }
 0xb65   :  { %v3511_v22 = vunpack.i.h.bf16 %v3509_v51  ;;  %v3510_v3 = vunpack.i.l.bf16 %v3509_v51 }
 0xb68   :  { %v3514_v46 = vpop.permute.xlu0 %3513 }
 0xb69   :  { %v3516_v10 = vunpack.i.h.bf16 %v3514_v46  ;;  %v3515_v29 = vunpack.i.l.bf16 %v3514_v46 }
 0xb6c   :  { %v3519_v28 = vpop.permute.xlu0 %3518 }
 0xb6d   :  { %v3521_v45 = vunpack.i.h.bf16 %v3519_v28  ;;  %v3520_v23 = vunpack.i.l.bf16 %v3519_v28 }
 0xb70   :  { %v3524_v17 = vpop.permute.xlu1 %3523 }
 0xb71   :  { %v3526_v44 = vunpack.i.h.bf16 %v3524_v17  ;;  %v3525_v1 = vunpack.i.l.bf16 %v3524_v17 }
 0xb74   :  { %v3529_v57 = vpop.permute.xlu1 %3528 }
 0xb75   :  { %v3531_v9 = vunpack.i.h.bf16 %v3529_v57  ;;  %v3530_v21 = vunpack.i.l.bf16 %v3529_v57 }
 0xb78   :  { %v3534_v50 = vpop.permute.xlu0 %3533 }
 0xb79   :  { %v3536_v18 = vunpack.i.h.bf16 %v3534_v50  ;;  %v3535_v14 = vunpack.i.l.bf16 %v3534_v50 }
 0xb7b   :  { %v2667_v33 = vsel %vm1545_vm13, %v3491_v27, %v3536_v18  ;;  %v2666_v38 = vsel %vm1545_vm13, %v3490_v35, %v3535_v14 }
 0xb7c   :  { %v2672_v31 = vsel %vm245_vm6, %v2667_v33, %v3501_v41  ;;  %v2671_v52 = vsel %vm245_vm6, %v2666_v38, %v3500_v11  ;;  %v3496_v41 = vunpack.i.h.bf16 %v4884_v39  ;;  %v3495_v11 = vunpack.i.l.bf16 %v4884_v39 }
 0xb7d   :  { %v2676_v42 = vsel %vm1552_vm14, %v2671_v52, %v3505_v60  ;;  %v2677_v16 = vsel %vm1552_vm14, %v2672_v31, %v3506_v5  ;;  %v2394_v33 = vmul.f32 %v4888_v40, %v5165_v25  ;;  %v2393_v38 = vmul.f32 %v4886_v2, %v5164_v55 }
 0xb7e   :  { %v2681_v59 = vsel %vm1094_vm10, %v2676_v42, %v3510_v3  ;;  %v2682_v48 = vsel %vm1094_vm10, %v2677_v16, %v3511_v22 }
 0xb7f   :  { %v2686_v49 = vsel %vm829_vm9, %v2681_v59, %v3515_v29  ;;  %v2687_v0 = vsel %vm829_vm9, %v2682_v48, %v3516_v10 }
 0xb80   :  { %v2691_v7 = vsel %vm1100_vm11, %v2686_v49, %v3520_v23  ;;  %v2692_v19 = vsel %vm1100_vm11, %v2687_v0, %v3521_v45  ;;  %v3539_v35 = vpop.permute.xlu1 %3538  ;;  %v2399_v49 = vmul.f32 0.4082483, %v2394_v33  ;;  %v2398_v0 = vmul.f32 0.4082483, %v2393_v38 }
 0xb81   :  { %v2697_v20 = vsel %vm2696_vm2, %v2691_v7, %v2396_v36  ;;  %v2698_v46 = vsel %vm2696_vm2, %v2692_v19, %v2397_v15  ;;  %v3541_v22 = vunpack.i.h.bf16 %v3539_v35 }
 0xb82   :  { %v2702_v53 = vsel %vm390_vm7, %v2697_v20, %v3525_v1  ;;  %v2703_v51 = vsel %vm390_vm7, %v2698_v46, %v3526_v44 }
 0xb83   :  { %v2708_v28 = vsel %vm2707_vm3, %v2702_v53, %v3530_v21  ;;  %v2709_v50 = vsel %vm2707_vm3, %v2703_v51, %v3531_v9 }
 0xb84   :  { %v3370_v27 = vpack.c.bf16 %v2709_v50, %v2708_v28  ;;  %v3544_v14 = vpop.permute.xlu1 %3543 }
 0xb85   :  { %v3546_v31 = vunpack.i.h.bf16 %v3544_v14  ;;  %v3545_v52 = vunpack.i.l.bf16 %v3544_v14 }
 0xb86   :  { %3371 = vmatpush3.bf16.msra.mxu0 %v3370_v27 }
 0xb87   :  { %3372 = vmatprep.subr.bf16.mxu0 %v5152_v12  ;;  %v3540_v12 = vunpack.i.l.bf16 %v3539_v35 }
 0xb88   :  { %v3549_v17 = vpop.permute.xlu0 %3548 }
 0xb89   :  { %v3551_v42 = vunpack.i.h.bf16 %v3549_v17  ;;  %v3550_v16 = vunpack.i.l.bf16 %v3549_v17 }
 0xb8c   :  { %v3554_v18 = vpop.permute.xlu0 %3553 }
 0xb8d   :  { %v3556_v25 = vunpack.i.h.bf16 %v3554_v18  ;;  %v3555_v40 = vunpack.i.l.bf16 %v3554_v18 }
 0xb90   :  { %v3559_v63 = vpop.permute.xlu0 %3558 }
 0xb91   :  { %v3561_v57 = vunpack.i.h.bf16 %v3559_v63  ;;  %v3560_v59 = vunpack.i.l.bf16 %v3559_v63 }
 0xb94   :  { %v3564_v3 = vpop.permute.xlu0 %3563 }
 0xb95   :  { %v3566_v7 = vunpack.i.h.bf16 %v3564_v3  ;;  %v3565_v19 = vunpack.i.l.bf16 %v3564_v3 }
 0xb98   :  { %v3569_v34 = vpop.permute.xlu1 %3568 }
 0xb99   :  { %v3571_v5 = vunpack.i.h.bf16 %v3569_v34  ;;  %v3570_v60 = vunpack.i.l.bf16 %v3569_v34  ;;  %v2395_v34 = vmul.f32 %v4892_v47, %v5167_v32  ;;  %v2798_v32 = vld [vmem:[#allocation2 + $0x198] sm:$0xff] }
 0xb9b   :  { %v2668_v10 = vsel %vm1545_vm13, %v3495_v11, %v3570_v60  ;;  %v2669_v29 = vsel %vm1545_vm13, %v3496_v41, %v3571_v5  ;;  %v2400_v3 = vmul.f32 0.4082483, %v2395_v34  ;;  %v5171_v34 = vld [vmem:[#allocation11_spill] sm:$0xff] }
 0xb9c   :  { %v2673_v39 = vsel %vm245_vm6, %v2668_v10, %v3540_v12  ;;  %v2674_v45 = vsel %vm245_vm6, %v2669_v29, %v3541_v22  ;;  %v3574_v23 = vpop.permute.xlu1 %3573  ;;  %v2797_v22 = vld [vmem:[#allocation2 + $0x188] sm:$0xff]  ;;  %v2799_v12 = vld [vmem:[#allocation2 + $0x1a0] sm:$0xff]  ;;  %v2801_v10 = vld [vmem:[#allocation2 + $0x1b8] sm:$0xff] }
 0xb9d   :  { %v2678_v55 = vsel %vm1552_vm14, %v2673_v39, %v3545_v52  ;;  %v2679_v2 = vsel %vm1552_vm14, %v2674_v45, %v3546_v31  ;;  %v3576_v20 = vunpack.i.h.bf16 %v3574_v23  ;;  %v3575_v46 = vunpack.i.l.bf16 %v3574_v23  ;;  %v2796_v52 = vld [vmem:[#allocation2 + $0x180] sm:$0xff] }
 0xb9e   :  { %v2683_v48 = vsel %vm1094_vm10, %v2678_v55, %v3550_v16  ;;  %v2684_v36 = vsel %vm1094_vm10, %v2679_v2, %v3551_v42  ;;  %v2560_v15 = vpop.permute.xlu0 %2559  ;;  %v3375_v16 = vpack.c.bf16 %v2799_v12, %v2797_v22  ;;  %v3377_v23 = vpack.c.bf16 %v2798_v32, %v2796_v52  ;;  %v2800_v55 = vld [vmem:[#allocation2 + $0x1b0] sm:$0xff]  ;;  %v2802_v2 = vld [vmem:[#allocation2 + $0x1c8] sm:$0xff]  ;;  %v5177_v32 = vld [vmem:[#allocation14_spill] sm:$0xff] }
 0xb9f   :  { %v2688_v44 = vsel %vm829_vm9, %v2683_v48, %v3555_v40  ;;  %v2689_v1 = vsel %vm829_vm9, %v2684_v36, %v3556_v25  ;;  %v3642_v48 = vld [vmem:[%s5080_s4 + $0x8] sm:$0xff]  ;;  %v3643_v36 = vld [vmem:[%s5080_s4 + $0x10] sm:$0xf] }
 0xba0   :  { %v2693_v9 = vsel %vm1100_vm11, %v2688_v44, %v3560_v59  ;;  %v2694_v21 = vsel %vm1100_vm11, %v2689_v1, %v3561_v57  ;;  %v2540_v28 = vpop.permute.xlu1 %2539  ;;  %v3641_v57 = vld [vmem:[%s5080_s4] sm:$0xff]  ;;  %v3381_v59 = vpack.c.bf16 %v2802_v2, %v2800_v55  ;;  %s3710_s4 = smov 92   ;;  %v5175_v12 = vld [vmem:[#allocation8_spill] sm:$0xff] }
 0xba1   :  { %v2699_v53 = vsel %vm2696_vm2, %v2693_v9, %v2398_v0  ;;  %v2700_v51 = vsel %vm2696_vm2, %v2694_v21, %v2399_v49  ;;  %v2804_v49 = vld [vmem:[#allocation2 + $0x1e0] sm:$0xff] }
 0xba2   :  { %v2704_v50 = vsel %vm390_vm7, %v2699_v53, %v3565_v19  ;;  %v2705_v27 = vsel %vm390_vm7, %v2700_v51, %v3566_v7  ;;  %v2580_v17 = vpop.permute.xlu0 %2579 }
 0xba3   :  { %v2710_v35 = vsel %vm2707_vm3, %v2704_v50, %v3575_v46  ;;  %v2711_v18 = vsel %vm2707_vm3, %v2705_v27, %v3576_v20 }
 0xba4   :  { %v3373_v14 = vpack.c.bf16 %v2711_v18, %v2710_v35  ;;  %v2600_v41 = vpop.permute.xlu1 %2599  ;;  %v5168_v35 = vld [vmem:[#allocation10_spill] sm:$0xff] }
 0xba6   :  { %v2520_v63 = vpop.permute.xlu0 %2519  ;;  %3374 = vmatpush3.bf16.msra.mxu0 %v3373_v14  ;;  %v5169_v14 = vld [vmem:[#allocation9_spill] sm:$0xff] }
 0xba7   :  { %v2670_v11 = vsel %vm1545_vm13, %v4890_v62, %v2520_v63  ;;  %3321 = vmatprep.subr.mxu0 %v5153_v37  ;;  %v2803_v62 = vld [vmem:[#allocation2 + $0x1d0] sm:$0xff] }
 0xba8   :  { %v2675_v5 = vsel %vm245_vm6, %v2670_v11, %v2540_v28  ;;  %v2640_v29 = vpop.permute.xlu1 %2639  ;;  %v3379_v40 = vpack.c.bf16 %v2803_v62, %v2801_v10  ;;  %v5170_v63 = vld [vmem:[#allocation12_spill] sm:$0xff]  ;;  %v5178_v10 = vld [vmem:[#allocation15_spill] sm:$0xff] }
 0xba9   :  { %v2680_v60 = vsel %vm1552_vm14, %v2675_v5, %v2560_v15  ;;  %v2805_v15 = vld [vmem:[#allocation2 + $0x1e8] sm:$0xff] }
 0xbaa   :  { %v2685_v33 = vsel %vm1094_vm10, %v2680_v60, %v2580_v17  ;;  %v2620_v38 = vpop.permute.xlu0 %2619  ;;  %v5173_v60 = vld [vmem:[#allocation6_spill] sm:$0xff] }
 0xbab   :  { %v2690_v31 = vsel %vm829_vm9, %v2685_v33, %v2600_v41  ;;  %v5172_v41 = vld [vmem:[#allocation13_spill] sm:$0xff] }
 0xbac   :  { %v2695_v47 = vsel %vm1100_vm11, %v2690_v31, %v2620_v38  ;;  %v5174_v38 = vld [vmem:[#allocation5_spill] sm:$0xff]  ;;  %v5176_v31 = vld [vmem:[#allocation7_spill] sm:$0xff] }
 0xbad   :  { %v2701_v42 = vsel %vm2696_vm2, %v2695_v47, %v2400_v3 }
 0xbae   :  { %v2706_v39 = vsel %vm390_vm7, %v2701_v42, %v2640_v29  ;;  %v2660_v45 = vpop.permute.xlu0 %2659  ;;  %v5179_v29 = vld [vmem:[#allocation16_spill] sm:$0xff] }
 0xbaf   :  { %v2712_v25 = vsel %vm2707_vm3, %v2706_v39, %v2660_v45  ;;  %v5180_v39 = vld [vmem:[#allocation32_spill] sm:$0xff]  ;;  %v5181_v45 = vld [vmem:[#allocation31_spill] sm:$0xff] }
 0xbb0   :  { %3322 = vmatpush3.msra.mxu0 %v2712_v25  ;;  %v5182_v25 = vld [vmem:[#allocation17_spill] sm:$0xff] }
 0xbb1   :  { %3324 = vmatmul.mubr.msk.f32.vlgmr.msra.gmra.mrb[32].mxu0 %vm1106_vm12, %v3641_v57  ;;  %3376 = vmatprep.subr.bf16.mxu0 %v3375_v16 }
 0xbb2   :  { %3326 = vmatprep.mubr.msk.f32.mxu0 %vm3672_vm0, %v5153_v37  ;;  %3378 = vmatpush1.bf16.msra.mxu0 %v3377_v23  ;;  %v3047_v23 = vpop.permute.xlu1 %3046 }
 0xbb3   :  { %3380 = vmatprep.subr.bf16.mxu0 %v3379_v40 }
 0xbb5   :  { %3327 = vmatmul.mubr.msk.f32.gmra.mrb[34].mxu0 %vm1106_vm12, %v3642_v48 }
 0xbb6   :  { %3329 = vmatprep.mubr.msk.f32.mxu0 %vm3672_vm0, %v5153_v37  ;;  %3382 = vmatpush1.bf16.msra.mxu0 %v3381_v59  ;;  %vm3033_vm0 = vcmask 15360  }
 0xbb7   :  { %2823 = vmatprep.subr.mxu0 %v2805_v15 }
 0xbb9   :  { %3330 = vmatmul.mubr.msk.f32.gmra.mrb[36].mxu0 %vm1106_vm12, %v3643_v36 }
 0xbba   :  { %2879 = vmatprep.mubr.f32.mxu0 %v5153_v37  ;;  %2824 = vmatpush1.msra.mxu0 %v2804_v49 }
 0xc84   :  { %v2779_v0 = vpop.f32.mrb[32].mxu0 }
 0xc85   :  { %v2793_v44 = vmul.f32 %v2779_v0, %v4076_v43  ;;  %v3325_v1 = vpop.f32.mrb[33].mxu0 }
 0xc87   :  { %3111 = vmatmul.mubr.msk.f32.vlgmr.msra.gmra.mrb[38].mxu0 %vm1106_vm12, %v2793_v44 }
 0xc88   :  { %v2784_v7 = vpop.f32.mrb[34].mxu0  ;;  %2885 = vmatprep.mubr.f32.mxu0 %v5153_v37 }
 0xc89   :  { %v2794_v19 = vmul.f32 %v2784_v7, %v4080_v30  ;;  %v3328_v9 = vpop.f32.mrb[35].mxu0 }
 0xc8b   :  { %3112 = vmatmul.mubr.msk.f32.gmra.mrb[40].mxu0 %vm1106_vm12, %v2794_v19 }
 0xc8c   :  { %v2789_v21 = vpop.f32.mrb[36].mxu0  ;;  %2891 = vmatprep.mubr.f32.mxu0 %v5153_v37 }
 0xc8d   :  { %v2795_v20 = vmul.f32 %v2789_v21, %v4099_v56  ;;  %v3331_v46 = vpop.f32.mrb[37].mxu0 }
 0xc8f   :  { %3113 = vmatmul.mubr.msk.f32.gmra.mrb[42].mxu0 %vm1106_vm12, %v2795_v20 }
 0xd5a   :  { %v4977_v43 = vpop.f32.mrb[38].mxu0 }
 0xd5b   :  { %v2883_v53 = vpop.f32.mrb[39].mxu0  ;;  %v2919_v51 = vmul.f32 %v4977_v43, %v3921_v6  ;;  %v2901_v30 = vmul.f32 %v4977_v43, %v3919_v4  ;;  %v2955_v28 = vmul.f32 %v4977_v43, %v3927_v24  ;;  %v2937_v50 = vmul.f32 %v4977_v43, %v3923_v8 }
 0xd5c   :  { %v2991_v27 = vmul.f32 %v4977_v43, %v3945_v61  ;;  %v2973_v17 = vmul.f32 %v4977_v43, %v3935_v54  ;;  %v3010_v8 = vmul.f32 %v2883_v53, %v3975_v26  ;;  %v3009_v24 = vmul.f32 %v4977_v43, %v3975_v26 }
 0xd5d   :  { %2925 = vrot.lane.b32.xlu0 %v2919_v51, %s3710_s4  ;;  %2907 = vrot.lane.b32.xlu1 %v2901_v30, %s3711_s5  ;;  %v2898_v40 = vmul.f32 %v4977_v43, %v5182_v25 }
 0xd5e   :  { %v4985_v37 = vpop.f32.mrb[40].mxu0 }
 0xd5f   :  { %v2889_v56 = vpop.f32.mrb[41].mxu0  ;;  %v2920_v61 = vmul.f32 %v4985_v37, %v3940_v58  ;;  %v2902_v54 = vmul.f32 %v4985_v37, %v3958_v13  ;;  %v2956_v18 = vmul.f32 %v4985_v37, %v5168_v35  ;;  %v2938_v26 = vmul.f32 %v4985_v37, %v5169_v14 }
 0xd60   :  { %v2992_v58 = vmul.f32 %v4985_v37, %v5170_v63  ;;  %v2974_v13 = vmul.f32 %v4985_v37, %v5171_v34  ;;  %v3012_v11 = vmul.f32 %v2889_v56, %v5172_v41  ;;  %v3011_v5 = vmul.f32 %v4985_v37, %v5172_v41  ;;  %v5183_v56 = vld [vmem:[#allocation19_spill] sm:$0xff] }
 0xd61   :  { %2961 = vrot.lane.b32.xlu0 %v2955_v28, %s3712_s7  ;;  %2943 = vrot.lane.b32.xlu1 %v2937_v50, %s3713_s11  ;;  %v2899_v28 = vmul.f32 %v4985_v37, %v5183_v56 }
 0xd62   :  { %v4993_v4 = vpop.f32.mrb[42].mxu0 }
 0xd63   :  { %v2895_v6 = vpop.f32.mrb[43].mxu0  ;;  %v2921_v33 = vmul.f32 %v4993_v4, %v5173_v60  ;;  %v2903_v22 = vmul.f32 %v4993_v4, %v5174_v38  ;;  %v2957_v3 = vmul.f32 %v4993_v4, %v5175_v12  ;;  %v2939_v52 = vmul.f32 %v4993_v4, %v5176_v31 }
 0xd64   :  { %v2993_v47 = vmul.f32 %v4993_v4, %v5177_v32  ;;  %v2975_v62 = vmul.f32 %v4993_v4, %v5178_v10  ;;  %v3014_v42 = vmul.f32 %v2895_v6, %v5179_v29  ;;  %v3013_v16 = vmul.f32 %v4993_v4, %v5179_v29 }
 0xd65   :  { %2997 = vrot.lane.b32.xlu0 %v2991_v27, %s3709_s27  ;;  %2979 = vrot.lane.b32.xlu1 %v2973_v17, %s3714_s12 }
 0xd69   :  { %3021 = vrot.lane.b32.xlu1 %v3009_v24, %s3715_s2  ;;  %3023 = vrot.lane.b32.xlu0 %v3010_v8, %s3715_s2 }
 0xd6d   :  { %2927 = vrot.lane.b32.xlu1 %v2920_v61, %s3710_s4  ;;  %2909 = vrot.lane.b32.xlu0 %v2902_v54, %s3711_s5  ;;  %v5184_v54 = vld [vmem:[#allocation18_spill] sm:$0xff] }
 0xd6e   :  { %v2900_v35 = vmul.f32 %v4993_v4, %v5184_v54 }
 0xd71   :  { %2963 = vrot.lane.b32.xlu1 %v2956_v18, %s3712_s7  ;;  %2945 = vrot.lane.b32.xlu0 %v2938_v26, %s3713_s11 }
 0xd75   :  { %2999 = vrot.lane.b32.xlu1 %v2992_v58, %s3709_s27  ;;  %2981 = vrot.lane.b32.xlu0 %v2974_v13, %s3714_s12 }
 0xd79   :  { %3025 = vrot.lane.b32.xlu1 %v3011_v5, %s3715_s2  ;;  %3027 = vrot.lane.b32.xlu0 %v3012_v11, %s3715_s2 }
 0xd7d   :  { %2929 = vrot.lane.b32.xlu0 %v2921_v33, %s3710_s4  ;;  %2911 = vrot.lane.b32.xlu1 %v2903_v22, %s3711_s5 }
 0xd81   :  { %2965 = vrot.lane.b32.xlu0 %v2957_v3, %s3712_s7  ;;  %2947 = vrot.lane.b32.xlu1 %v2939_v52, %s3713_s11 }
 0xd85   :  { %3001 = vrot.lane.b32.xlu0 %v2993_v47, %s3709_s27  ;;  %2983 = vrot.lane.b32.xlu1 %v2975_v62, %s3714_s12 }
 0xd89   :  { %3029 = vrot.lane.b32.xlu1 %v3013_v16, %s3715_s2  ;;  %3031 = vrot.lane.b32.xlu0 %v3014_v42, %s3715_s2 }
 0xd8d   :  { %3050 = vrot.lane.b32.xlu1 %v5180_v39, %s3685_s28  ;;  %3048 = vrot.lane.b32.xlu0 %v5181_v45, %s3685_s28 }
 0xdcf   :  { %v2926_v55 = vpop.permute.xlu0 %2925  ;;  %v2908_v2 = vpop.permute.xlu1 %2907 }
 0xdd0   :  { %v2916_v57 = vadd.f32 %v2908_v2, %v2898_v40 }
 0xdd2   :  { %v2934_v59 = vadd.f32 %v2926_v55, %v2916_v57 }
 0xdd3   :  { %v2962_v48 = vpop.permute.xlu0 %2961  ;;  %v2944_v36 = vpop.permute.xlu1 %2943 }
 0xdd4   :  { %v2952_v15 = vadd.f32 %v2944_v36, %v2934_v59 }
 0xdd6   :  { %v2970_v49 = vadd.f32 %v2962_v48, %v2952_v15 }
 0xdd7   :  { %v2998_v0 = vpop.permute.xlu0 %2997  ;;  %v2980_v44 = vpop.permute.xlu1 %2979 }
 0xdd8   :  { %v2988_v1 = vadd.f32 %v2980_v44, %v2970_v49 }
 0xdda   :  { %v3006_v7 = vadd.f32 %v2998_v0, %v2988_v1 }
 0xddb   :  { %v3022_v19 = vpop.permute.xlu1 %3021  ;;  %v3024_v9 = vpop.permute.xlu0 %3023 }
 0xddc   :  { %v3034_v21 = vsel %vm3033_vm0, %v3022_v19, %v3024_v9 }
 0xddd   :  { %v3040_v20 = vadd.f32 %v3034_v21, %v3006_v7 }
 0xddf   :  { %v3055_v46 = vadd.f32 %v3047_v23, %v3040_v20  ;;  %v2928_v43 = vpop.permute.xlu1 %2927  ;;  %v2910_v53 = vpop.permute.xlu0 %2909 }
 0xde0   :  { %v2917_v50 = vadd.f32 %v2910_v53, %v2899_v28 }
 0xde1   :  { %3058 = vst.msk [vmem:[%s5082_s6] sm:$0xff] %vm1885_vm1, %v3055_v46 }
 0xde2   :  { %v2935_v17 = vadd.f32 %v2928_v43, %v2917_v50 }
 0xde3   :  { %v2964_v51 = vpop.permute.xlu1 %2963  ;;  %v2946_v30 = vpop.permute.xlu0 %2945 }
 0xde4   :  { %v2953_v61 = vadd.f32 %v2946_v30, %v2935_v17 }
 0xde6   :  { %v2971_v63 = vadd.f32 %v2964_v51, %v2953_v61 }
 0xde7   :  { %v3000_v6 = vpop.permute.xlu1 %2999  ;;  %v2982_v27 = vpop.permute.xlu0 %2981 }
 0xde8   :  { %v2989_v11 = vadd.f32 %v2982_v27, %v2971_v63 }
 0xdea   :  { %v3007_v38 = vadd.f32 %v3000_v6, %v2989_v11 }
 0xdeb   :  { %v3026_v8 = vpop.permute.xlu1 %3025  ;;  %v3028_v24 = vpop.permute.xlu0 %3027 }
 0xdec   :  { %v3035_v12 = vsel %vm3033_vm0, %v3026_v8, %v3028_v24 }
 0xded   :  { %v3041_v32 = vadd.f32 %v3035_v12, %v3007_v38 }
 0xdef   :  { %v2930_v18 = vpop.permute.xlu0 %2929  ;;  %v2912_v14 = vpop.permute.xlu1 %2911 }
 0xdf0   :  { %v2918_v26 = vadd.f32 %v2912_v14, %v2900_v35 }
 0xdf2   :  { %v2936_v58 = vadd.f32 %v2930_v18, %v2918_v26 }
 0xdf3   :  { %v2966_v34 = vpop.permute.xlu0 %2965  ;;  %v2948_v13 = vpop.permute.xlu1 %2947 }
 0xdf4   :  { %v2954_v41 = vadd.f32 %v2948_v13, %v2936_v58 }
 0xdf6   :  { %v2972_v37 = vadd.f32 %v2966_v34, %v2954_v41 }
 0xdf7   :  { %v3002_v5 = vpop.permute.xlu0 %3001  ;;  %v2984_v60 = vpop.permute.xlu1 %2983 }
 0xdf8   :  { %v2990_v33 = vadd.f32 %v2984_v60, %v2972_v37 }
 0xdfa   :  { %v3008_v22 = vadd.f32 %v3002_v5, %v2990_v33 }
 0xdfb   :  { %v3030_v3 = vpop.permute.xlu1 %3029  ;;  %v3032_v31 = vpop.permute.xlu0 %3031 }
 0xdfc   :  { %v3036_v4 = vsel %vm3033_vm0, %v3030_v3, %v3032_v31 }
 0xdfd   :  { %v3042_v52 = vadd.f32 %v3036_v4, %v3008_v22 }
 0xdff   :  { %v3051_v47 = vpop.permute.xlu1 %3050  ;;  %v3049_v10 = vpop.permute.xlu0 %3048 }
 0xe00   :  { %v3057_v62 = vadd.f32 %v3051_v47, %v3042_v52  ;;  %v3056_v29 = vadd.f32 %v3049_v10, %v3041_v32 }
 0xe02   :  { %3061 = vst.msk [vmem:[%s5082_s6 + $0x10] sm:$0xf] %vm3060_vm4, %v3057_v62 }
 0xe03   :  { %3059 = vst.msk [vmem:[%s5082_s6 + $0x8] sm:$0xff] %vm1885_vm1, %v3056_v29 }
 0xe04   :  { %3066 = vsyncpa [#allocation3], 1 }

</bundles_post_ra>
